<compile_context>
chip_gen: v5e
topology: v5e:2x2
jax: 0.10.0
libtpu: 0.0.40
codegen_flags: <defaults>
</compile_context>

<pallas_src>
import jax
import jax.numpy as jnp
from jax import lax
from jax.experimental import pallas as pl
from jax.experimental.pallas import tpu as pltpu

HP = 128  # padded per-direction hidden width: one 128-lane group per gate


def _lstm_tagger_kernel(emb_ref,                      # (T, E)
                        wi_f_ref, wh_f_ref, b_f_ref,  # (E,4HP),(HP,4HP),(1,4HP)
                        wi_r_ref, wh_r_ref, b_r_ref,  # same shapes, reverse dir
                        wo_ref, bo_ref,               # (2HP, tagset), (1, tagset)
                        out_ref,                      # (T, tagset)
                        hid_ref):                     # scratch (T, 2HP)
    T = emb_ref.shape[0]

    emb = emb_ref[...]
    # Hoisted input projections: one (T,E)@(E,4HP) matmul per direction.
    # Gate columns are 128-lane padded (padding lanes are exact zeros).
    gx_f = jnp.dot(emb, wi_f_ref[...],
                   preferred_element_type=jnp.float32) + b_f_ref[...]
    gx_r = jnp.dot(emb, wi_r_ref[...],
                   preferred_element_type=jnp.float32) + b_r_ref[...]

    wh_f = wh_f_ref[...]
    wh_r = wh_r_ref[...]

    def cell(gx_t, h, c, wh):
        # Only the recurrent term stays inside the chain.
        gates = gx_t + jnp.dot(h, wh, preferred_element_type=jnp.float32)
        i_g = jax.nn.sigmoid(gates[:, 0 * HP:1 * HP])   # 128-lane aligned slices
        f_g = jax.nn.sigmoid(gates[:, 1 * HP:2 * HP])
        g_g = jnp.tanh(gates[:, 2 * HP:3 * HP])
        o_g = jax.nn.sigmoid(gates[:, 3 * HP:4 * HP])
        c_new = f_g * c + i_g * g_g
        h_new = o_g * jnp.tanh(c_new)
        return h_new, c_new

    zeros = jnp.zeros((1, HP), jnp.float32)
    h_f = c_f = h_b = c_b = zeros

    # Fully unrolled recurrence (static trip count).  Forward step t and
    # backward step T-1-t are computed together so their latency chains hide
    # behind each other.  Hidden states land in disjoint 128-lane halves of the
    # shared scratch: fwd -> lanes [0, HP), bwd -> lanes [HP, 2*HP).
    for t in range(T):
        tb = T - 1 - t
        h_f, c_f = cell(gx_f[t:t + 1, :], h_f, c_f, wh_f)
        h_b, c_b = cell(gx_r[tb:tb + 1, :], h_b, c_b, wh_r)
        hid_ref[t:t + 1, 0:HP] = h_f
        hid_ref[tb:tb + 1, HP:2 * HP] = h_b

    # hidden2tag linear layer straight off the scratch (no concatenate).
    tag_space = (jnp.dot(hid_ref[...], wo_ref[...],
                         preferred_element_type=jnp.float32) + bo_ref[...])

    # log_softmax over dim=1.
    m = jnp.max(tag_space, axis=1, keepdims=True)
    shifted = tag_space - m
    lse = jnp.log(jnp.sum(jnp.exp(shifted), axis=1, keepdims=True))
    out_ref[...] = shifted - lse


def _pad_gate_cols(w, Hh):
    """(rows, 4*Hh) -> (rows, 4*HP); gate g goes to lanes [g*HP, g*HP + Hh)."""
    rows = w.shape[0]
    out = jnp.zeros((rows, 4 * HP), jnp.float32)
    for g in range(4):
        out = out.at[:, g * HP:g * HP + Hh].set(w[:, g * Hh:(g + 1) * Hh])
    return out


def lstm_tagger_forward(sentence, params, *, hidden_dim, tagset_size):
    """Single-sentence LSTMTagger forward.  sentence: (T,) int32."""
    Hh = hidden_dim // 2

    # Glue: embedding gather outside the kernel.
    embeds = jnp.take(params["embedding"], sentence, axis=0).astype(jnp.float32)
    T, _E = embeds.shape

    # Pre-transpose + gate-pad weights so every in-kernel gate slice is a free,
    # 128-lane-aligned view.  All padding entries are exact zeros, so the
    # padded computation matches the unpadded one exactly at every step.
    wi_f = _pad_gate_cols(params["w_ih_f"].T, Hh)                          # (E, 4HP)
    wi_r = _pad_gate_cols(params["w_ih_r"].T, Hh)
    wh_f = jnp.zeros((HP, 4 * HP), jnp.float32).at[:Hh, :].set(
        _pad_gate_cols(params["w_hh_f"].T, Hh))                            # (HP, 4HP)
    wh_r = jnp.zeros((HP, 4 * HP), jnp.float32).at[:Hh, :].set(
        _pad_gate_cols(params["w_hh_r"].T, Hh))
    b_f = _pad_gate_cols(
        (params["b_ih_f"] + params["b_hh_f"]).reshape(1, 4 * Hh), Hh)      # (1, 4HP)
    b_r = _pad_gate_cols(
        (params["b_ih_r"] + params["b_hh_r"]).reshape(1, 4 * Hh), Hh)

    wo_t = params["w_out"].T                                               # (2Hh, tagset)
    wo = (jnp.zeros((2 * HP, tagset_size), jnp.float32)
          .at[0:Hh, :].set(wo_t[0:Hh, :])              # forward half
          .at[HP:HP + Hh, :].set(wo_t[Hh:2 * Hh, :]))  # backward half
    bo = params["b_out"].reshape(1, tagset_size).astype(jnp.float32)

    # TODO(synk): batching multiple sentences (B,T) and a parallel grid over
    # sentence blocks (v7x dual-TC) is the next throughput step but changes the
    # module's single-sentence forward interface.

    vmem = pl.BlockSpec(memory_space=pltpu.MemorySpace.VMEM)
    return pl.pallas_call(
        _lstm_tagger_kernel,
        out_shape=jax.ShapeDtypeStruct((T, tagset_size), jnp.float32),
        in_specs=[vmem] * 9,
        out_specs=vmem,
        scratch_shapes=[pltpu.VMEM((T, 2 * HP), jnp.float32)],  # [fwd ; bwd] hiddens
    )(embeds, wi_f, wh_f, b_f, wi_r, wh_r, b_r, wo, bo)


def _reference_forward(sentence, params, *, hidden_dim, tagset_size):
    """Pure-JAX f32-accurate reference mirroring torch.nn.LSTM(bidirectional)."""
    Hh = hidden_dim // 2
    P = lax.Precision.HIGHEST
    embeds = jnp.take(params["embedding"], sentence, axis=0)

    def run_dir(xs, w_ih, w_hh, b):
        def step(carry, x_t):
            h, c = carry
            g = (jnp.dot(x_t, w_ih.T, precision=P)
                 + jnp.dot(h, w_hh.T, precision=P) + b)
            i = jax.nn.sigmoid(g[0:Hh])
            f = jax.nn.sigmoid(g[Hh:2 * Hh])
            gg = jnp.tanh(g[2 * Hh:3 * Hh])
            o = jax.nn.sigmoid(g[3 * Hh:4 * Hh])
            c = f * c + i * gg
            h = o * jnp.tanh(c)
            return (h, c), h
        z = jnp.zeros((Hh,), jnp.float32)
        _, hs = lax.scan(step, (z, z), xs)
        return hs

    hf = run_dir(embeds, params["w_ih_f"], params["w_hh_f"],
                 params["b_ih_f"] + params["b_hh_f"])
    hb = run_dir(embeds[::-1], params["w_ih_r"], params["w_hh_r"],
                 params["b_ih_r"] + params["b_hh_r"])[::-1]
    lstm_out = jnp.concatenate([hf, hb], axis=-1)
    tag_space = jnp.dot(lstm_out, params["w_out"].T, precision=P) + params["b_out"]
    return jax.nn.log_softmax(tag_space, axis=1)


def init_params(key, *, embedding_dim, hidden_dim, vocab_size, tagset_size):
    Hh = hidden_dim // 2
    ks = jax.random.split(key, 11)
    s = 1.0 / jnp.sqrt(Hh)
    u = lambda k, shape, scale: jax.random.uniform(k, shape, jnp.float32, -scale, scale)
    return {
        "embedding": jax.random.normal(ks[0], (vocab_size, embedding_dim), jnp.float32),
        "w_ih_f": u(ks[1], (4 * Hh, embedding_dim), s),
        "w_hh_f": u(ks[2], (4 * Hh, Hh), s),
        "b_ih_f": u(ks[3], (4 * Hh,), s),
        "b_hh_f": u(ks[4], (4 * Hh,), s),
        "w_ih_r": u(ks[5], (4 * Hh, embedding_dim), s),
        "w_hh_r": u(ks[6], (4 * Hh, Hh), s),
        "b_ih_r": u(ks[7], (4 * Hh,), s),
        "b_hh_r": u(ks[8], (4 * Hh,), s),
        "w_out": u(ks[9], (tagset_size, hidden_dim), 1.0 / jnp.sqrt(hidden_dim)),
        "b_out": u(ks[10], (tagset_size,), 1.0 / jnp.sqrt(hidden_dim)),
    }


if __name__ == "__main__":
    EMBEDDING_DIM = 32
    HIDDEN_DIM = 32          # 16 per direction
    VOCAB_SIZE = 20
    TAGSET_SIZE = 8
    SEQ_LEN = 8

    key = jax.random.PRNGKey(0)
    pkey, skey = jax.random.split(key)
    params = init_params(pkey, embedding_dim=EMBEDDING_DIM, hidden_dim=HIDDEN_DIM,
                         vocab_size=VOCAB_SIZE, tagset_size=TAGSET_SIZE)
    sentence = jax.random.randint(skey, (SEQ_LEN,), 0, VOCAB_SIZE, dtype=jnp.int32)

    out = lstm_tagger_forward(sentence, params,
                              hidden_dim=HIDDEN_DIM, tagset_size=TAGSET_SIZE)
    out = jax.block_until_ready(out)

    ref = _reference_forward(sentence, params,
                             hidden_dim=HIDDEN_DIM, tagset_size=TAGSET_SIZE)
    assert out.shape == (SEQ_LEN, TAGSET_SIZE)
    # Kernel uses default (single-pass bf16) MXU precision per the perf review;
    # reference is f32-accurate (HIGHEST), so allow bf16-level tolerance.
    assert jnp.allclose(out, ref, atol=2e-2, rtol=2e-2), "mismatch vs JAX reference"

    print("KERNEL_OK")
</pallas_src>

<mosaic_0001>
module attributes {stable_mosaic.version = 11 : i64} {
  func.func @_lstm_tagger_kernel(%arg0: memref<8x32xf32, #tpu.memory_space<vmem>>, %arg1: memref<32x512xf32, #tpu.memory_space<vmem>>, %arg2: memref<128x512xf32, #tpu.memory_space<vmem>>, %arg3: memref<1x512xf32, #tpu.memory_space<vmem>>, %arg4: memref<32x512xf32, #tpu.memory_space<vmem>>, %arg5: memref<128x512xf32, #tpu.memory_space<vmem>>, %arg6: memref<1x512xf32, #tpu.memory_space<vmem>>, %arg7: memref<256x8xf32, #tpu.memory_space<vmem>>, %arg8: memref<1x8xf32, #tpu.memory_space<vmem>>, %arg9: memref<8x8xf32, #tpu.memory_space<vmem>>, %arg10: memref<8x256xf32, #tpu.memory_space<vmem>>) attributes {dimension_semantics = [], scalar_prefetch = 0 : i64, scratch_operands = 1 : i64, tpu.core_type = #tpu.core_type<tc>} {
    %c0 = arith.constant 0 : index
    %c0_0 = arith.constant 0 : index
    %0 = vector.load %arg0[%c0, %c0_0] : memref<8x32xf32, #tpu.memory_space<vmem>>, vector<8x32xf32>
    %c0_1 = arith.constant 0 : index
    %c0_2 = arith.constant 0 : index
    %1 = vector.load %arg1[%c0_1, %c0_2] : memref<32x512xf32, #tpu.memory_space<vmem>>, vector<32x512xf32>
    %cst = arith.constant dense<0.000000e+00> : vector<8x512xf32>
    %2 = tpu.matmul %0, %1, %cst {dimension_numbers = #tpu.dot_dimension_numbers<[1], [0], [0], [1], [0, 0, 1, 1], [], []>} : vector<8x32xf32>, vector<32x512xf32>, vector<8x512xf32> -> vector<8x512xf32>
    %c0_3 = arith.constant 0 : index
    %c0_4 = arith.constant 0 : index
    %3 = vector.load %arg3[%c0_3, %c0_4] : memref<1x512xf32, #tpu.memory_space<vmem>>, vector<1x512xf32>
    %4 = vector.broadcast %3 : vector<1x512xf32> to vector<8x512xf32>
    %5 = arith.addf %2, %4 : vector<8x512xf32>
    %c0_5 = arith.constant 0 : index
    %c0_6 = arith.constant 0 : index
    %6 = vector.load %arg4[%c0_5, %c0_6] : memref<32x512xf32, #tpu.memory_space<vmem>>, vector<32x512xf32>
    %cst_7 = arith.constant dense<0.000000e+00> : vector<8x512xf32>
    %7 = tpu.matmul %0, %6, %cst_7 {dimension_numbers = #tpu.dot_dimension_numbers<[1], [0], [0], [1], [0, 0, 1, 1], [], []>} : vector<8x32xf32>, vector<32x512xf32>, vector<8x512xf32> -> vector<8x512xf32>
    %c0_8 = arith.constant 0 : index
    %c0_9 = arith.constant 0 : index
    %8 = vector.load %arg6[%c0_8, %c0_9] : memref<1x512xf32, #tpu.memory_space<vmem>>, vector<1x512xf32>
    %9 = vector.broadcast %8 : vector<1x512xf32> to vector<8x512xf32>
    %10 = arith.addf %7, %9 : vector<8x512xf32>
    %c0_10 = arith.constant 0 : index
    %c0_11 = arith.constant 0 : index
    %11 = vector.load %arg2[%c0_10, %c0_11] : memref<128x512xf32, #tpu.memory_space<vmem>>, vector<128x512xf32>
    %c0_12 = arith.constant 0 : index
    %c0_13 = arith.constant 0 : index
    %12 = vector.load %arg5[%c0_12, %c0_13] : memref<128x512xf32, #tpu.memory_space<vmem>>, vector<128x512xf32>
    %cst_14 = arith.constant 0.000000e+00 : f32
    %13 = vector.broadcast %cst_14 : f32 to vector<1x128xf32>
    %14 = vector.extract_strided_slice %5 {offsets = [0, 0], sizes = [1, 512], strides = [1, 1]} : vector<8x512xf32> to vector<1x512xf32>
    %cst_15 = arith.constant dense<0.000000e+00> : vector<1x512xf32>
    %15 = tpu.matmul %13, %11, %cst_15 {dimension_numbers = #tpu.dot_dimension_numbers<[1], [0], [0], [1], [0, 0, 1, 1], [], []>} : vector<1x128xf32>, vector<128x512xf32>, vector<1x512xf32> -> vector<1x512xf32>
    %16 = arith.addf %14, %15 : vector<1x512xf32>
    %17 = vector.extract_strided_slice %16 {offsets = [0, 0], sizes = [1, 128], strides = [1, 1]} : vector<1x512xf32> to vector<1x128xf32>
    %18 = arith.negf %17 : vector<1x128xf32>
    %19 = math.exp %18 : vector<1x128xf32>
    %cst_16 = arith.constant 1.000000e+00 : f32
    %20 = vector.broadcast %cst_16 : f32 to vector<1x128xf32>
    %21 = arith.addf %20, %19 : vector<1x128xf32>
    %22 = arith.divf %20, %21 : vector<1x128xf32>
    %23 = vector.extract_strided_slice %16 {offsets = [0, 128], sizes = [1, 128], strides = [1, 1]} : vector<1x512xf32> to vector<1x128xf32>
    %24 = arith.negf %23 : vector<1x128xf32>
    %25 = math.exp %24 : vector<1x128xf32>
    %cst_17 = arith.constant 1.000000e+00 : f32
    %26 = vector.broadcast %cst_17 : f32 to vector<1x128xf32>
    %27 = arith.addf %26, %25 : vector<1x128xf32>
    %28 = arith.divf %26, %27 : vector<1x128xf32>
    %29 = vector.extract_strided_slice %16 {offsets = [0, 256], sizes = [1, 128], strides = [1, 1]} : vector<1x512xf32> to vector<1x128xf32>
    %30 = math.tanh %29 : vector<1x128xf32>
    %31 = vector.extract_strided_slice %16 {offsets = [0, 384], sizes = [1, 128], strides = [1, 1]} : vector<1x512xf32> to vector<1x128xf32>
    %32 = arith.negf %31 : vector<1x128xf32>
    %33 = math.exp %32 : vector<1x128xf32>
    %cst_18 = arith.constant 1.000000e+00 : f32
    %34 = vector.broadcast %cst_18 : f32 to vector<1x128xf32>
    %35 = arith.addf %34, %33 : vector<1x128xf32>
    %36 = arith.divf %34, %35 : vector<1x128xf32>
    %37 = arith.mulf %28, %13 : vector<1x128xf32>
    %38 = arith.mulf %22, %30 : vector<1x128xf32>
    %39 = arith.addf %37, %38 : vector<1x128xf32>
    %40 = math.tanh %39 : vector<1x128xf32>
    %41 = arith.mulf %36, %40 : vector<1x128xf32>
    %42 = vector.extract_strided_slice %10 {offsets = [7, 0], sizes = [1, 512], strides = [1, 1]} : vector<8x512xf32> to vector<1x512xf32>
    %cst_19 = arith.constant dense<0.000000e+00> : vector<1x512xf32>
    %43 = tpu.matmul %13, %12, %cst_19 {dimension_numbers = #tpu.dot_dimension_numbers<[1], [0], [0], [1], [0, 0, 1, 1], [], []>} : vector<1x128xf32>, vector<128x512xf32>, vector<1x512xf32> -> vector<1x512xf32>
    %44 = arith.addf %42, %43 : vector<1x512xf32>
    %45 = vector.extract_strided_slice %44 {offsets = [0, 0], sizes = [1, 128], strides = [1, 1]} : vector<1x512xf32> to vector<1x128xf32>
    %46 = arith.negf %45 : vector<1x128xf32>
    %47 = math.exp %46 : vector<1x128xf32>
    %cst_20 = arith.constant 1.000000e+00 : f32
    %48 = vector.broadcast %cst_20 : f32 to vector<1x128xf32>
    %49 = arith.addf %48, %47 : vector<1x128xf32>
    %50 = arith.divf %48, %49 : vector<1x128xf32>
    %51 = vector.extract_strided_slice %44 {offsets = [0, 128], sizes = [1, 128], strides = [1, 1]} : vector<1x512xf32> to vector<1x128xf32>
    %52 = arith.negf %51 : vector<1x128xf32>
    %53 = math.exp %52 : vector<1x128xf32>
    %cst_21 = arith.constant 1.000000e+00 : f32
    %54 = vector.broadcast %cst_21 : f32 to vector<1x128xf32>
    %55 = arith.addf %54, %53 : vector<1x128xf32>
    %56 = arith.divf %54, %55 : vector<1x128xf32>
    %57 = vector.extract_strided_slice %44 {offsets = [0, 256], sizes = [1, 128], strides = [1, 1]} : vector<1x512xf32> to vector<1x128xf32>
    %58 = math.tanh %57 : vector<1x128xf32>
    %59 = vector.extract_strided_slice %44 {offsets = [0, 384], sizes = [1, 128], strides = [1, 1]} : vector<1x512xf32> to vector<1x128xf32>
    %60 = arith.negf %59 : vector<1x128xf32>
    %61 = math.exp %60 : vector<1x128xf32>
    %cst_22 = arith.constant 1.000000e+00 : f32
    %62 = vector.broadcast %cst_22 : f32 to vector<1x128xf32>
    %63 = arith.addf %62, %61 : vector<1x128xf32>
    %64 = arith.divf %62, %63 : vector<1x128xf32>
    %65 = arith.mulf %56, %13 : vector<1x128xf32>
    %66 = arith.mulf %50, %58 : vector<1x128xf32>
    %67 = arith.addf %65, %66 : vector<1x128xf32>
    %68 = math.tanh %67 : vector<1x128xf32>
    %69 = arith.mulf %64, %68 : vector<1x128xf32>
    %c0_23 = arith.constant 0 : index
    %c0_24 = arith.constant 0 : index
    %70 = vector.load %arg10[%c0_23, %c0_24] : memref<8x256xf32, #tpu.memory_space<vmem>>, vector<1x128xf32>
    tpu.vector_store %arg10[%c0_23, %c0_24], %41 {strides = array<i32>} : memref<8x256xf32, #tpu.memory_space<vmem>>, vector<1x128xf32>,
    %c7 = arith.constant 7 : index
    %c128 = arith.constant 128 : index
    %71 = vector.load %arg10[%c7, %c128] : memref<8x256xf32, #tpu.memory_space<vmem>>, vector<1x128xf32>
    tpu.vector_store %arg10[%c7, %c128], %69 {strides = array<i32>} : memref<8x256xf32, #tpu.memory_space<vmem>>, vector<1x128xf32>,
    %72 = vector.extract_strided_slice %5 {offsets = [1, 0], sizes = [1, 512], strides = [1, 1]} : vector<8x512xf32> to vector<1x512xf32>
    %cst_25 = arith.constant dense<0.000000e+00> : vector<1x512xf32>
    %73 = tpu.matmul %41, %11, %cst_25 {dimension_numbers = #tpu.dot_dimension_numbers<[1], [0], [0], [1], [0, 0, 1, 1], [], []>} : vector<1x128xf32>, vector<128x512xf32>, vector<1x512xf32> -> vector<1x512xf32>
    %74 = arith.addf %72, %73 : vector<1x512xf32>
    %75 = vector.extract_strided_slice %74 {offsets = [0, 0], sizes = [1, 128], strides = [1, 1]} : vector<1x512xf32> to vector<1x128xf32>
    %76 = arith.negf %75 : vector<1x128xf32>
    %77 = math.exp %76 : vector<1x128xf32>
    %cst_26 = arith.constant 1.000000e+00 : f32
    %78 = vector.broadcast %cst_26 : f32 to vector<1x128xf32>
    %79 = arith.addf %78, %77 : vector<1x128xf32>
    %80 = arith.divf %78, %79 : vector<1x128xf32>
    %81 = vector.extract_strided_slice %74 {offsets = [0, 128], sizes = [1, 128], strides = [1, 1]} : vector<1x512xf32> to vector<1x128xf32>
    %82 = arith.negf %81 : vector<1x128xf32>
    %83 = math.exp %82 : vector<1x128xf32>
    %cst_27 = arith.constant 1.000000e+00 : f32
    %84 = vector.broadcast %cst_27 : f32 to vector<1x128xf32>
    %85 = arith.addf %84, %83 : vector<1x128xf32>
    %86 = arith.divf %84, %85 : vector<1x128xf32>
    %87 = vector.extract_strided_slice %74 {offsets = [0, 256], sizes = [1, 128], strides = [1, 1]} : vector<1x512xf32> to vector<1x128xf32>
    %88 = math.tanh %87 : vector<1x128xf32>
    %89 = vector.extract_strided_slice %74 {offsets = [0, 384], sizes = [1, 128], strides = [1, 1]} : vector<1x512xf32> to vector<1x128xf32>
    %90 = arith.negf %89 : vector<1x128xf32>
    %91 = math.exp %90 : vector<1x128xf32>
    %cst_28 = arith.constant 1.000000e+00 : f32
    %92 = vector.broadcast %cst_28 : f32 to vector<1x128xf32>
    %93 = arith.addf %92, %91 : vector<1x128xf32>
    %94 = arith.divf %92, %93 : vector<1x128xf32>
    %95 = arith.mulf %86, %39 : vector<1x128xf32>
    %96 = arith.mulf %80, %88 : vector<1x128xf32>
    %97 = arith.addf %95, %96 : vector<1x128xf32>
    %98 = math.tanh %97 : vector<1x128xf32>
    %99 = arith.mulf %94, %98 : vector<1x128xf32>
    %100 = vector.extract_strided_slice %10 {offsets = [6, 0], sizes = [1, 512], strides = [1, 1]} : vector<8x512xf32> to vector<1x512xf32>
    %cst_29 = arith.constant dense<0.000000e+00> : vector<1x512xf32>
    %101 = tpu.matmul %69, %12, %cst_29 {dimension_numbers = #tpu.dot_dimension_numbers<[1], [0], [0], [1], [0, 0, 1, 1], [], []>} : vector<1x128xf32>, vector<128x512xf32>, vector<1x512xf32> -> vector<1x512xf32>
    %102 = arith.addf %100, %101 : vector<1x512xf32>
    %103 = vector.extract_strided_slice %102 {offsets = [0, 0], sizes = [1, 128], strides = [1, 1]} : vector<1x512xf32> to vector<1x128xf32>
    %104 = arith.negf %103 : vector<1x128xf32>
    %105 = math.exp %104 : vector<1x128xf32>
    %cst_30 = arith.constant 1.000000e+00 : f32
    %106 = vector.broadcast %cst_30 : f32 to vector<1x128xf32>
    %107 = arith.addf %106, %105 : vector<1x128xf32>
    %108 = arith.divf %106, %107 : vector<1x128xf32>
    %109 = vector.extract_strided_slice %102 {offsets = [0, 128], sizes = [1, 128], strides = [1, 1]} : vector<1x512xf32> to vector<1x128xf32>
    %110 = arith.negf %109 : vector<1x128xf32>
    %111 = math.exp %110 : vector<1x128xf32>
    %cst_31 = arith.constant 1.000000e+00 : f32
    %112 = vector.broadcast %cst_31 : f32 to vector<1x128xf32>
    %113 = arith.addf %112, %111 : vector<1x128xf32>
    %114 = arith.divf %112, %113 : vector<1x128xf32>
    %115 = vector.extract_strided_slice %102 {offsets = [0, 256], sizes = [1, 128], strides = [1, 1]} : vector<1x512xf32> to vector<1x128xf32>
    %116 = math.tanh %115 : vector<1x128xf32>
    %117 = vector.extract_strided_slice %102 {offsets = [0, 384], sizes = [1, 128], strides = [1, 1]} : vector<1x512xf32> to vector<1x128xf32>
    %118 = arith.negf %117 : vector<1x128xf32>
    %119 = math.exp %118 : vector<1x128xf32>
    %cst_32 = arith.constant 1.000000e+00 : f32
    %120 = vector.broadcast %cst_32 : f32 to vector<1x128xf32>
    %121 = arith.addf %120, %119 : vector<1x128xf32>
    %122 = arith.divf %120, %121 : vector<1x128xf32>
    %123 = arith.mulf %114, %67 : vector<1x128xf32>
    %124 = arith.mulf %108, %116 : vector<1x128xf32>
    %125 = arith.addf %123, %124 : vector<1x128xf32>
    %126 = math.tanh %125 : vector<1x128xf32>
    %127 = arith.mulf %122, %126 : vector<1x128xf32>
    %c1 = arith.constant 1 : index
    %c0_33 = arith.constant 0 : index
    %128 = vector.load %arg10[%c1, %c0_33] : memref<8x256xf32, #tpu.memory_space<vmem>>, vector<1x128xf32>
    tpu.vector_store %arg10[%c1, %c0_33], %99 {strides = array<i32>} : memref<8x256xf32, #tpu.memory_space<vmem>>, vector<1x128xf32>,
    %c6 = arith.constant 6 : index
    %c128_34 = arith.constant 128 : index
    %129 = vector.load %arg10[%c6, %c128_34] : memref<8x256xf32, #tpu.memory_space<vmem>>, vector<1x128xf32>
    tpu.vector_store %arg10[%c6, %c128_34], %127 {strides = array<i32>} : memref<8x256xf32, #tpu.memory_space<vmem>>, vector<1x128xf32>,
    %130 = vector.extract_strided_slice %5 {offsets = [2, 0], sizes = [1, 512], strides = [1, 1]} : vector<8x512xf32> to vector<1x512xf32>
    %cst_35 = arith.constant dense<0.000000e+00> : vector<1x512xf32>
    %131 = tpu.matmul %99, %11, %cst_35 {dimension_numbers = #tpu.dot_dimension_numbers<[1], [0], [0], [1], [0, 0, 1, 1], [], []>} : vector<1x128xf32>, vector<128x512xf32>, vector<1x512xf32> -> vector<1x512xf32>
    %132 = arith.addf %130, %131 : vector<1x512xf32>
    %133 = vector.extract_strided_slice %132 {offsets = [0, 0], sizes = [1, 128], strides = [1, 1]} : vector<1x512xf32> to vector<1x128xf32>
    %134 = arith.negf %133 : vector<1x128xf32>
    %135 = math.exp %134 : vector<1x128xf32>
    %cst_36 = arith.constant 1.000000e+00 : f32
    %136 = vector.broadcast %cst_36 : f32 to vector<1x128xf32>
    %137 = arith.addf %136, %135 : vector<1x128xf32>
    %138 = arith.divf %136, %137 : vector<1x128xf32>
    %139 = vector.extract_strided_slice %132 {offsets = [0, 128], sizes = [1, 128], strides = [1, 1]} : vector<1x512xf32> to vector<1x128xf32>
    %140 = arith.negf %139 : vector<1x128xf32>
    %141 = math.exp %140 : vector<1x128xf32>
    %cst_37 = arith.constant 1.000000e+00 : f32
    %142 = vector.broadcast %cst_37 : f32 to vector<1x128xf32>
    %143 = arith.addf %142, %141 : vector<1x128xf32>
    %144 = arith.divf %142, %143 : vector<1x128xf32>
    %145 = vector.extract_strided_slice %132 {offsets = [0, 256], sizes = [1, 128], strides = [1, 1]} : vector<1x512xf32> to vector<1x128xf32>
    %146 = math.tanh %145 : vector<1x128xf32>
    %147 = vector.extract_strided_slice %132 {offsets = [0, 384], sizes = [1, 128], strides = [1, 1]} : vector<1x512xf32> to vector<1x128xf32>
    %148 = arith.negf %147 : vector<1x128xf32>
    %149 = math.exp %148 : vector<1x128xf32>
    %cst_38 = arith.constant 1.000000e+00 : f32
    %150 = vector.broadcast %cst_38 : f32 to vector<1x128xf32>
    %151 = arith.addf %150, %149 : vector<1x128xf32>
    %152 = arith.divf %150, %151 : vector<1x128xf32>
    %153 = arith.mulf %144, %97 : vector<1x128xf32>
    %154 = arith.mulf %138, %146 : vector<1x128xf32>
    %155 = arith.addf %153, %154 : vector<1x128xf32>
    %156 = math.tanh %155 : vector<1x128xf32>
    %157 = arith.mulf %152, %156 : vector<1x128xf32>
    %158 = vector.extract_strided_slice %10 {offsets = [5, 0], sizes = [1, 512], strides = [1, 1]} : vector<8x512xf32> to vector<1x512xf32>
    %cst_39 = arith.constant dense<0.000000e+00> : vector<1x512xf32>
    %159 = tpu.matmul %127, %12, %cst_39 {dimension_numbers = #tpu.dot_dimension_numbers<[1], [0], [0], [1], [0, 0, 1, 1], [], []>} : vector<1x128xf32>, vector<128x512xf32>, vector<1x512xf32> -> vector<1x512xf32>
    %160 = arith.addf %158, %159 : vector<1x512xf32>
    %161 = vector.extract_strided_slice %160 {offsets = [0, 0], sizes = [1, 128], strides = [1, 1]} : vector<1x512xf32> to vector<1x128xf32>
    %162 = arith.negf %161 : vector<1x128xf32>
    %163 = math.exp %162 : vector<1x128xf32>
    %cst_40 = arith.constant 1.000000e+00 : f32
    %164 = vector.broadcast %cst_40 : f32 to vector<1x128xf32>
    %165 = arith.addf %164, %163 : vector<1x128xf32>
    %166 = arith.divf %164, %165 : vector<1x128xf32>
    %167 = vector.extract_strided_slice %160 {offsets = [0, 128], sizes = [1, 128], strides = [1, 1]} : vector<1x512xf32> to vector<1x128xf32>
    %168 = arith.negf %167 : vector<1x128xf32>
    %169 = math.exp %168 : vector<1x128xf32>
    %cst_41 = arith.constant 1.000000e+00 : f32
    %170 = vector.broadcast %cst_41 : f32 to vector<1x128xf32>
    %171 = arith.addf %170, %169 : vector<1x128xf32>
    %172 = arith.divf %170, %171 : vector<1x128xf32>
    %173 = vector.extract_strided_slice %160 {offsets = [0, 256], sizes = [1, 128], strides = [1, 1]} : vector<1x512xf32> to vector<1x128xf32>
    %174 = math.tanh %173 : vector<1x128xf32>
    %175 = vector.extract_strided_slice %160 {offsets = [0, 384], sizes = [1, 128], strides = [1, 1]} : vector<1x512xf32> to vector<1x128xf32>
    %176 = arith.negf %175 : vector<1x128xf32>
    %177 = math.exp %176 : vector<1x128xf32>
    %cst_42 = arith.constant 1.000000e+00 : f32
    %178 = vector.broadcast %cst_42 : f32 to vector<1x128xf32>
    %179 = arith.addf %178, %177 : vector<1x128xf32>
    %180 = arith.divf %178, %179 : vector<1x128xf32>
    %181 = arith.mulf %172, %125 : vector<1x128xf32>
    %182 = arith.mulf %166, %174 : vector<1x128xf32>
    %183 = arith.addf %181, %182 : vector<1x128xf32>
    %184 = math.tanh %183 : vector<1x128xf32>
    %185 = arith.mulf %180, %184 : vector<1x128xf32>
    %c2 = arith.constant 2 : index
    %c0_43 = arith.constant 0 : index
    %186 = vector.load %arg10[%c2, %c0_43] : memref<8x256xf32, #tpu.memory_space<vmem>>, vector<1x128xf32>
    tpu.vector_store %arg10[%c2, %c0_43], %157 {strides = array<i32>} : memref<8x256xf32, #tpu.memory_space<vmem>>, vector<1x128xf32>,
    %c5 = arith.constant 5 : index
    %c128_44 = arith.constant 128 : index
    %187 = vector.load %arg10[%c5, %c128_44] : memref<8x256xf32, #tpu.memory_space<vmem>>, vector<1x128xf32>
    tpu.vector_store %arg10[%c5, %c128_44], %185 {strides = array<i32>} : memref<8x256xf32, #tpu.memory_space<vmem>>, vector<1x128xf32>,
    %188 = vector.extract_strided_slice %5 {offsets = [3, 0], sizes = [1, 512], strides = [1, 1]} : vector<8x512xf32> to vector<1x512xf32>
    %cst_45 = arith.constant dense<0.000000e+00> : vector<1x512xf32>
    %189 = tpu.matmul %157, %11, %cst_45 {dimension_numbers = #tpu.dot_dimension_numbers<[1], [0], [0], [1], [0, 0, 1, 1], [], []>} : vector<1x128xf32>, vector<128x512xf32>, vector<1x512xf32> -> vector<1x512xf32>
    %190 = arith.addf %188, %189 : vector<1x512xf32>
    %191 = vector.extract_strided_slice %190 {offsets = [0, 0], sizes = [1, 128], strides = [1, 1]} : vector<1x512xf32> to vector<1x128xf32>
    %192 = arith.negf %191 : vector<1x128xf32>
    %193 = math.exp %192 : vector<1x128xf32>
    %cst_46 = arith.constant 1.000000e+00 : f32
    %194 = vector.broadcast %cst_46 : f32 to vector<1x128xf32>
    %195 = arith.addf %194, %193 : vector<1x128xf32>
    %196 = arith.divf %194, %195 : vector<1x128xf32>
    %197 = vector.extract_strided_slice %190 {offsets = [0, 128], sizes = [1, 128], strides = [1, 1]} : vector<1x512xf32> to vector<1x128xf32>
    %198 = arith.negf %197 : vector<1x128xf32>
    %199 = math.exp %198 : vector<1x128xf32>
    %cst_47 = arith.constant 1.000000e+00 : f32
    %200 = vector.broadcast %cst_47 : f32 to vector<1x128xf32>
    %201 = arith.addf %200, %199 : vector<1x128xf32>
    %202 = arith.divf %200, %201 : vector<1x128xf32>
    %203 = vector.extract_strided_slice %190 {offsets = [0, 256], sizes = [1, 128], strides = [1, 1]} : vector<1x512xf32> to vector<1x128xf32>
    %204 = math.tanh %203 : vector<1x128xf32>
    %205 = vector.extract_strided_slice %190 {offsets = [0, 384], sizes = [1, 128], strides = [1, 1]} : vector<1x512xf32> to vector<1x128xf32>
    %206 = arith.negf %205 : vector<1x128xf32>
    %207 = math.exp %206 : vector<1x128xf32>
    %cst_48 = arith.constant 1.000000e+00 : f32
    %208 = vector.broadcast %cst_48 : f32 to vector<1x128xf32>
    %209 = arith.addf %208, %207 : vector<1x128xf32>
    %210 = arith.divf %208, %209 : vector<1x128xf32>
    %211 = arith.mulf %202, %155 : vector<1x128xf32>
    %212 = arith.mulf %196, %204 : vector<1x128xf32>
    %213 = arith.addf %211, %212 : vector<1x128xf32>
    %214 = math.tanh %213 : vector<1x128xf32>
    %215 = arith.mulf %210, %214 : vector<1x128xf32>
    %216 = vector.extract_strided_slice %10 {offsets = [4, 0], sizes = [1, 512], strides = [1, 1]} : vector<8x512xf32> to vector<1x512xf32>
    %cst_49 = arith.constant dense<0.000000e+00> : vector<1x512xf32>
    %217 = tpu.matmul %185, %12, %cst_49 {dimension_numbers = #tpu.dot_dimension_numbers<[1], [0], [0], [1], [0, 0, 1, 1], [], []>} : vector<1x128xf32>, vector<128x512xf32>, vector<1x512xf32> -> vector<1x512xf32>
    %218 = arith.addf %216, %217 : vector<1x512xf32>
    %219 = vector.extract_strided_slice %218 {offsets = [0, 0], sizes = [1, 128], strides = [1, 1]} : vector<1x512xf32> to vector<1x128xf32>
    %220 = arith.negf %219 : vector<1x128xf32>
    %221 = math.exp %220 : vector<1x128xf32>
    %cst_50 = arith.constant 1.000000e+00 : f32
    %222 = vector.broadcast %cst_50 : f32 to vector<1x128xf32>
    %223 = arith.addf %222, %221 : vector<1x128xf32>
    %224 = arith.divf %222, %223 : vector<1x128xf32>
    %225 = vector.extract_strided_slice %218 {offsets = [0, 128], sizes = [1, 128], strides = [1, 1]} : vector<1x512xf32> to vector<1x128xf32>
    %226 = arith.negf %225 : vector<1x128xf32>
    %227 = math.exp %226 : vector<1x128xf32>
    %cst_51 = arith.constant 1.000000e+00 : f32
    %228 = vector.broadcast %cst_51 : f32 to vector<1x128xf32>
    %229 = arith.addf %228, %227 : vector<1x128xf32>
    %230 = arith.divf %228, %229 : vector<1x128xf32>
    %231 = vector.extract_strided_slice %218 {offsets = [0, 256], sizes = [1, 128], strides = [1, 1]} : vector<1x512xf32> to vector<1x128xf32>
    %232 = math.tanh %231 : vector<1x128xf32>
    %233 = vector.extract_strided_slice %218 {offsets = [0, 384], sizes = [1, 128], strides = [1, 1]} : vector<1x512xf32> to vector<1x128xf32>
    %234 = arith.negf %233 : vector<1x128xf32>
    %235 = math.exp %234 : vector<1x128xf32>
    %cst_52 = arith.constant 1.000000e+00 : f32
    %236 = vector.broadcast %cst_52 : f32 to vector<1x128xf32>
    %237 = arith.addf %236, %235 : vector<1x128xf32>
    %238 = arith.divf %236, %237 : vector<1x128xf32>
    %239 = arith.mulf %230, %183 : vector<1x128xf32>
    %240 = arith.mulf %224, %232 : vector<1x128xf32>
    %241 = arith.addf %239, %240 : vector<1x128xf32>
    %242 = math.tanh %241 : vector<1x128xf32>
    %243 = arith.mulf %238, %242 : vector<1x128xf32>
    %c3 = arith.constant 3 : index
    %c0_53 = arith.constant 0 : index
    %244 = vector.load %arg10[%c3, %c0_53] : memref<8x256xf32, #tpu.memory_space<vmem>>, vector<1x128xf32>
    tpu.vector_store %arg10[%c3, %c0_53], %215 {strides = array<i32>} : memref<8x256xf32, #tpu.memory_space<vmem>>, vector<1x128xf32>,
    %c4 = arith.constant 4 : index
    %c128_54 = arith.constant 128 : index
    %245 = vector.load %arg10[%c4, %c128_54] : memref<8x256xf32, #tpu.memory_space<vmem>>, vector<1x128xf32>
    tpu.vector_store %arg10[%c4, %c128_54], %243 {strides = array<i32>} : memref<8x256xf32, #tpu.memory_space<vmem>>, vector<1x128xf32>,
    %246 = vector.extract_strided_slice %5 {offsets = [4, 0], sizes = [1, 512], strides = [1, 1]} : vector<8x512xf32> to vector<1x512xf32>
    %cst_55 = arith.constant dense<0.000000e+00> : vector<1x512xf32>
    %247 = tpu.matmul %215, %11, %cst_55 {dimension_numbers = #tpu.dot_dimension_numbers<[1], [0], [0], [1], [0, 0, 1, 1], [], []>} : vector<1x128xf32>, vector<128x512xf32>, vector<1x512xf32> -> vector<1x512xf32>
    %248 = arith.addf %246, %247 : vector<1x512xf32>
    %249 = vector.extract_strided_slice %248 {offsets = [0, 0], sizes = [1, 128], strides = [1, 1]} : vector<1x512xf32> to vector<1x128xf32>
    %250 = arith.negf %249 : vector<1x128xf32>
    %251 = math.exp %250 : vector<1x128xf32>
    %cst_56 = arith.constant 1.000000e+00 : f32
    %252 = vector.broadcast %cst_56 : f32 to vector<1x128xf32>
    %253 = arith.addf %252, %251 : vector<1x128xf32>
    %254 = arith.divf %252, %253 : vector<1x128xf32>
    %255 = vector.extract_strided_slice %248 {offsets = [0, 128], sizes = [1, 128], strides = [1, 1]} : vector<1x512xf32> to vector<1x128xf32>
    %256 = arith.negf %255 : vector<1x128xf32>
    %257 = math.exp %256 : vector<1x128xf32>
    %cst_57 = arith.constant 1.000000e+00 : f32
    %258 = vector.broadcast %cst_57 : f32 to vector<1x128xf32>
    %259 = arith.addf %258, %257 : vector<1x128xf32>
    %260 = arith.divf %258, %259 : vector<1x128xf32>
    %261 = vector.extract_strided_slice %248 {offsets = [0, 256], sizes = [1, 128], strides = [1, 1]} : vector<1x512xf32> to vector<1x128xf32>
    %262 = math.tanh %261 : vector<1x128xf32>
    %263 = vector.extract_strided_slice %248 {offsets = [0, 384], sizes = [1, 128], strides = [1, 1]} : vector<1x512xf32> to vector<1x128xf32>
    %264 = arith.negf %263 : vector<1x128xf32>
    %265 = math.exp %264 : vector<1x128xf32>
    %cst_58 = arith.constant 1.000000e+00 : f32
    %266 = vector.broadcast %cst_58 : f32 to vector<1x128xf32>
    %267 = arith.addf %266, %265 : vector<1x128xf32>
    %268 = arith.divf %266, %267 : vector<1x128xf32>
    %269 = arith.mulf %260, %213 : vector<1x128xf32>
    %270 = arith.mulf %254, %262 : vector<1x128xf32>
    %271 = arith.addf %269, %270 : vector<1x128xf32>
    %272 = math.tanh %271 : vector<1x128xf32>
    %273 = arith.mulf %268, %272 : vector<1x128xf32>
    %274 = vector.extract_strided_slice %10 {offsets = [3, 0], sizes = [1, 512], strides = [1, 1]} : vector<8x512xf32> to vector<1x512xf32>
    %cst_59 = arith.constant dense<0.000000e+00> : vector<1x512xf32>
    %275 = tpu.matmul %243, %12, %cst_59 {dimension_numbers = #tpu.dot_dimension_numbers<[1], [0], [0], [1], [0, 0, 1, 1], [], []>} : vector<1x128xf32>, vector<128x512xf32>, vector<1x512xf32> -> vector<1x512xf32>
    %276 = arith.addf %274, %275 : vector<1x512xf32>
    %277 = vector.extract_strided_slice %276 {offsets = [0, 0], sizes = [1, 128], strides = [1, 1]} : vector<1x512xf32> to vector<1x128xf32>
    %278 = arith.negf %277 : vector<1x128xf32>
    %279 = math.exp %278 : vector<1x128xf32>
    %cst_60 = arith.constant 1.000000e+00 : f32
    %280 = vector.broadcast %cst_60 : f32 to vector<1x128xf32>
    %281 = arith.addf %280, %279 : vector<1x128xf32>
    %282 = arith.divf %280, %281 : vector<1x128xf32>
    %283 = vector.extract_strided_slice %276 {offsets = [0, 128], sizes = [1, 128], strides = [1, 1]} : vector<1x512xf32> to vector<1x128xf32>
    %284 = arith.negf %283 : vector<1x128xf32>
    %285 = math.exp %284 : vector<1x128xf32>
    %cst_61 = arith.constant 1.000000e+00 : f32
    %286 = vector.broadcast %cst_61 : f32 to vector<1x128xf32>
    %287 = arith.addf %286, %285 : vector<1x128xf32>
    %288 = arith.divf %286, %287 : vector<1x128xf32>
    %289 = vector.extract_strided_slice %276 {offsets = [0, 256], sizes = [1, 128], strides = [1, 1]} : vector<1x512xf32> to vector<1x128xf32>
    %290 = math.tanh %289 : vector<1x128xf32>
    %291 = vector.extract_strided_slice %276 {offsets = [0, 384], sizes = [1, 128], strides = [1, 1]} : vector<1x512xf32> to vector<1x128xf32>
    %292 = arith.negf %291 : vector<1x128xf32>
    %293 = math.exp %292 : vector<1x128xf32>
    %cst_62 = arith.constant 1.000000e+00 : f32
    %294 = vector.broadcast %cst_62 : f32 to vector<1x128xf32>
    %295 = arith.addf %294, %293 : vector<1x128xf32>
    %296 = arith.divf %294, %295 : vector<1x128xf32>
    %297 = arith.mulf %288, %241 : vector<1x128xf32>
    %298 = arith.mulf %282, %290 : vector<1x128xf32>
    %299 = arith.addf %297, %298 : vector<1x128xf32>
    %300 = math.tanh %299 : vector<1x128xf32>
    %301 = arith.mulf %296, %300 : vector<1x128xf32>
    %c4_63 = arith.constant 4 : index
    %c0_64 = arith.constant 0 : index
    %302 = vector.load %arg10[%c4_63, %c0_64] : memref<8x256xf32, #tpu.memory_space<vmem>>, vector<1x128xf32>
    tpu.vector_store %arg10[%c4_63, %c0_64], %273 {strides = array<i32>} : memref<8x256xf32, #tpu.memory_space<vmem>>, vector<1x128xf32>,
    %c3_65 = arith.constant 3 : index
    %c128_66 = arith.constant 128 : index
    %303 = vector.load %arg10[%c3_65, %c128_66] : memref<8x256xf32, #tpu.memory_space<vmem>>, vector<1x128xf32>
    tpu.vector_store %arg10[%c3_65, %c128_66], %301 {strides = array<i32>} : memref<8x256xf32, #tpu.memory_space<vmem>>, vector<1x128xf32>,
    %304 = vector.extract_strided_slice %5 {offsets = [5, 0], sizes = [1, 512], strides = [1, 1]} : vector<8x512xf32> to vector<1x512xf32>
    %cst_67 = arith.constant dense<0.000000e+00> : vector<1x512xf32>
    %305 = tpu.matmul %273, %11, %cst_67 {dimension_numbers = #tpu.dot_dimension_numbers<[1], [0], [0], [1], [0, 0, 1, 1], [], []>} : vector<1x128xf32>, vector<128x512xf32>, vector<1x512xf32> -> vector<1x512xf32>
    %306 = arith.addf %304, %305 : vector<1x512xf32>
    %307 = vector.extract_strided_slice %306 {offsets = [0, 0], sizes = [1, 128], strides = [1, 1]} : vector<1x512xf32> to vector<1x128xf32>
    %308 = arith.negf %307 : vector<1x128xf32>
    %309 = math.exp %308 : vector<1x128xf32>
    %cst_68 = arith.constant 1.000000e+00 : f32
    %310 = vector.broadcast %cst_68 : f32 to vector<1x128xf32>
    %311 = arith.addf %310, %309 : vector<1x128xf32>
    %312 = arith.divf %310, %311 : vector<1x128xf32>
    %313 = vector.extract_strided_slice %306 {offsets = [0, 128], sizes = [1, 128], strides = [1, 1]} : vector<1x512xf32> to vector<1x128xf32>
    %314 = arith.negf %313 : vector<1x128xf32>
    %315 = math.exp %314 : vector<1x128xf32>
    %cst_69 = arith.constant 1.000000e+00 : f32
    %316 = vector.broadcast %cst_69 : f32 to vector<1x128xf32>
    %317 = arith.addf %316, %315 : vector<1x128xf32>
    %318 = arith.divf %316, %317 : vector<1x128xf32>
    %319 = vector.extract_strided_slice %306 {offsets = [0, 256], sizes = [1, 128], strides = [1, 1]} : vector<1x512xf32> to vector<1x128xf32>
    %320 = math.tanh %319 : vector<1x128xf32>
    %321 = vector.extract_strided_slice %306 {offsets = [0, 384], sizes = [1, 128], strides = [1, 1]} : vector<1x512xf32> to vector<1x128xf32>
    %322 = arith.negf %321 : vector<1x128xf32>
    %323 = math.exp %322 : vector<1x128xf32>
    %cst_70 = arith.constant 1.000000e+00 : f32
    %324 = vector.broadcast %cst_70 : f32 to vector<1x128xf32>
    %325 = arith.addf %324, %323 : vector<1x128xf32>
    %326 = arith.divf %324, %325 : vector<1x128xf32>
    %327 = arith.mulf %318, %271 : vector<1x128xf32>
    %328 = arith.mulf %312, %320 : vector<1x128xf32>
    %329 = arith.addf %327, %328 : vector<1x128xf32>
    %330 = math.tanh %329 : vector<1x128xf32>
    %331 = arith.mulf %326, %330 : vector<1x128xf32>
    %332 = vector.extract_strided_slice %10 {offsets = [2, 0], sizes = [1, 512], strides = [1, 1]} : vector<8x512xf32> to vector<1x512xf32>
    %cst_71 = arith.constant dense<0.000000e+00> : vector<1x512xf32>
    %333 = tpu.matmul %301, %12, %cst_71 {dimension_numbers = #tpu.dot_dimension_numbers<[1], [0], [0], [1], [0, 0, 1, 1], [], []>} : vector<1x128xf32>, vector<128x512xf32>, vector<1x512xf32> -> vector<1x512xf32>
    %334 = arith.addf %332, %333 : vector<1x512xf32>
    %335 = vector.extract_strided_slice %334 {offsets = [0, 0], sizes = [1, 128], strides = [1, 1]} : vector<1x512xf32> to vector<1x128xf32>
    %336 = arith.negf %335 : vector<1x128xf32>
    %337 = math.exp %336 : vector<1x128xf32>
    %cst_72 = arith.constant 1.000000e+00 : f32
    %338 = vector.broadcast %cst_72 : f32 to vector<1x128xf32>
    %339 = arith.addf %338, %337 : vector<1x128xf32>
    %340 = arith.divf %338, %339 : vector<1x128xf32>
    %341 = vector.extract_strided_slice %334 {offsets = [0, 128], sizes = [1, 128], strides = [1, 1]} : vector<1x512xf32> to vector<1x128xf32>
    %342 = arith.negf %341 : vector<1x128xf32>
    %343 = math.exp %342 : vector<1x128xf32>
    %cst_73 = arith.constant 1.000000e+00 : f32
    %344 = vector.broadcast %cst_73 : f32 to vector<1x128xf32>
    %345 = arith.addf %344, %343 : vector<1x128xf32>
    %346 = arith.divf %344, %345 : vector<1x128xf32>
    %347 = vector.extract_strided_slice %334 {offsets = [0, 256], sizes = [1, 128], strides = [1, 1]} : vector<1x512xf32> to vector<1x128xf32>
    %348 = math.tanh %347 : vector<1x128xf32>
    %349 = vector.extract_strided_slice %334 {offsets = [0, 384], sizes = [1, 128], strides = [1, 1]} : vector<1x512xf32> to vector<1x128xf32>
    %350 = arith.negf %349 : vector<1x128xf32>
    %351 = math.exp %350 : vector<1x128xf32>
    %cst_74 = arith.constant 1.000000e+00 : f32
    %352 = vector.broadcast %cst_74 : f32 to vector<1x128xf32>
    %353 = arith.addf %352, %351 : vector<1x128xf32>
    %354 = arith.divf %352, %353 : vector<1x128xf32>
    %355 = arith.mulf %346, %299 : vector<1x128xf32>
    %356 = arith.mulf %340, %348 : vector<1x128xf32>
    %357 = arith.addf %355, %356 : vector<1x128xf32>
    %358 = math.tanh %357 : vector<1x128xf32>
    %359 = arith.mulf %354, %358 : vector<1x128xf32>
    %c5_75 = arith.constant 5 : index
    %c0_76 = arith.constant 0 : index
    %360 = vector.load %arg10[%c5_75, %c0_76] : memref<8x256xf32, #tpu.memory_space<vmem>>, vector<1x128xf32>
    tpu.vector_store %arg10[%c5_75, %c0_76], %331 {strides = array<i32>} : memref<8x256xf32, #tpu.memory_space<vmem>>, vector<1x128xf32>,
    %c2_77 = arith.constant 2 : index
    %c128_78 = arith.constant 128 : index
    %361 = vector.load %arg10[%c2_77, %c128_78] : memref<8x256xf32, #tpu.memory_space<vmem>>, vector<1x128xf32>
    tpu.vector_store %arg10[%c2_77, %c128_78], %359 {strides = array<i32>} : memref<8x256xf32, #tpu.memory_space<vmem>>, vector<1x128xf32>,
    %362 = vector.extract_strided_slice %5 {offsets = [6, 0], sizes = [1, 512], strides = [1, 1]} : vector<8x512xf32> to vector<1x512xf32>
    %cst_79 = arith.constant dense<0.000000e+00> : vector<1x512xf32>
    %363 = tpu.matmul %331, %11, %cst_79 {dimension_numbers = #tpu.dot_dimension_numbers<[1], [0], [0], [1], [0, 0, 1, 1], [], []>} : vector<1x128xf32>, vector<128x512xf32>, vector<1x512xf32> -> vector<1x512xf32>
    %364 = arith.addf %362, %363 : vector<1x512xf32>
    %365 = vector.extract_strided_slice %364 {offsets = [0, 0], sizes = [1, 128], strides = [1, 1]} : vector<1x512xf32> to vector<1x128xf32>
    %366 = arith.negf %365 : vector<1x128xf32>
    %367 = math.exp %366 : vector<1x128xf32>
    %cst_80 = arith.constant 1.000000e+00 : f32
    %368 = vector.broadcast %cst_80 : f32 to vector<1x128xf32>
    %369 = arith.addf %368, %367 : vector<1x128xf32>
    %370 = arith.divf %368, %369 : vector<1x128xf32>
    %371 = vector.extract_strided_slice %364 {offsets = [0, 128], sizes = [1, 128], strides = [1, 1]} : vector<1x512xf32> to vector<1x128xf32>
    %372 = arith.negf %371 : vector<1x128xf32>
    %373 = math.exp %372 : vector<1x128xf32>
    %cst_81 = arith.constant 1.000000e+00 : f32
    %374 = vector.broadcast %cst_81 : f32 to vector<1x128xf32>
    %375 = arith.addf %374, %373 : vector<1x128xf32>
    %376 = arith.divf %374, %375 : vector<1x128xf32>
    %377 = vector.extract_strided_slice %364 {offsets = [0, 256], sizes = [1, 128], strides = [1, 1]} : vector<1x512xf32> to vector<1x128xf32>
    %378 = math.tanh %377 : vector<1x128xf32>
    %379 = vector.extract_strided_slice %364 {offsets = [0, 384], sizes = [1, 128], strides = [1, 1]} : vector<1x512xf32> to vector<1x128xf32>
    %380 = arith.negf %379 : vector<1x128xf32>
    %381 = math.exp %380 : vector<1x128xf32>
    %cst_82 = arith.constant 1.000000e+00 : f32
    %382 = vector.broadcast %cst_82 : f32 to vector<1x128xf32>
    %383 = arith.addf %382, %381 : vector<1x128xf32>
    %384 = arith.divf %382, %383 : vector<1x128xf32>
    %385 = arith.mulf %376, %329 : vector<1x128xf32>
    %386 = arith.mulf %370, %378 : vector<1x128xf32>
    %387 = arith.addf %385, %386 : vector<1x128xf32>
    %388 = math.tanh %387 : vector<1x128xf32>
    %389 = arith.mulf %384, %388 : vector<1x128xf32>
    %390 = vector.extract_strided_slice %10 {offsets = [1, 0], sizes = [1, 512], strides = [1, 1]} : vector<8x512xf32> to vector<1x512xf32>
    %cst_83 = arith.constant dense<0.000000e+00> : vector<1x512xf32>
    %391 = tpu.matmul %359, %12, %cst_83 {dimension_numbers = #tpu.dot_dimension_numbers<[1], [0], [0], [1], [0, 0, 1, 1], [], []>} : vector<1x128xf32>, vector<128x512xf32>, vector<1x512xf32> -> vector<1x512xf32>
    %392 = arith.addf %390, %391 : vector<1x512xf32>
    %393 = vector.extract_strided_slice %392 {offsets = [0, 0], sizes = [1, 128], strides = [1, 1]} : vector<1x512xf32> to vector<1x128xf32>
    %394 = arith.negf %393 : vector<1x128xf32>
    %395 = math.exp %394 : vector<1x128xf32>
    %cst_84 = arith.constant 1.000000e+00 : f32
    %396 = vector.broadcast %cst_84 : f32 to vector<1x128xf32>
    %397 = arith.addf %396, %395 : vector<1x128xf32>
    %398 = arith.divf %396, %397 : vector<1x128xf32>
    %399 = vector.extract_strided_slice %392 {offsets = [0, 128], sizes = [1, 128], strides = [1, 1]} : vector<1x512xf32> to vector<1x128xf32>
    %400 = arith.negf %399 : vector<1x128xf32>
    %401 = math.exp %400 : vector<1x128xf32>
    %cst_85 = arith.constant 1.000000e+00 : f32
    %402 = vector.broadcast %cst_85 : f32 to vector<1x128xf32>
    %403 = arith.addf %402, %401 : vector<1x128xf32>
    %404 = arith.divf %402, %403 : vector<1x128xf32>
    %405 = vector.extract_strided_slice %392 {offsets = [0, 256], sizes = [1, 128], strides = [1, 1]} : vector<1x512xf32> to vector<1x128xf32>
    %406 = math.tanh %405 : vector<1x128xf32>
    %407 = vector.extract_strided_slice %392 {offsets = [0, 384], sizes = [1, 128], strides = [1, 1]} : vector<1x512xf32> to vector<1x128xf32>
    %408 = arith.negf %407 : vector<1x128xf32>
    %409 = math.exp %408 : vector<1x128xf32>
    %cst_86 = arith.constant 1.000000e+00 : f32
    %410 = vector.broadcast %cst_86 : f32 to vector<1x128xf32>
    %411 = arith.addf %410, %409 : vector<1x128xf32>
    %412 = arith.divf %410, %411 : vector<1x128xf32>
    %413 = arith.mulf %404, %357 : vector<1x128xf32>
    %414 = arith.mulf %398, %406 : vector<1x128xf32>
    %415 = arith.addf %413, %414 : vector<1x128xf32>
    %416 = math.tanh %415 : vector<1x128xf32>
    %417 = arith.mulf %412, %416 : vector<1x128xf32>
    %c6_87 = arith.constant 6 : index
    %c0_88 = arith.constant 0 : index
    %418 = vector.load %arg10[%c6_87, %c0_88] : memref<8x256xf32, #tpu.memory_space<vmem>>, vector<1x128xf32>
    tpu.vector_store %arg10[%c6_87, %c0_88], %389 {strides = array<i32>} : memref<8x256xf32, #tpu.memory_space<vmem>>, vector<1x128xf32>,
    %c1_89 = arith.constant 1 : index
    %c128_90 = arith.constant 128 : index
    %419 = vector.load %arg10[%c1_89, %c128_90] : memref<8x256xf32, #tpu.memory_space<vmem>>, vector<1x128xf32>
    tpu.vector_store %arg10[%c1_89, %c128_90], %417 {strides = array<i32>} : memref<8x256xf32, #tpu.memory_space<vmem>>, vector<1x128xf32>,
    %420 = vector.extract_strided_slice %5 {offsets = [7, 0], sizes = [1, 512], strides = [1, 1]} : vector<8x512xf32> to vector<1x512xf32>
    %cst_91 = arith.constant dense<0.000000e+00> : vector<1x512xf32>
    %421 = tpu.matmul %389, %11, %cst_91 {dimension_numbers = #tpu.dot_dimension_numbers<[1], [0], [0], [1], [0, 0, 1, 1], [], []>} : vector<1x128xf32>, vector<128x512xf32>, vector<1x512xf32> -> vector<1x512xf32>
    %422 = arith.addf %420, %421 : vector<1x512xf32>
    %423 = vector.extract_strided_slice %422 {offsets = [0, 0], sizes = [1, 128], strides = [1, 1]} : vector<1x512xf32> to vector<1x128xf32>
    %424 = arith.negf %423 : vector<1x128xf32>
    %425 = math.exp %424 : vector<1x128xf32>
    %cst_92 = arith.constant 1.000000e+00 : f32
    %426 = vector.broadcast %cst_92 : f32 to vector<1x128xf32>
    %427 = arith.addf %426, %425 : vector<1x128xf32>
    %428 = arith.divf %426, %427 : vector<1x128xf32>
    %429 = vector.extract_strided_slice %422 {offsets = [0, 128], sizes = [1, 128], strides = [1, 1]} : vector<1x512xf32> to vector<1x128xf32>
    %430 = arith.negf %429 : vector<1x128xf32>
    %431 = math.exp %430 : vector<1x128xf32>
    %cst_93 = arith.constant 1.000000e+00 : f32
    %432 = vector.broadcast %cst_93 : f32 to vector<1x128xf32>
    %433 = arith.addf %432, %431 : vector<1x128xf32>
    %434 = arith.divf %432, %433 : vector<1x128xf32>
    %435 = vector.extract_strided_slice %422 {offsets = [0, 256], sizes = [1, 128], strides = [1, 1]} : vector<1x512xf32> to vector<1x128xf32>
    %436 = math.tanh %435 : vector<1x128xf32>
    %437 = vector.extract_strided_slice %422 {offsets = [0, 384], sizes = [1, 128], strides = [1, 1]} : vector<1x512xf32> to vector<1x128xf32>
    %438 = arith.negf %437 : vector<1x128xf32>
    %439 = math.exp %438 : vector<1x128xf32>
    %cst_94 = arith.constant 1.000000e+00 : f32
    %440 = vector.broadcast %cst_94 : f32 to vector<1x128xf32>
    %441 = arith.addf %440, %439 : vector<1x128xf32>
    %442 = arith.divf %440, %441 : vector<1x128xf32>
    %443 = arith.mulf %434, %387 : vector<1x128xf32>
    %444 = arith.mulf %428, %436 : vector<1x128xf32>
    %445 = arith.addf %443, %444 : vector<1x128xf32>
    %446 = math.tanh %445 : vector<1x128xf32>
    %447 = arith.mulf %442, %446 : vector<1x128xf32>
    %448 = vector.extract_strided_slice %10 {offsets = [0, 0], sizes = [1, 512], strides = [1, 1]} : vector<8x512xf32> to vector<1x512xf32>
    %cst_95 = arith.constant dense<0.000000e+00> : vector<1x512xf32>
    %449 = tpu.matmul %417, %12, %cst_95 {dimension_numbers = #tpu.dot_dimension_numbers<[1], [0], [0], [1], [0, 0, 1, 1], [], []>} : vector<1x128xf32>, vector<128x512xf32>, vector<1x512xf32> -> vector<1x512xf32>
    %450 = arith.addf %448, %449 : vector<1x512xf32>
    %451 = vector.extract_strided_slice %450 {offsets = [0, 0], sizes = [1, 128], strides = [1, 1]} : vector<1x512xf32> to vector<1x128xf32>
    %452 = arith.negf %451 : vector<1x128xf32>
    %453 = math.exp %452 : vector<1x128xf32>
    %cst_96 = arith.constant 1.000000e+00 : f32
    %454 = vector.broadcast %cst_96 : f32 to vector<1x128xf32>
    %455 = arith.addf %454, %453 : vector<1x128xf32>
    %456 = arith.divf %454, %455 : vector<1x128xf32>
    %457 = vector.extract_strided_slice %450 {offsets = [0, 128], sizes = [1, 128], strides = [1, 1]} : vector<1x512xf32> to vector<1x128xf32>
    %458 = arith.negf %457 : vector<1x128xf32>
    %459 = math.exp %458 : vector<1x128xf32>
    %cst_97 = arith.constant 1.000000e+00 : f32
    %460 = vector.broadcast %cst_97 : f32 to vector<1x128xf32>
    %461 = arith.addf %460, %459 : vector<1x128xf32>
    %462 = arith.divf %460, %461 : vector<1x128xf32>
    %463 = vector.extract_strided_slice %450 {offsets = [0, 256], sizes = [1, 128], strides = [1, 1]} : vector<1x512xf32> to vector<1x128xf32>
    %464 = math.tanh %463 : vector<1x128xf32>
    %465 = vector.extract_strided_slice %450 {offsets = [0, 384], sizes = [1, 128], strides = [1, 1]} : vector<1x512xf32> to vector<1x128xf32>
    %466 = arith.negf %465 : vector<1x128xf32>
    %467 = math.exp %466 : vector<1x128xf32>
    %cst_98 = arith.constant 1.000000e+00 : f32
    %468 = vector.broadcast %cst_98 : f32 to vector<1x128xf32>
    %469 = arith.addf %468, %467 : vector<1x128xf32>
    %470 = arith.divf %468, %469 : vector<1x128xf32>
    %471 = arith.mulf %462, %415 : vector<1x128xf32>
    %472 = arith.mulf %456, %464 : vector<1x128xf32>
    %473 = arith.addf %471, %472 : vector<1x128xf32>
    %474 = math.tanh %473 : vector<1x128xf32>
    %475 = arith.mulf %470, %474 : vector<1x128xf32>
    %c7_99 = arith.constant 7 : index
    %c0_100 = arith.constant 0 : index
    %476 = vector.load %arg10[%c7_99, %c0_100] : memref<8x256xf32, #tpu.memory_space<vmem>>, vector<1x128xf32>
    tpu.vector_store %arg10[%c7_99, %c0_100], %447 {strides = array<i32>} : memref<8x256xf32, #tpu.memory_space<vmem>>, vector<1x128xf32>,
    %c0_101 = arith.constant 0 : index
    %c128_102 = arith.constant 128 : index
    %477 = vector.load %arg10[%c0_101, %c128_102] : memref<8x256xf32, #tpu.memory_space<vmem>>, vector<1x128xf32>
    tpu.vector_store %arg10[%c0_101, %c128_102], %475 {strides = array<i32>} : memref<8x256xf32, #tpu.memory_space<vmem>>, vector<1x128xf32>,
    %c0_103 = arith.constant 0 : index
    %c0_104 = arith.constant 0 : index
    %478 = vector.load %arg10[%c0_103, %c0_104] : memref<8x256xf32, #tpu.memory_space<vmem>>, vector<8x256xf32>
    %c0_105 = arith.constant 0 : index
    %c0_106 = arith.constant 0 : index
    %479 = vector.load %arg7[%c0_105, %c0_106] : memref<256x8xf32, #tpu.memory_space<vmem>>, vector<256x8xf32>
    %cst_107 = arith.constant dense<0.000000e+00> : vector<8x8xf32>
    %480 = tpu.matmul %478, %479, %cst_107 {dimension_numbers = #tpu.dot_dimension_numbers<[1], [0], [0], [1], [0, 0, 1, 1], [], []>} : vector<8x256xf32>, vector<256x8xf32>, vector<8x8xf32> -> vector<8x8xf32>
    %c0_108 = arith.constant 0 : index
    %c0_109 = arith.constant 0 : index
    %481 = vector.load %arg8[%c0_108, %c0_109] : memref<1x8xf32, #tpu.memory_space<vmem>>, vector<1x8xf32>
    %482 = vector.broadcast %481 : vector<1x8xf32> to vector<8x8xf32>
    %483 = arith.addf %480, %482 : vector<8x8xf32>
    %cst_110 = arith.constant dense<0xFF800000> : vector<8xf32>
    %484 = vector.multi_reduction <maximumf>, %483, %cst_110 [1] : vector<8x8xf32> to vector<8xf32>
    %485 = vector.shape_cast %484 : vector<8xf32> to vector<8x1xf32>
    %486 = vector.broadcast %485 : vector<8x1xf32> to vector<8x8xf32>
    %487 = arith.subf %483, %486 : vector<8x8xf32>
    %488 = math.exp %487 : vector<8x8xf32>
    %cst_111 = arith.constant dense<0.000000e+00> : vector<8xf32>
    %489 = vector.multi_reduction <add>, %488, %cst_111 [1] : vector<8x8xf32> to vector<8xf32>
    %490 = vector.shape_cast %489 : vector<8xf32> to vector<8x1xf32>
    %491 = math.log %490 : vector<8x1xf32>
    %492 = vector.broadcast %491 : vector<8x1xf32> to vector<8x8xf32>
    %493 = arith.subf %487, %492 : vector<8x8xf32>
    %c0_112 = arith.constant 0 : index
    %c0_113 = arith.constant 0 : index
    %494 = vector.load %arg9[%c0_112, %c0_113] : memref<8x8xf32, #tpu.memory_space<vmem>>, vector<8x8xf32>
    tpu.vector_store %arg9[%c0_112, %c0_113], %493 {strides = array<i32>} : memref<8x8xf32, #tpu.memory_space<vmem>>, vector<8x8xf32>,
    return
  }
}

</mosaic_0001>

<bundles_post_ra>
// kernel: tpu_custom_call.1
= control target key start
LH: loop header
LB: loop body
LE: loop exit
PB: predicated region body
PF: predicated region fallthrough
CT: control target
= control target key end

     0   :  { %14 = vsyncpa [#allocation4], 0  ;;  %s6611_s0 = inlined_call_operand.vmem [shape: f32[8,32], index: 0, kind: input, shape index: {}]   ;;  %s6612_s1 = inlined_call_operand.vmem [shape: f32[32,512], index: 1, kind: input, shape index: {}]   ;;  %s6613_s2 = inlined_call_operand.hbm [shape: f32[128,512], index: 2, kind: input, shape index: {}]   ;;  %s6614_s3 = inlined_call_operand.vmem [shape: f32[1,512], index: 3, kind: input, shape index: {}]   ;;  %s6615_s4 = inlined_call_operand.vmem [shape: f32[32,512], index: 4, kind: input, shape index: {}]   ;;  %s6616_s5 = inlined_call_operand.hbm [shape: f32[128,512], index: 5, kind: input, shape index: {}]   ;;  %s6617_s6 = inlined_call_operand.vmem [shape: f32[1,512], index: 6, kind: input, shape index: {}]   ;;  %s6618_s7 = inlined_call_operand.vmem [shape: f32[256,8], index: 7, kind: input, shape index: {}]   ;;  %s6619_s8 = inlined_call_operand.vmem [shape: f32[1,8], index: 8, kind: input, shape index: {}]   ;;  %s6620_s9 = inlined_call_operand.hbm [shape: f32[8,8], index: 9, kind: output, shape index: {}]  }
   0x1   :  { %15 = vsyncpa [#allocation7], 0 }
   0x2   :  { %16 = vsyncpa [#allocation5], 0  ;;  %s25_s11 = sshll.u32 %s6613_s2, 4  ;;  %s3925_s12 = smov [#allocation3]   ;;  %s26_s11 = int_to_ptr.hbm [resolvable:$true] %s25_s11 }
   0x3   :  { %s27_s13 = sshll.u32 %s3925_s12, 4  ;;  %s42_s16 = sshll.u32 %s6616_s5, 4  ;;  %s28_s13 = int_to_ptr.vmem [resolvable:$true] %s27_s13  ;;  %s43_s16 = int_to_ptr.hbm [resolvable:$true] %s42_s16 }
   0x4   :  { %s3926_s17 = smov 512   ;;  %s3927_s18 = smov 32  }
   0x5   :  { %33 = dma.hbm_to_vmem [thread:$0]  %s26_s11, 8192, %s28_s13, [#allocation4], %s3926_s17, %s3926_s17, %s3927_s18  }
   0x6   :  { %s3928_s19 = smov [#allocation6]  }
   0x7   :  { %s44_s20 = sshll.u32 %s3928_s19, 4  ;;  %s45_s20 = int_to_ptr.vmem [resolvable:$true] %s44_s20 }
   0x8   :  { %50 = dma.hbm_to_vmem [thread:$0]  %s43_s16, 8192, %s45_s20, [#allocation7], %s3926_s17, %s3926_s17, %s3927_s18  }
   0x9   :  { %3919 = dma.done.wait [#allocation4], 8192  }
   0xa   :  { %3920 = vsyncadd [#allocation4], 4294959104 }
   0xb   :  { %3921 = dma.done.wait [#allocation7], 8192  }
   0xc   :  { %3922 = vsyncadd [#allocation7], 4294959104  ;;  %v78_v0 = vld [vmem:[%s6612_s1 + $0x60] sm:$0xff]  ;;  %v79_v1 = vld [vmem:[%s6612_s1 + $0x68] sm:$0xff]  ;;  %vm92_vm0 = vcmask 261120   ;;  %s3129_s25 = sshll.u32 %s6620_s9, 4  ;;  %s3130_s25 = int_to_ptr.hbm [resolvable:$true] %s3129_s25 }
   0xd   :  { %v3993_v2 = vld [vmem:[#allocation3 + $0x1e0] sm:$0xff]  ;;  %108 = vmatpush.msra.mxu2 %v78_v0  ;;  %128 = vmatpush.msra.mxu3 %v79_v1  ;;  %v3995_v3 = vld [vmem:[#allocation3 + $0x1e8] sm:$0xff]  ;;  %v74_v4 = vld [vmem:[%s6612_s1 + $0x40] sm:$0xff] }
   0xe   :  { %v75_v5 = vld [vmem:[%s6612_s1 + $0x48] sm:$0xff]  ;;  %410 = vmatpush.msra.mxu0 %v3993_v2  ;;  %430 = vmatpush.msra.mxu1 %v3995_v3  ;;  %v4005_v6 = vld [vmem:[#allocation3 + $0x1c0] sm:$0xff]  ;;  %v4007_v7 = vld [vmem:[#allocation3 + $0x1c8] sm:$0xff] }
   0xf   :  { %v70_v8 = vld [vmem:[%s6612_s1 + $0x20] sm:$0xff]  ;;  %109 = vmatpush.msra.mxu2 %v74_v4  ;;  %129 = vmatpush.msra.mxu3 %v75_v5  ;;  %v71_v9 = vld [vmem:[%s6612_s1 + $0x28] sm:$0xff]  ;;  %v4015_v10 = vld [vmem:[#allocation3 + $0x1a0] sm:$0xff] }
  0x10   :  { %v4017_v11 = vld [vmem:[#allocation3 + $0x1a8] sm:$0xff]  ;;  %411 = vmatpush.msra.mxu0 %v4005_v6  ;;  %431 = vmatpush.msra.mxu1 %v4007_v7  ;;  %v66_v12 = vld [vmem:[%s6612_s1] sm:$0xff]  ;;  %v67_v13 = vld [vmem:[%s6612_s1 + $0x8] sm:$0xff] }
  0x11   :  { %110 = vmatpush.msra.mxu2 %v70_v8  ;;  %130 = vmatpush.msra.mxu3 %v71_v9  ;;  %v4027_v14 = vld [vmem:[#allocation3 + $0x180] sm:$0xff]  ;;  %v4029_v15 = vld [vmem:[#allocation3 + $0x188] sm:$0xff]  ;;  %v4066_v26 = vld [vmem:[%s6611_s0] sm:$0xff] }
  0x12   :  { %412 = vmatpush.msra.mxu0 %v4015_v10  ;;  %432 = vmatpush.msra.mxu1 %v4017_v11  ;;  %v80_v16 = vld [vmem:[%s6612_s1 + $0x70] sm:$0xff]  ;;  %v81_v17 = vld [vmem:[%s6612_s1 + $0x78] sm:$0xff]  ;;  %v188_v31 = vld [vmem:[%s6615_s4 + $0x60] sm:$0xff] }
  0x13   :  { %111 = vmatpush.msra.mxu2 %v66_v12  ;;  %131 = vmatpush.msra.mxu3 %v67_v13  ;;  %v4039_v18 = vld [vmem:[#allocation3 + $0x160] sm:$0xff]  ;;  %v4041_v19 = vld [vmem:[#allocation3 + $0x168] sm:$0xff]  ;;  %v189_v32 = vld [vmem:[%s6615_s4 + $0x68] sm:$0xff] }
  0x14   :  { %413 = vmatpush.msra.mxu0 %v4027_v14  ;;  %433 = vmatpush.msra.mxu1 %v4029_v15  ;;  %v76_v20 = vld [vmem:[%s6612_s1 + $0x50] sm:$0xff]  ;;  %v77_v21 = vld [vmem:[%s6612_s1 + $0x58] sm:$0xff]  ;;  %v184_v35 = vld [vmem:[%s6615_s4 + $0x40] sm:$0xff] }
  0x15   :  { %148 = vmatpush.msrb.mxu2 %v80_v16  ;;  %168 = vmatpush.msrb.mxu3 %v81_v17  ;;  %v4051_v22 = vld [vmem:[#allocation3 + $0x140] sm:$0xff]  ;;  %v4053_v23 = vld [vmem:[#allocation3 + $0x148] sm:$0xff]  ;;  %v185_v36 = vld [vmem:[%s6615_s4 + $0x48] sm:$0xff]  ;;  %v6621_v17 = vmov 0.0  }
  0x16   :  { %414 = vmatpush.msra.mxu0 %v4039_v18  ;;  %434 = vmatpush.msra.mxu1 %v4041_v19  ;;  %v72_v24 = vld [vmem:[%s6612_s1 + $0x30] sm:$0xff]  ;;  %v73_v25 = vld [vmem:[%s6612_s1 + $0x38] sm:$0xff]  ;;  %v180_v39 = vld [vmem:[%s6615_s4 + $0x20] sm:$0xff] }
  0x17   :  { %149 = vmatpush.msrb.mxu2 %v76_v20  ;;  %169 = vmatpush.msrb.mxu3 %v77_v21  ;;  %v4070_v27 = vld [vmem:[#allocation3 + $0x120] sm:$0xff]  ;;  %v4072_v28 = vld [vmem:[#allocation3 + $0x128] sm:$0xff]  ;;  %v181_v40 = vld [vmem:[%s6615_s4 + $0x28] sm:$0xff] }
  0x18   :  { %415 = vmatpush.msra.mxu0 %v4051_v22  ;;  %435 = vmatpush.msra.mxu1 %v4053_v23  ;;  %v68_v29 = vld [vmem:[%s6612_s1 + $0x10] sm:$0xff]  ;;  %v69_v30 = vld [vmem:[%s6612_s1 + $0x18] sm:$0xff]  ;;  %v176_v43 = vld [vmem:[%s6615_s4] sm:$0xff] }
  0x19   :  { %150 = vmatpush.msrb.mxu2 %v72_v24  ;;  %170 = vmatpush.msrb.mxu3 %v73_v25  ;;  %v4092_v33 = vld [vmem:[#allocation3 + $0x100] sm:$0xff]  ;;  %v4094_v34 = vld [vmem:[#allocation3 + $0x108] sm:$0xff]  ;;  %v177_v44 = vld [vmem:[%s6615_s4 + $0x8] sm:$0xff] }
  0x1a   :  { %3140 = vmatmul.msk.f32.vlgmr.msra.gmra.mxu2 %vm92_vm0, %v4066_v26  ;;  %3141 = vmatmul.msk.f32.vlgmr.msra.gmra.mxu3 %vm92_vm0, %v4066_v26  ;;  %v4102_v37 = vld [vmem:[#allocation3 + $0xe0] sm:$0xff]  ;;  %v4104_v38 = vld [vmem:[#allocation3 + $0xe8] sm:$0xff]  ;;  %v4184_v63 = vld [vmem:[#allocation3 + $0x1f0] sm:$0xff] }
  0x1b   :  { %416 = vmatpush.msra.mxu0 %v4070_v27  ;;  %436 = vmatpush.msra.mxu1 %v4072_v28  ;;  %v4114_v41 = vld [vmem:[#allocation3 + $0xc0] sm:$0xff]  ;;  %v4116_v42 = vld [vmem:[#allocation3 + $0xc8] sm:$0xff]  ;;  %v4186_v0 = vld [vmem:[#allocation3 + $0x1f8] sm:$0xff] }
  0x1c   :  { %151 = vmatpush.msrb.mxu2 %v68_v29  ;;  %171 = vmatpush.msrb.mxu3 %v69_v30  ;;  %v4128_v45 = vld [vmem:[#allocation3 + $0xa0] sm:$0xff]  ;;  %v4130_v46 = vld [vmem:[#allocation3 + $0xa8] sm:$0xff]  ;;  %v4198_v5 = vld [vmem:[#allocation3 + $0x1d0] sm:$0xff] }
  0x1d   :  { %417 = vmatpush.msra.mxu0 %v4092_v33  ;;  %437 = vmatpush.msra.mxu1 %v4094_v34  ;;  %v190_v47 = vld [vmem:[%s6615_s4 + $0x70] sm:$0xff]  ;;  %v191_v48 = vld [vmem:[%s6615_s4 + $0x78] sm:$0xff]  ;;  %v4200_v8 = vld [vmem:[#allocation3 + $0x1d8] sm:$0xff] }
  0x1e   :  { %214 = vmatpush.msra.mxu2 %v188_v31  ;;  %234 = vmatpush.msra.mxu3 %v189_v32  ;;  %v4142_v49 = vld [vmem:[#allocation3 + $0x80] sm:$0xff]  ;;  %v4144_v50 = vld [vmem:[#allocation3 + $0x88] sm:$0xff]  ;;  %v4212_v13 = vld [vmem:[#allocation3 + $0x1b0] sm:$0xff] }
  0x1f   :  { %418 = vmatpush.msra.mxu0 %v4102_v37  ;;  %438 = vmatpush.msra.mxu1 %v4104_v38  ;;  %v186_v51 = vld [vmem:[%s6615_s4 + $0x50] sm:$0xff]  ;;  %v187_v52 = vld [vmem:[%s6615_s4 + $0x58] sm:$0xff]  ;;  %v4214_v16 = vld [vmem:[#allocation3 + $0x1b8] sm:$0xff] }
  0x20   :  { %215 = vmatpush.msra.mxu2 %v184_v35  ;;  %235 = vmatpush.msra.mxu3 %v185_v36  ;;  %v4154_v53 = vld [vmem:[#allocation3 + $0x60] sm:$0xff]  ;;  %v4156_v54 = vld [vmem:[#allocation3 + $0x68] sm:$0xff]  ;;  %v4224_v24 = vld [vmem:[#allocation3 + $0x190] sm:$0xff] }
  0x21   :  { %419 = vmatpush.msra.mxu0 %v4114_v41  ;;  %439 = vmatpush.msra.mxu1 %v4116_v42  ;;  %v182_v55 = vld [vmem:[%s6615_s4 + $0x30] sm:$0xff]  ;;  %v183_v56 = vld [vmem:[%s6615_s4 + $0x38] sm:$0xff]  ;;  %v4226_v25 = vld [vmem:[#allocation3 + $0x198] sm:$0xff] }
  0x22   :  { %216 = vmatpush.msra.mxu2 %v180_v39  ;;  %236 = vmatpush.msra.mxu3 %v181_v40  ;;  %v4166_v57 = vld [vmem:[#allocation3 + $0x40] sm:$0xff]  ;;  %v4168_v58 = vld [vmem:[#allocation3 + $0x48] sm:$0xff]  ;;  %v4236_v31 = vld [vmem:[#allocation3 + $0x170] sm:$0xff] }
  0x23   :  { %3142 = vmatmul.msk.f32.vlgmr.msrb.gmra.mxu2 %vm92_vm0, %v4066_v26  ;;  %3143 = vmatmul.msk.f32.vlgmr.msrb.gmra.mxu3 %vm92_vm0, %v4066_v26  ;;  %v178_v59 = vld [vmem:[%s6615_s4 + $0x10] sm:$0xff]  ;;  %v179_v60 = vld [vmem:[%s6615_s4 + $0x18] sm:$0xff]  ;;  %v4238_v32 = vld [vmem:[#allocation3 + $0x178] sm:$0xff] }
  0x24   :  { %217 = vmatpush.msra.mxu2 %v176_v43  ;;  %237 = vmatpush.msra.mxu3 %v177_v44  ;;  %v4180_v61 = vld [vmem:[#allocation3 + $0x20] sm:$0xff]  ;;  %v4182_v62 = vld [vmem:[#allocation3 + $0x28] sm:$0xff]  ;;  %v4248_v39 = vld [vmem:[#allocation3 + $0x150] sm:$0xff] }
  0x25   :  { %420 = vmatpush.msra.mxu0 %v4128_v45  ;;  %440 = vmatpush.msra.mxu1 %v4130_v46  ;;  %v4192_v1 = vld [vmem:[#allocation3] sm:$0xff]  ;;  %v4194_v4 = vld [vmem:[#allocation3 + $0x8] sm:$0xff]  ;;  %v4250_v40 = vld [vmem:[#allocation3 + $0x158] sm:$0xff] }
  0x26   :  { %254 = vmatpush.msrb.mxu2 %v190_v47  ;;  %274 = vmatpush.msrb.mxu3 %v191_v48  ;;  %v4206_v9 = vld [vmem:[#allocation6 + $0x1e0] sm:$0xff]  ;;  %v4208_v12 = vld [vmem:[#allocation6 + $0x1e8] sm:$0xff]  ;;  %v4260_v47 = vld [vmem:[#allocation3 + $0x130] sm:$0xff] }
  0x27   :  { %421 = vmatpush.msra.mxu0 %v4142_v49  ;;  %441 = vmatpush.msra.mxu1 %v4144_v50  ;;  %v4218_v20 = vld [vmem:[#allocation6 + $0x1c0] sm:$0xff]  ;;  %v4220_v21 = vld [vmem:[#allocation6 + $0x1c8] sm:$0xff]  ;;  %v4262_v48 = vld [vmem:[#allocation3 + $0x138] sm:$0xff] }
  0x28   :  { %255 = vmatpush.msrb.mxu2 %v186_v51  ;;  %275 = vmatpush.msrb.mxu3 %v187_v52  ;;  %v4230_v29 = vld [vmem:[#allocation6 + $0x1a0] sm:$0xff]  ;;  %v4232_v30 = vld [vmem:[#allocation6 + $0x1a8] sm:$0xff] }
  0x29   :  { %422 = vmatpush.msra.mxu0 %v4154_v53  ;;  %442 = vmatpush.msra.mxu1 %v4156_v54  ;;  %v4242_v35 = vld [vmem:[#allocation6 + $0x180] sm:$0xff]  ;;  %v4244_v36 = vld [vmem:[#allocation6 + $0x188] sm:$0xff] }
  0x2a   :  { %256 = vmatpush.msrb.mxu2 %v182_v55  ;;  %276 = vmatpush.msrb.mxu3 %v183_v56  ;;  %6889 = vst [vmem:[#allocation12_spill] sm:$0xff] %v4242_v35  ;;  %v4254_v43 = vld [vmem:[#allocation6 + $0x160] sm:$0xff]  ;;  %v4256_v44 = vld [vmem:[#allocation6 + $0x168] sm:$0xff]  ;;  %v4272_v55 = vld [vmem:[#allocation3 + $0x110] sm:$0xff] }
  0x2b   :  { %423 = vmatpush.msra.mxu0 %v4166_v57  ;;  %443 = vmatpush.msra.mxu1 %v4168_v58  ;;  %6890 = vst [vmem:[#allocation13_spill] sm:$0xff] %v4244_v36  ;;  %v4266_v51 = vld [vmem:[#allocation6 + $0x140] sm:$0xff]  ;;  %v4268_v52 = vld [vmem:[#allocation6 + $0x148] sm:$0xff]  ;;  %v4274_v56 = vld [vmem:[#allocation3 + $0x118] sm:$0xff] }
  0x2c   :  { %257 = vmatpush.msrb.mxu2 %v178_v59  ;;  %277 = vmatpush.msrb.mxu3 %v179_v60  ;;  %6891 = vst [vmem:[#allocation14_spill] sm:$0xff] %v4254_v43  ;;  %v4278_v59 = vld [vmem:[#allocation6 + $0x120] sm:$0xff]  ;;  %v4280_v60 = vld [vmem:[#allocation6 + $0x128] sm:$0xff] }
  0x2d   :  { %3144 = vmatmul.msk.f32.vlgmr.msra.gmra.mxu2 %vm92_vm0, %v4066_v26  ;;  %3145 = vmatmul.msk.f32.vlgmr.msra.gmra.mxu3 %vm92_vm0, %v4066_v26  ;;  %6892 = vst [vmem:[#allocation15_spill] sm:$0xff] %v4256_v44 }
  0x2e   :  { %424 = vmatpush.msra.mxu0 %v4180_v61  ;;  %444 = vmatpush.msra.mxu1 %v4182_v62  ;;  %6893 = vst [vmem:[#allocation16_spill] sm:$0xff] %v4266_v51 }
  0x2f   :  { %450 = vmatpush.msra.mxu2 %v4184_v63  ;;  %470 = vmatpush.msra.mxu3 %v4186_v0  ;;  %6894 = vst [vmem:[#allocation17_spill] sm:$0xff] %v4268_v52 }
  0x30   :  { %425 = vmatpush.msra.mxu0 %v4192_v1  ;;  %445 = vmatpush.msra.mxu1 %v4194_v4  ;;  %6895 = vst [vmem:[#allocation18_spill] sm:$0xff] %v4272_v55 }
  0x31   :  { %451 = vmatpush.msra.mxu2 %v4198_v5  ;;  %471 = vmatpush.msra.mxu3 %v4200_v8  ;;  %6896 = vst [vmem:[#allocation19_spill] sm:$0xff] %v4274_v56 }
  0x32   :  { %426 = vmatmul.f32.vlgmr.msra.gmra.mxu0 %v6621_v17  ;;  %446 = vmatmul.f32.vlgmr.msra.gmra.mxu1 %v6621_v17  ;;  %6897 = vst [vmem:[#allocation20_spill] sm:$0xff] %v4278_v59  ;;  %v4284_v17 = vld [vmem:[#allocation3 + $0xf0] sm:$0xff] }
  0x33   :  { %557 = vmatpush.msrb.mxu0 %v4206_v9  ;;  %577 = vmatpush.msrb.mxu1 %v4208_v12  ;;  %6898 = vst [vmem:[#allocation21_spill] sm:$0xff] %v4280_v60 }
  0x34   :  { %452 = vmatpush.msra.mxu2 %v4212_v13  ;;  %472 = vmatpush.msra.mxu3 %v4214_v16  ;;  %6899 = vst [vmem:[#allocation22_spill] sm:$0xff] %v4284_v17 }
  0x35   :  { %558 = vmatpush.msrb.mxu0 %v4218_v20  ;;  %578 = vmatpush.msrb.mxu1 %v4220_v21 }
  0x36   :  { %453 = vmatpush.msra.mxu2 %v4224_v24  ;;  %473 = vmatpush.msra.mxu3 %v4226_v25 }
  0x37   :  { %559 = vmatpush.msrb.mxu0 %v4230_v29  ;;  %579 = vmatpush.msrb.mxu1 %v4232_v30 }
  0x38   :  { %454 = vmatpush.msra.mxu2 %v4236_v31  ;;  %474 = vmatpush.msra.mxu3 %v4238_v32 }
  0x39   :  { %560 = vmatpush.msrb.mxu0 %v4242_v35  ;;  %580 = vmatpush.msrb.mxu1 %v4244_v36  ;;  %v4292_v36 = vld [vmem:[#allocation6 + $0x108] sm:$0xff]  ;;  %v4296_v35 = vld [vmem:[#allocation3 + $0xd0] sm:$0xff] }
  0x3a   :  { %455 = vmatpush.msra.mxu2 %v4248_v39  ;;  %475 = vmatpush.msra.mxu3 %v4250_v40  ;;  %6902 = vst [vmem:[#allocation25_spill] sm:$0xff] %v4292_v36 }
  0x3b   :  { %561 = vmatpush.msrb.mxu0 %v4254_v43  ;;  %581 = vmatpush.msrb.mxu1 %v4256_v44  ;;  %v4286_v43 = vld [vmem:[#allocation3 + $0xf8] sm:$0xff]  ;;  %v4290_v44 = vld [vmem:[#allocation6 + $0x100] sm:$0xff] }
  0x3c   :  { %456 = vmatpush.msra.mxu2 %v4260_v47  ;;  %476 = vmatpush.msra.mxu3 %v4262_v48  ;;  %6900 = vst [vmem:[#allocation23_spill] sm:$0xff] %v4286_v43 }
  0x3d   :  { %562 = vmatpush.msrb.mxu0 %v4266_v51  ;;  %582 = vmatpush.msrb.mxu1 %v4268_v52  ;;  %6901 = vst [vmem:[#allocation24_spill] sm:$0xff] %v4290_v44  ;;  %v4298_v51 = vld [vmem:[#allocation3 + $0xd8] sm:$0xff]  ;;  %v4302_v52 = vld [vmem:[#allocation6 + $0xe0] sm:$0xff] }
  0x3e   :  { %457 = vmatpush.msra.mxu2 %v4272_v55  ;;  %477 = vmatpush.msra.mxu3 %v4274_v56  ;;  %6903 = vst [vmem:[#allocation26_spill] sm:$0xff] %v4298_v51  ;;  %v4304_v55 = vld [vmem:[#allocation6 + $0xe8] sm:$0xff]  ;;  %v4308_v56 = vld [vmem:[#allocation3 + $0xb0] sm:$0xff] }
  0x3f   :  { %563 = vmatpush.msrb.mxu0 %v4278_v59  ;;  %583 = vmatpush.msrb.mxu1 %v4280_v60  ;;  %6904 = vst [vmem:[#allocation27_spill] sm:$0xff] %v4302_v52  ;;  %v4310_v59 = vld [vmem:[#allocation3 + $0xb8] sm:$0xff]  ;;  %v4314_v60 = vld [vmem:[#allocation6 + $0xc0] sm:$0xff] }
  0x40   :  { %458 = vmatpush.msra.mxu2 %v4284_v17  ;;  %478 = vmatpush.msra.mxu3 %v4286_v43  ;;  %6905 = vst [vmem:[#allocation28_spill] sm:$0xff] %v4304_v55  ;;  %v4316_v17 = vld [vmem:[#allocation6 + $0xc8] sm:$0xff]  ;;  %v4320_v43 = vld [vmem:[#allocation3 + $0x90] sm:$0xff] }
  0x41   :  { %564 = vmatpush.msrb.mxu0 %v4290_v44  ;;  %584 = vmatpush.msrb.mxu1 %v4292_v36  ;;  %6906 = vst [vmem:[#allocation29_spill] sm:$0xff] %v4308_v56  ;;  %v4322_v44 = vld [vmem:[#allocation3 + $0x98] sm:$0xff]  ;;  %v4328_v36 = vld [vmem:[#allocation6 + $0xa0] sm:$0xff] }
  0x42   :  { %6907 = vst [vmem:[#allocation30_spill] sm:$0xff] %v4310_v59  ;;  %459 = vmatpush.msra.mxu2 %v4296_v35  ;;  %479 = vmatpush.msra.mxu3 %v4298_v51  ;;  %v4330_v51 = vld [vmem:[#allocation6 + $0xa8] sm:$0xff] }
  0x43   :  { %6908 = vst [vmem:[#allocation31_spill] sm:$0xff] %v4314_v60  ;;  %565 = vmatpush.msrb.mxu0 %v4302_v52  ;;  %585 = vmatpush.msrb.mxu1 %v4304_v55  ;;  %v4334_v55 = vld [vmem:[#allocation3 + $0x70] sm:$0xff]  ;;  %v4336_v52 = vld [vmem:[#allocation3 + $0x78] sm:$0xff] }
  0x44   :  { %6909 = vst [vmem:[#allocation32_spill] sm:$0xff] %v4316_v17  ;;  %460 = vmatpush.msra.mxu2 %v4308_v56  ;;  %480 = vmatpush.msra.mxu3 %v4310_v59  ;;  %v4354_v59 = vld [vmem:[#allocation6 + $0x60] sm:$0xff]  ;;  %v4356_v56 = vld [vmem:[#allocation6 + $0x68] sm:$0xff] }
  0x45   :  { %6910 = vst [vmem:[#allocation33_spill] sm:$0xff] %v4320_v43  ;;  %566 = vmatpush.msrb.mxu0 %v4314_v60  ;;  %586 = vmatpush.msrb.mxu1 %v4316_v17  ;;  %v4342_v60 = vld [vmem:[#allocation6 + $0x80] sm:$0xff]  ;;  %v4344_v17 = vld [vmem:[#allocation6 + $0x88] sm:$0xff] }
  0x46   :  { %6911 = vst [vmem:[#allocation34_spill] sm:$0xff] %v4322_v44  ;;  %461 = vmatpush.msra.mxu2 %v4320_v43  ;;  %481 = vmatpush.msra.mxu3 %v4322_v44  ;;  %v4348_v43 = vld [vmem:[#allocation3 + $0x50] sm:$0xff]  ;;  %v4350_v44 = vld [vmem:[#allocation3 + $0x58] sm:$0xff] }
  0x47   :  { %6912 = vst [vmem:[#allocation35_spill] sm:$0xff] %v4328_v36  ;;  %3146 = vmatmul.msk.f32.vlgmr.msrb.gmra.mxu2 %vm92_vm0, %v4066_v26  ;;  %3147 = vmatmul.msk.f32.vlgmr.msrb.gmra.mxu3 %vm92_vm0, %v4066_v26  ;;  %v4360_v26 = vld [vmem:[#allocation3 + $0x30] sm:$0xff] }
  0x48   :  { %6913 = vst [vmem:[#allocation36_spill] sm:$0xff] %v4330_v51  ;;  %567 = vmatpush.msrb.mxu0 %v4328_v36  ;;  %587 = vmatpush.msrb.mxu1 %v4330_v51  ;;  %v4362_v36 = vld [vmem:[#allocation3 + $0x38] sm:$0xff]  ;;  %v4366_v51 = vld [vmem:[#allocation6 + $0x40] sm:$0xff] }
  0x49   :  { %6914 = vst [vmem:[#allocation37_spill] sm:$0xff] %v4334_v55  ;;  %462 = vmatpush.msra.mxu2 %v4334_v55  ;;  %482 = vmatpush.msra.mxu3 %v4336_v52  ;;  %v4368_v55 = vld [vmem:[#allocation6 + $0x48] sm:$0xff] }
  0x4a   :  { %6915 = vst [vmem:[#allocation38_spill] sm:$0xff] %v4336_v52  ;;  %568 = vmatpush.msrb.mxu0 %v4342_v60  ;;  %588 = vmatpush.msrb.mxu1 %v4344_v17  ;;  %v4372_v52 = vld [vmem:[#allocation3 + $0x10] sm:$0xff] }
  0x4b   :  { %6916 = vst [vmem:[#allocation39_spill] sm:$0xff] %v4342_v60  ;;  %463 = vmatpush.msra.mxu2 %v4348_v43  ;;  %483 = vmatpush.msra.mxu3 %v4350_v44  ;;  %v4374_v60 = vld [vmem:[#allocation3 + $0x18] sm:$0xff] }
  0x4c   :  { %6917 = vst [vmem:[#allocation40_spill] sm:$0xff] %v4344_v17  ;;  %569 = vmatpush.msrb.mxu0 %v4354_v59  ;;  %589 = vmatpush.msrb.mxu1 %v4356_v56  ;;  %v4380_v17 = vld [vmem:[#allocation6 + $0x20] sm:$0xff] }
  0x4d   :  { %6918 = vst [vmem:[#allocation41_spill] sm:$0xff] %v4348_v43  ;;  %464 = vmatpush.msra.mxu2 %v4360_v26  ;;  %484 = vmatpush.msra.mxu3 %v4362_v36  ;;  %v6931_v43 = vmov 0.0  }
  0x4e   :  { %6919 = vst [vmem:[#allocation42_spill] sm:$0xff] %v4350_v44  ;;  %570 = vmatpush.msrb.mxu0 %v4366_v51  ;;  %590 = vmatpush.msrb.mxu1 %v4368_v55  ;;  %v4382_v44 = vld [vmem:[#allocation6 + $0x28] sm:$0xff] }
  0x4f   :  { %6920 = vst [vmem:[#allocation43_spill] sm:$0xff] %v4354_v59  ;;  %465 = vmatpush.msra.mxu2 %v4372_v52  ;;  %485 = vmatpush.msra.mxu3 %v4374_v60  ;;  %v4388_v59 = vld [vmem:[#allocation6 + $0x1f8] sm:$0xff] }
  0x50   :  { %6921 = vst [vmem:[#allocation44_spill] sm:$0xff] %v4356_v56  ;;  %v4386_v56 = vld [vmem:[#allocation6 + $0x1f0] sm:$0xff]  ;;  %466 = vmatmul.f32.vlgmr.msra.gmra.mxu2 %v6931_v43  ;;  %486 = vmatmul.f32.vlgmr.msra.gmra.mxu3 %v6931_v43 }
  0x51   :  { %6922 = vst [vmem:[#allocation45_spill] sm:$0xff] %v4360_v26  ;;  %571 = vmatpush.msrb.mxu0 %v4380_v17  ;;  %591 = vmatpush.msrb.mxu1 %v4382_v44  ;;  %v4408_v26 = vld [vmem:[#allocation6 + $0x1b8] sm:$0xff] }
  0x52   :  { %6923 = vst [vmem:[#allocation46_spill] sm:$0xff] %v4362_v36  ;;  %v4392_v36 = vld [vmem:[#allocation6] sm:$0xff]  ;;  %597 = vmatpush.msrb.mxu2 %v4386_v56  ;;  %617 = vmatpush.msrb.mxu3 %v4388_v59 }
  0x53   :  { %6924 = vst [vmem:[#allocation47_spill] sm:$0xff] %v4366_v51  ;;  %v4394_v51 = vld [vmem:[#allocation6 + $0x8] sm:$0xff]  ;;  %572 = vmatpush.msrb.mxu0 %v4392_v36 }
  0x54   :  { %6925 = vst [vmem:[#allocation48_spill] sm:$0xff] %v4368_v55  ;;  %v4398_v55 = vld [vmem:[#allocation6 + $0x1d0] sm:$0xff]  ;;  %592 = vmatpush.msrb.mxu1 %v4394_v51  ;;  %573 = vmatmul.f32.vlgmr.msrb.gmra.mxu0 %v6931_v43 }
  0x55   :  { %6926 = vst [vmem:[#allocation49_spill] sm:$0xff] %v4372_v52  ;;  %v4400_v52 = vld [vmem:[#allocation6 + $0x1d8] sm:$0xff]  ;;  %598 = vmatpush.msrb.mxu2 %v4398_v55  ;;  %593 = vmatmul.f32.vlgmr.msrb.gmra.mxu1 %v6931_v43 }
  0x56   :  { %6927 = vst [vmem:[#allocation50_spill] sm:$0xff] %v4374_v60  ;;  %v4406_v60 = vld [vmem:[#allocation6 + $0x1b0] sm:$0xff]  ;;  %618 = vmatpush.msrb.mxu3 %v4400_v52  ;;  %721 = vmatpush.msra.mxu0 %v3993_v2  ;;  %v4438_v2 = vld [vmem:[#allocation6 + $0x138] sm:$0xff] }
  0x57   :  { %6928 = vst [vmem:[#allocation51_spill] sm:$0xff] %v4380_v17  ;;  %v4416_v17 = vld [vmem:[#allocation6 + $0x198] sm:$0xff]  ;;  %599 = vmatpush.msrb.mxu2 %v4406_v60  ;;  %741 = vmatpush.msra.mxu1 %v3995_v3  ;;  %v4444_v3 = vld [vmem:[#allocation6 + $0x110] sm:$0xff] }
  0x58   :  { %6929 = vst [vmem:[#allocation52_spill] sm:$0xff] %v4382_v44  ;;  %v4414_v44 = vld [vmem:[#allocation6 + $0x190] sm:$0xff]  ;;  %619 = vmatpush.msrb.mxu3 %v4408_v26  ;;  %722 = vmatpush.msra.mxu0 %v4005_v6  ;;  %v4446_v6 = vld [vmem:[#allocation6 + $0x118] sm:$0xff] }
  0x59   :  { %6930 = vst [vmem:[#allocation53_spill] sm:$0xff] %v4386_v56  ;;  %600 = vmatpush.msrb.mxu2 %v4414_v44  ;;  %742 = vmatpush.msra.mxu1 %v4007_v7  ;;  %v4452_v7 = vld [vmem:[#allocation6 + $0xf0] sm:$0xff] }
  0x5a   :  { %6932 = vst [vmem:[#allocation54_spill] sm:$0xff] %v4392_v36  ;;  %v4422_v36 = vld [vmem:[#allocation6 + $0x178] sm:$0xff]  ;;  %620 = vmatpush.msrb.mxu3 %v4416_v17  ;;  %723 = vmatpush.msra.mxu0 %v4015_v10 }
  0x5b   :  { %6933 = vst [vmem:[#allocation55_spill] sm:$0xff] %v4394_v51  ;;  %v4420_v51 = vld [vmem:[#allocation6 + $0x170] sm:$0xff]  ;;  %743 = vmatpush.msra.mxu1 %v4017_v11  ;;  %v4454_v10 = vld [vmem:[#allocation6 + $0xf8] sm:$0xff] }
  0x5c   :  { %6934 = vst [vmem:[#allocation56_spill] sm:$0xff] %v4398_v55  ;;  %v4430_v55 = vld [vmem:[#allocation6 + $0x158] sm:$0xff]  ;;  %601 = vmatpush.msrb.mxu2 %v4420_v51  ;;  %621 = vmatpush.msrb.mxu3 %v4422_v36  ;;  %v4460_v11 = vld [vmem:[#allocation6 + $0xd0] sm:$0xff] }
  0x5d   :  { %6935 = vst [vmem:[#allocation57_spill] sm:$0xff] %v4400_v52  ;;  %v4428_v52 = vld [vmem:[#allocation6 + $0x150] sm:$0xff]  ;;  %724 = vmatpush.msra.mxu0 %v4027_v14  ;;  %744 = vmatpush.msra.mxu1 %v4029_v15  ;;  %v4462_v14 = vld [vmem:[#allocation6 + $0xd8] sm:$0xff] }
  0x5e   :  { %6936 = vst [vmem:[#allocation58_spill] sm:$0xff] %v4408_v26  ;;  %v4436_v26 = vld [vmem:[#allocation6 + $0x130] sm:$0xff]  ;;  %602 = vmatpush.msrb.mxu2 %v4428_v52  ;;  %622 = vmatpush.msrb.mxu3 %v4430_v55 }
  0x5f   :  { %6937 = vst [vmem:[#allocation59_spill] sm:$0xff] %v4416_v17  ;;  %725 = vmatpush.msra.mxu0 %v4039_v18  ;;  %745 = vmatpush.msra.mxu1 %v4041_v19  ;;  %v4468_v15 = vld [vmem:[#allocation6 + $0xb0] sm:$0xff]  ;;  %v4470_v18 = vld [vmem:[#allocation6 + $0xb8] sm:$0xff] }
  0x60   :  { %6938 = vst [vmem:[#allocation60_spill] sm:$0xff] %v4420_v51  ;;  %603 = vmatpush.msrb.mxu2 %v4436_v26  ;;  %623 = vmatpush.msrb.mxu3 %v4438_v2  ;;  %v4476_v19 = vld [vmem:[#allocation6 + $0x90] sm:$0xff] }
  0x61   :  { %6939 = vst [vmem:[#allocation61_spill] sm:$0xff] %v4422_v36  ;;  %726 = vmatpush.msra.mxu0 %v4051_v22  ;;  %746 = vmatpush.msra.mxu1 %v4053_v23  ;;  %v4478_v22 = vld [vmem:[#allocation6 + $0x98] sm:$0xff]  ;;  %v4484_v23 = vld [vmem:[#allocation6 + $0x70] sm:$0xff] }
  0x62   :  { %6940 = vst [vmem:[#allocation62_spill] sm:$0xff] %v4428_v52  ;;  %604 = vmatpush.msrb.mxu2 %v4444_v3  ;;  %624 = vmatpush.msrb.mxu3 %v4446_v6 }
  0x63   :  { %6941 = vst [vmem:[#allocation63_spill] sm:$0xff] %v4430_v55  ;;  %727 = vmatpush.msra.mxu0 %v4070_v27  ;;  %747 = vmatpush.msra.mxu1 %v4072_v28  ;;  %v4486_v27 = vld [vmem:[#allocation6 + $0x78] sm:$0xff]  ;;  %v4492_v28 = vld [vmem:[#allocation6 + $0x50] sm:$0xff] }
  0x64   :  { %6942 = vst [vmem:[#allocation64_spill] sm:$0xff] %v4436_v26  ;;  %605 = vmatpush.msrb.mxu2 %v4452_v7  ;;  %625 = vmatpush.msrb.mxu3 %v4454_v10 }
  0x65   :  { %6943 = vst [vmem:[#allocation65_spill] sm:$0xff] %v4438_v2  ;;  %728 = vmatpush.msra.mxu0 %v4092_v33  ;;  %748 = vmatpush.msra.mxu1 %v4094_v34  ;;  %v4494_v33 = vld [vmem:[#allocation6 + $0x58] sm:$0xff]  ;;  %v4500_v34 = vld [vmem:[#allocation6 + $0x30] sm:$0xff] }
  0x66   :  { %6944 = vst [vmem:[#allocation66_spill] sm:$0xff] %v4444_v3  ;;  %606 = vmatpush.msrb.mxu2 %v4460_v11  ;;  %626 = vmatpush.msrb.mxu3 %v4462_v14 }
  0x67   :  { %6945 = vst [vmem:[#allocation67_spill] sm:$0xff] %v4446_v6  ;;  %729 = vmatpush.msra.mxu0 %v4102_v37  ;;  %749 = vmatpush.msra.mxu1 %v4104_v38  ;;  %v4502_v37 = vld [vmem:[#allocation6 + $0x38] sm:$0xff]  ;;  %v4508_v38 = vld [vmem:[#allocation6 + $0x10] sm:$0xff] }
  0x68   :  { %6946 = vst [vmem:[#allocation68_spill] sm:$0xff] %v4452_v7  ;;  %607 = vmatpush.msrb.mxu2 %v4468_v15  ;;  %627 = vmatpush.msrb.mxu3 %v4470_v18 }
  0x69   :  { %6947 = vst [vmem:[#allocation69_spill] sm:$0xff] %v4454_v10  ;;  %730 = vmatpush.msra.mxu0 %v4114_v41  ;;  %750 = vmatpush.msra.mxu1 %v4116_v42  ;;  %v4510_v41 = vld [vmem:[#allocation6 + $0x18] sm:$0xff]  ;;  %v6962_v42 = vld [vmem:[#allocation12_spill] sm:$0xff] }
  0x6a   :  { %6948 = vst [vmem:[#allocation70_spill] sm:$0xff] %v4460_v11  ;;  %608 = vmatpush.msrb.mxu2 %v4476_v19  ;;  %628 = vmatpush.msrb.mxu3 %v4478_v22 }
  0x6b   :  { %6949 = vst [vmem:[#allocation71_spill] sm:$0xff] %v4462_v14  ;;  %731 = vmatpush.msra.mxu0 %v4128_v45  ;;  %751 = vmatpush.msra.mxu1 %v4130_v46  ;;  %v6963_v45 = vld [vmem:[#allocation13_spill] sm:$0xff]  ;;  %v6964_v46 = vld [vmem:[#allocation18_spill] sm:$0xff] }
  0x6c   :  { %6950 = vst [vmem:[#allocation72_spill] sm:$0xff] %v4468_v15  ;;  %609 = vmatpush.msrb.mxu2 %v4484_v23  ;;  %629 = vmatpush.msrb.mxu3 %v4486_v27 }
  0x6d   :  { %6951 = vst [vmem:[#allocation73_spill] sm:$0xff] %v4470_v18  ;;  %732 = vmatpush.msra.mxu0 %v4142_v49  ;;  %752 = vmatpush.msra.mxu1 %v4144_v50  ;;  %v6965_v49 = vld [vmem:[#allocation19_spill] sm:$0xff]  ;;  %v6966_v50 = vld [vmem:[#allocation14_spill] sm:$0xff] }
  0x6e   :  { %6952 = vst [vmem:[#allocation74_spill] sm:$0xff] %v4476_v19  ;;  %610 = vmatpush.msrb.mxu2 %v4492_v28  ;;  %630 = vmatpush.msrb.mxu3 %v4494_v33 }
  0x6f   :  { %6953 = vst [vmem:[#allocation75_spill] sm:$0xff] %v4478_v22  ;;  %733 = vmatpush.msra.mxu0 %v4154_v53  ;;  %753 = vmatpush.msra.mxu1 %v4156_v54  ;;  %v6967_v53 = vld [vmem:[#allocation15_spill] sm:$0xff]  ;;  %v6968_v54 = vld [vmem:[#allocation22_spill] sm:$0xff] }
  0x70   :  { %6954 = vst [vmem:[#allocation76_spill] sm:$0xff] %v4484_v23  ;;  %611 = vmatpush.msrb.mxu2 %v4500_v34  ;;  %631 = vmatpush.msrb.mxu3 %v4502_v37 }
  0x71   :  { %6955 = vst [vmem:[#allocation77_spill] sm:$0xff] %v4486_v27  ;;  %734 = vmatpush.msra.mxu0 %v4166_v57  ;;  %754 = vmatpush.msra.mxu1 %v4168_v58  ;;  %v6969_v57 = vld [vmem:[#allocation23_spill] sm:$0xff]  ;;  %v6970_v58 = vld [vmem:[#allocation16_spill] sm:$0xff] }
  0x72   :  { %6956 = vst [vmem:[#allocation78_spill] sm:$0xff] %v4492_v28  ;;  %612 = vmatpush.msrb.mxu2 %v4508_v38  ;;  %632 = vmatpush.msrb.mxu3 %v4510_v41 }
  0x73   :  { %6957 = vst [vmem:[#allocation79_spill] sm:$0xff] %v4494_v33  ;;  %613 = vmatmul.f32.vlgmr.msrb.gmra.mxu2 %v6931_v43  ;;  %633 = vmatmul.f32.vlgmr.msrb.gmra.mxu3 %v6931_v43  ;;  %v6981_v43 = vld [vmem:[#allocation27_spill] sm:$0xff] }
  0x74   :  { %6958 = vst [vmem:[#allocation80_spill] sm:$0xff] %v4500_v34  ;;  %761 = vmatpush.msra.mxu2 %v4184_v63  ;;  %781 = vmatpush.msra.mxu3 %v4186_v0 }
  0x75   :  { %6959 = vst [vmem:[#allocation81_spill] sm:$0xff] %v4502_v37  ;;  %735 = vmatpush.msra.mxu0 %v4180_v61  ;;  %755 = vmatpush.msra.mxu1 %v4182_v62  ;;  %v6971_v61 = vld [vmem:[#allocation17_spill] sm:$0xff]  ;;  %v6972_v62 = vld [vmem:[#allocation26_spill] sm:$0xff] }
  0x76   :  { %6960 = vst [vmem:[#allocation82_spill] sm:$0xff] %v4508_v38  ;;  %762 = vmatpush.msra.mxu2 %v4198_v5  ;;  %782 = vmatpush.msra.mxu3 %v4200_v8 }
  0x77   :  { %6961 = vst [vmem:[#allocation83_spill] sm:$0xff] %v4510_v41  ;;  %736 = vmatpush.msra.mxu0 %v4192_v1  ;;  %756 = vmatpush.msra.mxu1 %v4194_v4  ;;  %v6973_v1 = vld [vmem:[#allocation20_spill] sm:$0xff]  ;;  %v6974_v4 = vld [vmem:[#allocation21_spill] sm:$0xff] }
  0x78   :  { %763 = vmatpush.msra.mxu2 %v4212_v13  ;;  %783 = vmatpush.msra.mxu3 %v4214_v16 }
  0x79   :  { %883 = vmatpush.msrb.mxu0 %v4206_v9  ;;  %903 = vmatpush.msrb.mxu1 %v4208_v12  ;;  %v6975_v9 = vld [vmem:[#allocation29_spill] sm:$0xff]  ;;  %v6976_v12 = vld [vmem:[#allocation30_spill] sm:$0xff] }
  0x7a   :  { %764 = vmatpush.msra.mxu2 %v4224_v24  ;;  %784 = vmatpush.msra.mxu3 %v4226_v25 }
  0x7b   :  { %884 = vmatpush.msrb.mxu0 %v4218_v20  ;;  %904 = vmatpush.msrb.mxu1 %v4220_v21  ;;  %v6977_v20 = vld [vmem:[#allocation24_spill] sm:$0xff]  ;;  %v6978_v21 = vld [vmem:[#allocation25_spill] sm:$0xff] }
  0x7c   :  { %765 = vmatpush.msra.mxu2 %v4236_v31  ;;  %785 = vmatpush.msra.mxu3 %v4238_v32 }
  0x7d   :  { %885 = vmatpush.msrb.mxu0 %v4230_v29  ;;  %905 = vmatpush.msrb.mxu1 %v4232_v30  ;;  %v6979_v29 = vld [vmem:[#allocation33_spill] sm:$0xff]  ;;  %v6980_v30 = vld [vmem:[#allocation34_spill] sm:$0xff] }
  0x7e   :  { %766 = vmatpush.msra.mxu2 %v4248_v39  ;;  %786 = vmatpush.msra.mxu3 %v4250_v40 }
  0x7f   :  { %886 = vmatpush.msrb.mxu0 %v6962_v42  ;;  %906 = vmatpush.msrb.mxu1 %v6963_v45  ;;  %v6982_v42 = vld [vmem:[#allocation28_spill] sm:$0xff]  ;;  %v6983_v45 = vld [vmem:[#allocation37_spill] sm:$0xff] }
  0x80   :  { %767 = vmatpush.msra.mxu2 %v4260_v47  ;;  %787 = vmatpush.msra.mxu3 %v4262_v48 }
  0x81   :  { %887 = vmatpush.msrb.mxu0 %v6966_v50  ;;  %907 = vmatpush.msrb.mxu1 %v6967_v53  ;;  %v6984_v50 = vld [vmem:[#allocation38_spill] sm:$0xff]  ;;  %v6985_v53 = vld [vmem:[#allocation31_spill] sm:$0xff] }
  0x82   :  { %768 = vmatpush.msra.mxu2 %v6964_v46  ;;  %788 = vmatpush.msra.mxu3 %v6965_v49 }
  0x83   :  { %888 = vmatpush.msrb.mxu0 %v6970_v58  ;;  %908 = vmatpush.msrb.mxu1 %v6971_v61  ;;  %v6986_v58 = vld [vmem:[#allocation32_spill] sm:$0xff]  ;;  %v6987_v61 = vld [vmem:[#allocation41_spill] sm:$0xff] }
  0x84   :  { %769 = vmatpush.msra.mxu2 %v6968_v54  ;;  %789 = vmatpush.msra.mxu3 %v6969_v57 }
  0x85   :  { %889 = vmatpush.msrb.mxu0 %v6973_v1  ;;  %909 = vmatpush.msrb.mxu1 %v6974_v4  ;;  %v6988_v1 = vld [vmem:[#allocation42_spill] sm:$0xff]  ;;  %v6989_v4 = vld [vmem:[#allocation35_spill] sm:$0xff] }
  0x86   :  { %770 = vmatpush.msra.mxu2 %v4296_v35  ;;  %790 = vmatpush.msra.mxu3 %v6972_v62 }
  0x87   :  { %890 = vmatpush.msrb.mxu0 %v6977_v20  ;;  %910 = vmatpush.msrb.mxu1 %v6978_v21  ;;  %v6990_v20 = vld [vmem:[#allocation36_spill] sm:$0xff]  ;;  %v6991_v21 = vld [vmem:[#allocation45_spill] sm:$0xff] }
  0x88   :  { %771 = vmatpush.msra.mxu2 %v6975_v9  ;;  %791 = vmatpush.msra.mxu3 %v6976_v12 }
  0x89   :  { %891 = vmatpush.msrb.mxu0 %v6981_v43  ;;  %911 = vmatpush.msrb.mxu1 %v6982_v42  ;;  %v6992_v43 = vld [vmem:[#allocation46_spill] sm:$0xff]  ;;  %v6993_v42 = vld [vmem:[#allocation39_spill] sm:$0xff] }
  0x8a   :  { %772 = vmatpush.msra.mxu2 %v6979_v29  ;;  %792 = vmatpush.msra.mxu3 %v6980_v30 }
  0x8b   :  { %892 = vmatpush.msrb.mxu0 %v6985_v53  ;;  %912 = vmatpush.msrb.mxu1 %v6986_v58  ;;  %v6996_v53 = vld [vmem:[#allocation50_spill] sm:$0xff]  ;;  %v6997_v58 = vld [vmem:[#allocation43_spill] sm:$0xff] }
  0x8c   :  { %773 = vmatpush.msra.mxu2 %v6983_v45  ;;  %793 = vmatpush.msra.mxu3 %v6984_v50  ;;  %v6994_v45 = vld [vmem:[#allocation40_spill] sm:$0xff]  ;;  %v6995_v50 = vld [vmem:[#allocation49_spill] sm:$0xff] }
  0x8d   :  { %893 = vmatpush.msrb.mxu0 %v6989_v4  ;;  %913 = vmatpush.msrb.mxu1 %v6990_v20  ;;  %v6998_v4 = vld [vmem:[#allocation44_spill] sm:$0xff] }
  0x8e   :  { %774 = vmatpush.msra.mxu2 %v6987_v61  ;;  %794 = vmatpush.msra.mxu3 %v6988_v1  ;;  %v6999_v20 = vld [vmem:[#allocation56_spill] sm:$0xff] }
  0x8f   :  { %894 = vmatpush.msrb.mxu0 %v6993_v42  ;;  %914 = vmatpush.msrb.mxu1 %v6994_v45  ;;  %v7002_v42 = vld [vmem:[#allocation48_spill] sm:$0xff]  ;;  %v7003_v45 = vld [vmem:[#allocation58_spill] sm:$0xff] }
  0x90   :  { %775 = vmatpush.msra.mxu2 %v6991_v21  ;;  %795 = vmatpush.msra.mxu3 %v6992_v43  ;;  %v7000_v21 = vld [vmem:[#allocation57_spill] sm:$0xff]  ;;  %v7001_v43 = vld [vmem:[#allocation47_spill] sm:$0xff] }
  0x91   :  { %895 = vmatpush.msrb.mxu0 %v6997_v58  ;;  %915 = vmatpush.msrb.mxu1 %v6998_v4  ;;  %v7006_v58 = vld [vmem:[#allocation54_spill] sm:$0xff]  ;;  %v7007_v4 = vld [vmem:[#allocation55_spill] sm:$0xff] }
  0x92   :  { %776 = vmatpush.msra.mxu2 %v6995_v50  ;;  %796 = vmatpush.msra.mxu3 %v6996_v53  ;;  %v7004_v53 = vld [vmem:[#allocation51_spill] sm:$0xff] }
  0x93   :  { %896 = vmatpush.msrb.mxu0 %v7001_v43  ;;  %916 = vmatpush.msrb.mxu1 %v7002_v42 }
  0x94   :  { %923 = vmatpush.msrb.mxu2 %v4386_v56  ;;  %943 = vmatpush.msrb.mxu3 %v4388_v59  ;;  %v7005_v56 = vld [vmem:[#allocation52_spill] sm:$0xff] }
  0x95   :  { %897 = vmatpush.msrb.mxu0 %v7004_v53  ;;  %917 = vmatpush.msrb.mxu1 %v7005_v56  ;;  %v82_v56 = vld [vmem:[%s6614_s3] sm:$0xf] }
  0x96   :  { %924 = vmatpush.msrb.mxu2 %v6999_v20  ;;  %944 = vmatpush.msrb.mxu3 %v7000_v21  ;;  %v84_v43 = vperm.slane %v82_v56, 0  ;;  %v85_v42 = vperm.slane %v82_v56, 1 }
  0x97   :  { %898 = vmatpush.msrb.mxu0 %v7006_v58  ;;  %918 = vmatpush.msrb.mxu1 %v7007_v4 }
  0x98   :  { %925 = vmatpush.msrb.mxu2 %v4406_v60  ;;  %945 = vmatpush.msrb.mxu3 %v7003_v45 }
  0x9a   :  { %926 = vmatpush.msrb.mxu2 %v4414_v44  ;;  %946 = vmatpush.msrb.mxu3 %v4416_v17 }
  0x9c   :  { %927 = vmatpush.msrb.mxu2 %v4420_v51  ;;  %947 = vmatpush.msrb.mxu3 %v4422_v36 }
  0x9d   :  { %v113_v53 = vpop.f32.mrf.mxu2  ;;  %v133_v4 = vpop.f32.mrf.mxu3 }
  0x9e   :  { %928 = vmatpush.msrb.mxu2 %v4428_v52  ;;  %948 = vmatpush.msrb.mxu3 %v4430_v55  ;;  %v4625_v58 = vadd.f32 %v113_v53, %v84_v43 }
  0xa0   :  { %929 = vmatpush.msrb.mxu2 %v4436_v26  ;;  %949 = vmatpush.msrb.mxu3 %v4438_v2  ;;  %7008 = vst [vmem:[#allocation12_spill] sm:$0xff] %v4625_v58 }
  0xa2   :  { %930 = vmatpush.msrb.mxu2 %v4444_v3  ;;  %950 = vmatpush.msrb.mxu3 %v4446_v6 }
  0xa4   :  { %931 = vmatpush.msrb.mxu2 %v4452_v7  ;;  %951 = vmatpush.msrb.mxu3 %v4454_v10 }
  0xa6   :  { %932 = vmatpush.msrb.mxu2 %v4460_v11  ;;  %952 = vmatpush.msrb.mxu3 %v4462_v14 }
  0xa8   :  { %933 = vmatpush.msrb.mxu2 %v4468_v15  ;;  %953 = vmatpush.msrb.mxu3 %v4470_v18 }
  0xaa   :  { %934 = vmatpush.msrb.mxu2 %v4476_v19  ;;  %954 = vmatpush.msrb.mxu3 %v4478_v22  ;;  %v4629_v22 = vadd.f32 %v133_v4, %v85_v42 }
  0xac   :  { %935 = vmatpush.msrb.mxu2 %v4484_v23  ;;  %955 = vmatpush.msrb.mxu3 %v4486_v27  ;;  %7009 = vst [vmem:[#allocation13_spill] sm:$0xff] %v4629_v22 }
  0xae   :  { %936 = vmatpush.msrb.mxu2 %v4492_v28  ;;  %956 = vmatpush.msrb.mxu3 %v4494_v33 }
  0xaf   :  { %v427_v27 = vpop.f32.mrf.mxu0  ;;  %v447_v23 = vpop.f32.mrf.mxu1 }
  0xb0   :  { %937 = vmatpush.msrb.mxu2 %v4500_v34  ;;  %957 = vmatpush.msrb.mxu3 %v4502_v37  ;;  %v490_v28 = vadd.f32 %v427_v27, %v4625_v58  ;;  %v491_v33 = vadd.f32 %v447_v23, %v4629_v22  ;;  %v173_v34 = vpop.f32.mrf.mxu3  ;;  %v153_v37 = vpop.f32.mrf.mxu2  ;;  %v4640_v23 = vld [vmem:[%s6617_s6] sm:$0xf] }
  0xb2   :  { %938 = vmatpush.msrb.mxu2 %v4508_v38  ;;  %958 = vmatpush.msrb.mxu3 %v4510_v41  ;;  %v3148_v19 = vmul.f32 -1.442695, %v490_v28  ;;  %v3149_v18 = vmul.f32 -1.442695, %v491_v33  ;;  %v195_v28 = vperm.slane %v4640_v23, 1  ;;  %v194_v33 = vperm.slane %v4640_v23, 0 }
  0xb4   :  { %3203 = vpow2.f32 %v3148_v19  ;;  %v87_v19 = vperm.slane %v82_v56, 3 }
  0xb5   :  { %3205 = vpow2.f32 %v3149_v18 }
  0xb8   :  { %v239_v15 = vpop.f32.mrf.mxu3  ;;  %v219_v38 = vpop.f32.mrf.mxu2 }
  0xb9   :  { %v4646_v7 = vadd.f32 %v239_v15, %v195_v28  ;;  %v4648_v6 = vadd.f32 %v219_v38, %v194_v33 }
  0xba   :  { %v3204_v43 = vpop.eup %3203 }
  0xbb   :  { %v3206_v53 = vpop.eup %3205  ;;  %v497_v14 = vadd.f32 1.0, %v3204_v43  ;;  %v86_v43 = vperm.slane %v82_v56, 2  ;;  %7011 = vst [vmem:[#allocation19_spill] sm:$0xff] %v4646_v7 }
  0xbc   :  { %v516_v41 = vadd.f32 1.0, %v3206_v53  ;;  %v4644_v53 = vadd.f32 %v173_v34, %v87_v19 }
  0xbd   :  { %3207 = vrcp.f32 %v497_v14  ;;  %v4651_v36 = vadd.f32 %v153_v37, %v86_v43  ;;  %vm503_vm3 = vweird.f32 %v497_v14 }
  0xbe   :  { %3209 = vrcp.f32 %v516_v41  ;;  %7010 = vst [vmem:[#allocation18_spill] sm:$0xff] %v4644_v53  ;;  %vm522_vm4 = vweird.f32 %v516_v41 }
  0xbf   :  { %7012 = vst [vmem:[#allocation14_spill] sm:$0xff] %v4651_v36 }
  0xc3   :  { %v3208_v27 = vpop.eup %3207 }
  0xc4   :  { %v3210_v18 = vpop.eup %3209  ;;  %v499_v22 = vmul.f32 %v3208_v27, %v497_v14  ;;  %vm504_vm1 = vweird.f32 %v3208_v27 }
  0xc5   :  { %v518_v58 = vmul.f32 %v3210_v18, %v516_v41  ;;  %vm523_vm2 = vweird.f32 %v3210_v18  ;;  %vm4656_vm5 = vmor %vm503_vm3, %vm504_vm1 }
  0xc6   :  { %v500_v19 = vsub.f32 1.0, %v499_v22  ;;  %vm524_vm6 = vmor %vm522_vm4, %vm523_vm2 }
  0xc7   :  { %v519_v51 = vsub.f32 1.0, %v518_v58 }
  0xca   :  { %v4633_v4 = vpop.f32.mrf.mxu2  ;;  %v4635_v42 = vpop.f32.mrf.mxu3 }
  0xd1   :  { %v574_v11 = vpop.f32.mrf.mxu0 }
  0xd2   :  { %v594_v10 = vpop.f32.mrf.mxu1  ;;  %v641_v3 = vrot.slane %v574_v11, 1  ;;  %v520_v11 = vmul.f32 %v3210_v18, %v519_v51 }
  0xd3   :  { %v642_v2 = vrot.slane %v594_v10, 1  ;;  %v487_v26 = vpop.f32.mrf.mxu3  ;;  %v467_v55 = vpop.f32.mrf.mxu2  ;;  %v501_v10 = vmul.f32 %v3208_v27, %v500_v19 }
  0xd4   :  { %v493_v52 = vadd.f32 %v487_v26, %v4644_v53  ;;  %v649_v56 = vadd.f32 %v641_v3, %v4648_v6  ;;  %v492_v15 = vadd.f32 %v467_v55, %v4651_v36  ;;  %v521_v33 = vadd.f32 %v3210_v18, %v520_v11 }
  0xd5   :  { %v650_v34 = vadd.f32 %v642_v2, %v4646_v7  ;;  %v502_v37 = vadd.f32 %v3208_v27, %v501_v10  ;;  %v528_v3 = vand.u32 2147483648, %v516_v41  ;;  %v509_v2 = vand.u32 2147483648, %v497_v14 }
  0xd6   :  { %v3150_v17 = vmul.f32 -1.442695, %v493_v52  ;;  %v3151_v28 = vmul.f32 -1.442695, %v649_v56  ;;  %v526_v55 = vand.u32 2147483647, %v516_v41  ;;  %v525_v56 = vsel %vm524_vm6, %v3210_v18, %v521_v33 }
  0xd7   :  { %v3152_v38 = vmul.f32 -1.442695, %v650_v34  ;;  %v506_v43 = vsel %vm4656_vm5, %v3208_v27, %v502_v37  ;;  %v529_v19 = vor.u32 1.1754944e-38, %v528_v3 }
  0xd8   :  { %3211 = vpow2.f32 %v3150_v17  ;;  %v507_v17 = vand.u32 2147483647, %v497_v14  ;;  %vm527_vm8 = vcmp.eq.f32.partialorder %v526_v55, 8.507059e+37  ;;  %v197_v55 = vperm.slane %v4640_v23, 3 }
  0xd9   :  { %3213 = vtanh.f32 %v492_v15  ;;  %v510_v15 = vor.u32 1.1754944e-38, %v509_v2  ;;  %v530_v11 = vsel %vm527_vm8, %v529_v19, %v525_v56 }
  0xda   :  { %3215 = vpow2.f32 %v3151_v28  ;;  %vm508_vm7 = vcmp.eq.f32.partialorder %v507_v17, 8.507059e+37  ;;  %v552_v10 = vmul.f32 0.0, %v530_v11 }
  0xdb   :  { %3217 = vpow2.f32 %v3152_v38  ;;  %v511_v38 = vsel %vm508_vm7, %v510_v15, %v506_v43  ;;  %v196_v15 = vperm.slane %v4640_v23, 2 }
  0xde   :  { %v3212_v26 = vpop.eup %3211 }
  0xdf   :  { %v536_v51 = vadd.f32 1.0, %v3212_v26  ;;  %v3214_v22 = vpop.eup %3213 }
  0xe0   :  { %v3216_v58 = vpop.eup %3215  ;;  %v553_v41 = vmul.f32 %v3214_v22, %v511_v38 }
  0xe1   :  { %v3218_v34 = vpop.eup %3217  ;;  %3219 = vrcp.f32 %v536_v51  ;;  %v4662_v28 = vadd.f32 1.0, %v3216_v58  ;;  %v548_v33 = vand.u32 2147483648, %v536_v51  ;;  %v546_v52 = vand.u32 2147483647, %v536_v51 }
  0xe2   :  { %v4664_v14 = vadd.f32 1.0, %v3218_v34  ;;  %v4668_v27 = vadd.f32 %v553_v41, %v552_v10  ;;  %vm542_vm10 = vweird.f32 %v536_v51  ;;  %v4682_v10 = vadd.f32 %v4635_v42, %v197_v55  ;;  %v4691_v42 = vld [vmem:[#allocation3 + $0x1e8] sm:$0xff] }
  0xe3   :  { %3221 = vrcp.f32 %v4662_v28  ;;  %v549_v58 = vor.u32 1.1754944e-38, %v548_v33  ;;  %vm547_vm12 = vcmp.eq.f32.partialorder %v546_v52, 8.507059e+37  ;;  %v4688_v52 = vld [vmem:[#allocation3 + $0x1e0] sm:$0xff]  ;;  %vm662_vm15 = vweird.f32 %v4662_v28 }
  0xe4   :  { %3223 = vrcp.f32 %v4664_v14  ;;  %vm681_vm0 = vweird.f32 %v4664_v14 }
  0xe5   :  { %3225 = vtanh.f32 %v4668_v27 }
  0xe7   :  { %v3220_v26 = vpop.eup %3219 }
  0xe8   :  { %v538_v18 = vmul.f32 %v3220_v26, %v536_v51  ;;  %vm543_vm9 = vweird.f32 %v3220_v26 }
  0xe9   :  { %v4671_v3 = vpop.eup %3221  ;;  %vm544_vm11 = vmor %vm542_vm10, %vm543_vm9 }
  0xea   :  { %v539_v37 = vsub.f32 1.0, %v538_v18  ;;  %v4673_v17 = vpop.eup %3223  ;;  %v658_v43 = vmul.f32 %v4671_v3, %v4662_v28  ;;  %vm663_vm13 = vweird.f32 %v4671_v3 }
  0xeb   :  { %v677_v56 = vmul.f32 %v4673_v17, %v4664_v14  ;;  %v3226_v19 = vpop.eup %3225  ;;  %vm682_vm14 = vweird.f32 %v4673_v17  ;;  %vm4733_vm1 = vmor %vm662_vm15, %vm663_vm13 }
  0xec   :  { %v540_v2 = vmul.f32 %v3220_v26, %v539_v37  ;;  %v659_v33 = vsub.f32 1.0, %v658_v43  ;;  %vm4747_vm2 = vmor %vm681_vm0, %vm682_vm14 }
  0xee   :  { %v541_v22 = vadd.f32 %v3220_v26, %v540_v2  ;;  %v678_v2 = vsub.f32 1.0, %v677_v56  ;;  %v4722_v56 = vld [vmem:[#allocation3 + $0x188] sm:$0xff] }
  0xf0   :  { %v545_v34 = vsel %vm544_vm11, %v3220_v26, %v541_v22  ;;  %v4686_v26 = vadd.f32 %v4633_v4, %v196_v15  ;;  %v679_v4 = vmul.f32 %v4673_v17, %v678_v2  ;;  %v660_v22 = vmul.f32 %v4671_v3, %v659_v33 }
  0xf1   :  { %v550_v41 = vsel %vm547_vm12, %v549_v58, %v545_v34  ;;  %v4702_v58 = vld [vmem:[#allocation3 + $0x1c8] sm:$0xff]  ;;  %v687_v34 = vand.u32 2147483648, %v4664_v14  ;;  %v666_v15 = vand.u32 2147483647, %v4662_v28 }
  0xf2   :  { %v556_v18 = vmul.f32 %v3226_v19, %v550_v41  ;;  %v661_v43 = vadd.f32 %v4671_v3, %v660_v22 }
  0xf3   :  { %vm667_vm3 = vcmp.eq.f32.partialorder %v666_v15, 8.507059e+37  ;;  %v7019_v15 = vld [vmem:[#allocation37_spill] sm:$0xff] }
  0xf4   :  { %716 = vst [vmem:[#allocation2] sm:$0x1] %v556_v18  ;;  %737 = vmatmul.f32.vlgmr.msra.gmra.mxu0 %v556_v18  ;;  %757 = vmatmul.f32.vlgmr.msra.gmra.mxu1 %v556_v18 }
  0xf5   :  { %777 = vmatmul.f32.vlgmr.msra.gmra.mxu2 %v556_v18  ;;  %797 = vmatmul.f32.vlgmr.msra.gmra.mxu3 %v556_v18  ;;  %v4764_v18 = vld [vmem:[#allocation3 + $0x148] sm:$0xff] }
  0xf6   :  { %v614_v38 = vpop.f32.mrf.mxu2  ;;  %v634_v11 = vpop.f32.mrf.mxu3  ;;  %1053 = vmatpush.msra.mxu0 %v4688_v52  ;;  %1073 = vmatpush.msra.mxu1 %v4691_v42 }
  0xf7   :  { %v644_v51 = vrot.slane %v634_v11, 1  ;;  %v643_v37 = vrot.slane %v614_v38, 1  ;;  %1093 = vmatpush.msra.mxu2 %v4184_v63  ;;  %1113 = vmatpush.msra.mxu3 %v4186_v0  ;;  %v4707_v63 = vld [vmem:[#allocation3 + $0x1a0] sm:$0xff]  ;;  %v4710_v0 = vld [vmem:[#allocation3 + $0x1a8] sm:$0xff]  ;;  %v685_v38 = vand.u32 2147483647, %v4664_v14 }
  0xf8   :  { %1074 = vmatpush.msra.mxu1 %v4702_v58  ;;  %v4739_v11 = vld [vmem:[#allocation3 + $0x160] sm:$0xff] }
  0xf9   :  { %v652_v7 = vadd.f32 %v644_v51, %v4682_v10  ;;  %v651_v55 = vadd.f32 %v643_v37, %v4686_v26  ;;  %1094 = vmatpush.msra.mxu2 %v4198_v5  ;;  %1114 = vmatpush.msra.mxu3 %v4200_v8  ;;  %v680_v5 = vadd.f32 %v4673_v17, %v679_v4  ;;  %v4719_v8 = vld [vmem:[#allocation3 + $0x180] sm:$0xff]  ;;  %vm686_vm4 = vcmp.eq.f32.partialorder %v685_v38, 8.507059e+37  ;;  %v7020_v38 = vld [vmem:[#allocation38_spill] sm:$0xff] }
  0xfa   :  { %1075 = vmatpush.msra.mxu1 %v4710_v0  ;;  %v4761_v51 = vld [vmem:[#allocation3 + $0x140] sm:$0xff] }
  0xfb   :  { %v3153_v23 = vmul.f32 -1.442695, %v652_v7  ;;  %v4699_v7 = vld [vmem:[#allocation3 + $0x1c0] sm:$0xff]  ;;  %1095 = vmatpush.msra.mxu2 %v4212_v13  ;;  %1115 = vmatpush.msra.mxu3 %v4214_v16  ;;  %v668_v13 = vand.u32 2147483648, %v4662_v28  ;;  %v665_v28 = vsel %vm4733_vm1, %v4671_v3, %v661_v43  ;;  %v684_v14 = vsel %vm4747_vm2, %v4673_v17, %v680_v5  ;;  %v4773_v3 = vld [vmem:[#allocation3 + $0x128] sm:$0xff] }
  0xfc   :  { %1054 = vmatpush.msra.mxu0 %v4699_v7  ;;  %1076 = vmatpush.msra.mxu1 %v4722_v56  ;;  %v4786_v4 = vld [vmem:[#allocation3 + $0xe0] sm:$0xff] }
  0xfd   :  { %3227 = vpow2.f32 %v3153_v23  ;;  %1096 = vmatpush.msra.mxu2 %v4224_v24  ;;  %1116 = vmatpush.msra.mxu3 %v4226_v25  ;;  %v4742_v24 = vld [vmem:[#allocation3 + $0x168] sm:$0xff]  ;;  %v669_v33 = vor.u32 1.1754944e-38, %v668_v13  ;;  %v4796_v43 = vld [vmem:[#allocation3 + $0xc0] sm:$0xff] }
  0xfe   :  { %1055 = vmatpush.msra.mxu0 %v4707_v63  ;;  %3229 = vtanh.f32 %v651_v55  ;;  %1077 = vmatpush.msra.mxu1 %v4742_v24  ;;  %v4781_v23 = vld [vmem:[#allocation3 + $0x108] sm:$0xff] }
  0xff   :  { %1097 = vmatpush.msra.mxu2 %v4236_v31  ;;  %1117 = vmatpush.msra.mxu3 %v4238_v32  ;;  %v688_v31 = vor.u32 1.1754944e-38, %v687_v34  ;;  %v4770_v32 = vld [vmem:[#allocation3 + $0x120] sm:$0xff]  ;;  %v670_v17 = vsel %vm667_vm3, %v669_v33, %v665_v28 }
 0x100   :  { %1056 = vmatpush.msra.mxu0 %v4719_v8  ;;  %1078 = vmatpush.msra.mxu1 %v4764_v18 }
 0x101   :  { %1098 = vmatpush.msra.mxu2 %v4248_v39  ;;  %1118 = vmatpush.msra.mxu3 %v4250_v40  ;;  %v689_v2 = vsel %vm686_vm4, %v688_v31, %v684_v14  ;;  %v4778_v40 = vld [vmem:[#allocation3 + $0x100] sm:$0xff]  ;;  %v4844_v31 = vld [vmem:[#allocation3 + $0x28] sm:$0xff] }
 0x102   :  { %1057 = vmatpush.msra.mxu0 %v4739_v11  ;;  %1079 = vmatpush.msra.mxu1 %v4773_v3  ;;  %v711_v55 = vmul.f32 0.0, %v689_v2  ;;  %v7022_v2 = vld [vmem:[#allocation46_spill] sm:$0xff] }
 0x103   :  { %v3228_v16 = vpop.eup %3227  ;;  %1099 = vmatpush.msra.mxu2 %v4260_v47  ;;  %1119 = vmatpush.msra.mxu3 %v4262_v48  ;;  %v4789_v47 = vld [vmem:[#allocation3 + $0xe8] sm:$0xff] }
 0x104   :  { %v4751_v41 = vadd.f32 1.0, %v3228_v16  ;;  %1058 = vmatpush.msra.mxu0 %v4761_v51  ;;  %v3230_v37 = vpop.eup %3229  ;;  %1080 = vmatpush.msra.mxu1 %v4781_v23 }
 0x105   :  { %v712_v39 = vmul.f32 %v3230_v37, %v670_v17  ;;  %1100 = vmatpush.msra.mxu2 %v6964_v46  ;;  %1120 = vmatpush.msra.mxu3 %v6965_v49  ;;  %v4799_v46 = vld [vmem:[#allocation3 + $0xc8] sm:$0xff]  ;;  %v4841_v37 = vld [vmem:[#allocation3 + $0x20] sm:$0xff]  ;;  %v7021_v17 = vld [vmem:[#allocation45_spill] sm:$0xff] }
 0x106   :  { %3231 = vrcp.f32 %v4751_v41  ;;  %1059 = vmatpush.msra.mxu0 %v4770_v32  ;;  %1081 = vmatpush.msra.mxu1 %v4789_v47  ;;  %v707_v34 = vand.u32 2147483648, %v4751_v41  ;;  %v705_v16 = vand.u32 2147483647, %v4751_v41  ;;  %vm701_vm6 = vweird.f32 %v4751_v41 }
 0x107   :  { %1101 = vmatpush.msra.mxu2 %v6968_v54  ;;  %1121 = vmatpush.msra.mxu3 %v6969_v57  ;;  %v4794_v22 = vadd.f32 %v712_v39, %v711_v55  ;;  %v4805_v54 = vld [vmem:[#allocation3 + $0xa0] sm:$0xff]  ;;  %v4808_v57 = vld [vmem:[#allocation3 + $0xa8] sm:$0xff]  ;;  %v7023_v55 = vld [vmem:[#allocation50_spill] sm:$0xff] }
 0x108   :  { %1060 = vmatpush.msra.mxu0 %v4778_v40  ;;  %1082 = vmatpush.msra.mxu1 %v4799_v46  ;;  %v708_v25 = vor.u32 1.1754944e-38, %v707_v34  ;;  %vm706_vm8 = vcmp.eq.f32.partialorder %v705_v16, 8.507059e+37  ;;  %v4849_v39 = vld [vmem:[#allocation3] sm:$0xff]  ;;  %v4868_v34 = vld [vmem:[#allocation6 + $0x1c8] sm:$0xff] }
 0x109   :  { %1102 = vmatpush.msra.mxu2 %v4296_v35  ;;  %1122 = vmatpush.msra.mxu3 %v6972_v62  ;;  %3233 = vtanh.f32 %v4794_v22  ;;  %v4815_v35 = vld [vmem:[#allocation3 + $0x80] sm:$0xff]  ;;  %v4818_v62 = vld [vmem:[#allocation3 + $0x88] sm:$0xff]  ;;  %7028 = vst [vmem:[#allocation16_spill] sm:$0xff] %v4868_v34 }
 0x10a   :  { %1061 = vmatpush.msra.mxu0 %v4786_v4  ;;  %1083 = vmatpush.msra.mxu1 %v4808_v57  ;;  %v4876_v16 = vld [vmem:[#allocation6 + $0x1a8] sm:$0xff] }
 0x10b   :  { %1103 = vmatpush.msra.mxu2 %v6975_v9  ;;  %1123 = vmatpush.msra.mxu3 %v6976_v12  ;;  %v4824_v9 = vld [vmem:[#allocation3 + $0x60] sm:$0xff]  ;;  %v4827_v12 = vld [vmem:[#allocation3 + $0x68] sm:$0xff]  ;;  %7030 = vst [vmem:[#allocation26_spill] sm:$0xff] %v4876_v16 }
 0x10c   :  { %v3232_v48 = vpop.eup %3231  ;;  %1062 = vmatpush.msra.mxu0 %v4796_v43  ;;  %1084 = vmatpush.msra.mxu1 %v4818_v62 }
 0x10d   :  { %v697_v49 = vmul.f32 %v3232_v48, %v4751_v41  ;;  %vm702_vm5 = vweird.f32 %v3232_v48  ;;  %1104 = vmatpush.msra.mxu2 %v6979_v29  ;;  %1124 = vmatpush.msra.mxu3 %v6980_v30  ;;  %v4833_v29 = vld [vmem:[#allocation3 + $0x40] sm:$0xff]  ;;  %v4836_v30 = vld [vmem:[#allocation3 + $0x48] sm:$0xff] }
 0x10e   :  { %1063 = vmatpush.msra.mxu0 %v4805_v54  ;;  %1085 = vmatpush.msra.mxu1 %v4827_v12  ;;  %vm703_vm7 = vmor %vm701_vm6, %vm702_vm5 }
 0x10f   :  { %v698_v5 = vsub.f32 1.0, %v697_v49  ;;  %1105 = vmatpush.msra.mxu2 %v7019_v15  ;;  %1125 = vmatpush.msra.mxu3 %v7020_v38  ;;  %v3234_v41 = vpop.eup %3233  ;;  %v4860_v49 = vld [vmem:[#allocation6 + $0x1e8] sm:$0xff]  ;;  %v4897_v38 = vld [vmem:[#allocation6 + $0x140] sm:$0xff] }
 0x110   :  { %1064 = vmatpush.msra.mxu0 %v4815_v35  ;;  %1086 = vmatpush.msra.mxu1 %v4836_v30  ;;  %7025 = vst [vmem:[#allocation22_spill] sm:$0xff] %v4860_v49  ;;  %v4892_v15 = vld [vmem:[#allocation6 + $0x168] sm:$0xff] }
 0x111   :  { %v699_v13 = vmul.f32 %v3232_v48, %v698_v5  ;;  %1106 = vmatpush.msra.mxu2 %v6987_v61  ;;  %1126 = vmatpush.msra.mxu3 %v6988_v1  ;;  %v4852_v61 = vld [vmem:[#allocation3 + $0x8] sm:$0xff]  ;;  %v7026_v5 = vld [vmem:[#allocation53_spill] sm:$0xff]  ;;  %7035 = vst [vmem:[#allocation30_spill] sm:$0xff] %v4892_v15 }
 0x112   :  { %1065 = vmatpush.msra.mxu0 %v4824_v9  ;;  %1087 = vmatpush.msra.mxu1 %v4844_v31  ;;  %7038 = vst [vmem:[#allocation24_spill] sm:$0xff] %v4897_v38 }
 0x113   :  { %v700_v19 = vadd.f32 %v3232_v48, %v699_v13  ;;  %1107 = vmatpush.msra.mxu2 %v7021_v17  ;;  %1127 = vmatpush.msra.mxu3 %v7022_v2  ;;  %v4873_v13 = vld [vmem:[#allocation6 + $0x1a0] sm:$0xff]  ;;  %v7045_v17 = vld [vmem:[#allocation65_spill] sm:$0xff] }
 0x114   :  { %1066 = vmatpush.msra.mxu0 %v4833_v29  ;;  %1088 = vmatpush.msra.mxu1 %v4852_v61  ;;  %7029 = vst [vmem:[#allocation17_spill] sm:$0xff] %v4873_v13  ;;  %v4913_v2 = vld [vmem:[#allocation6 + $0x100] sm:$0xff] }
 0x115   :  { %v704_v28 = vsel %vm703_vm7, %v3232_v48, %v700_v19  ;;  %1108 = vmatpush.msra.mxu2 %v6995_v50  ;;  %1128 = vmatpush.msra.mxu3 %v7023_v55  ;;  %v4857_v48 = vld [vmem:[#allocation6 + $0x1e0] sm:$0xff]  ;;  %v4884_v19 = vld [vmem:[#allocation6 + $0x188] sm:$0xff]  ;;  %7046 = vst [vmem:[#allocation27_spill] sm:$0xff] %v4913_v2  ;;  %v7048_v55 = vld [vmem:[#allocation66_spill] sm:$0xff] }
 0x116   :  { %v709_v14 = vsel %vm706_vm8, %v708_v25, %v704_v28  ;;  %1067 = vmatpush.msra.mxu0 %v4841_v37  ;;  %7024 = vst [vmem:[#allocation15_spill] sm:$0xff] %v4857_v48  ;;  %v4865_v50 = vld [vmem:[#allocation6 + $0x1c0] sm:$0xff]  ;;  %v4900_v25 = vld [vmem:[#allocation6 + $0x148] sm:$0xff] }
 0x117   :  { %v715_v33 = vmul.f32 %v3234_v41, %v709_v14  ;;  %7027 = vst [vmem:[#allocation23_spill] sm:$0xff] %v4865_v50  ;;  %v7041_v28 = vld [vmem:[#allocation63_spill] sm:$0xff]  ;;  %v4908_v14 = vld [vmem:[#allocation6 + $0x128] sm:$0xff] }
 0x118   :  { %1068 = vmatpush.msra.mxu0 %v4849_v39  ;;  %7032 = vst [vmem:[#allocation21_spill] sm:$0xff] %v4884_v19  ;;  %v4905_v41 = vld [vmem:[#allocation6 + $0x120] sm:$0xff] }
 0x119   :  { %v718_v1 = vrot.slane %v715_v33, 7  ;;  %7039 = vst [vmem:[#allocation25_spill] sm:$0xff] %v4900_v25  ;;  %v7044_v33 = vld [vmem:[#allocation64_spill] sm:$0xff] }
 0x11a   :  { %7042 = vst [vmem:[#allocation33_spill] sm:$0xff] %v4905_v41 }
 0x11b   :  { %720 = vst [vmem:[#allocation2 + $0xf] sm:$0x1] %v718_v1  ;;  %899 = vmatmul.f32.vlgmr.msrb.gmra.mxu0 %v718_v1  ;;  %919 = vmatmul.f32.vlgmr.msrb.gmra.mxu1 %v718_v1 }
 0x11c   :  { %939 = vmatmul.f32.vlgmr.msrb.gmra.mxu2 %v718_v1  ;;  %959 = vmatmul.f32.vlgmr.msrb.gmra.mxu3 %v718_v1  ;;  %7043 = vst [vmem:[#allocation34_spill] sm:$0xff] %v4908_v14  ;;  %v4916_v1 = vld [vmem:[#allocation6 + $0x108] sm:$0xff] }
 0x11d   :  { %1215 = vmatpush.msrb.mxu0 %v4857_v48  ;;  %1235 = vmatpush.msrb.mxu1 %v4860_v49  ;;  %7047 = vst [vmem:[#allocation28_spill] sm:$0xff] %v4916_v1 }
 0x11e   :  { %1255 = vmatpush.msrb.mxu2 %v7026_v5  ;;  %1275 = vmatpush.msrb.mxu3 %v4388_v59  ;;  %v4881_v59 = vld [vmem:[#allocation6 + $0x180] sm:$0xff] }
 0x11f   :  { %1216 = vmatpush.msrb.mxu0 %v4865_v50  ;;  %1236 = vmatpush.msrb.mxu1 %v4868_v34  ;;  %7031 = vst [vmem:[#allocation20_spill] sm:$0xff] %v4881_v59  ;;  %v7049_v5 = vld [vmem:[#allocation67_spill] sm:$0xff] }
 0x120   :  { %1256 = vmatpush.msrb.mxu2 %v6999_v20  ;;  %1276 = vmatpush.msrb.mxu3 %v7000_v21  ;;  %v7033_v21 = vld [vmem:[#allocation59_spill] sm:$0xff] }
 0x121   :  { %1217 = vmatpush.msrb.mxu0 %v4873_v13  ;;  %1237 = vmatpush.msrb.mxu1 %v4876_v16  ;;  %v4889_v20 = vld [vmem:[#allocation6 + $0x160] sm:$0xff] }
 0x122   :  { %1257 = vmatpush.msrb.mxu2 %v4406_v60  ;;  %1277 = vmatpush.msrb.mxu3 %v7003_v45  ;;  %7034 = vst [vmem:[#allocation29_spill] sm:$0xff] %v4889_v20  ;;  %v7036_v60 = vld [vmem:[#allocation60_spill] sm:$0xff]  ;;  %v7037_v45 = vld [vmem:[#allocation61_spill] sm:$0xff] }
 0x123   :  { %1218 = vmatpush.msrb.mxu0 %v4881_v59  ;;  %1238 = vmatpush.msrb.mxu1 %v4884_v19 }
 0x124   :  { %1258 = vmatpush.msrb.mxu2 %v4414_v44  ;;  %1278 = vmatpush.msrb.mxu3 %v7033_v21  ;;  %v7040_v44 = vld [vmem:[#allocation62_spill] sm:$0xff]  ;;  %v4921_v21 = vld [vmem:[#allocation6 + $0xe0] sm:$0xff] }
 0x125   :  { %1219 = vmatpush.msrb.mxu0 %v4889_v20  ;;  %1239 = vmatpush.msrb.mxu1 %v4892_v15  ;;  %7050 = vst [vmem:[#allocation31_spill] sm:$0xff] %v4921_v21 }
 0x126   :  { %1259 = vmatpush.msrb.mxu2 %v7036_v60  ;;  %1279 = vmatpush.msrb.mxu3 %v7037_v45  ;;  %v4924_v60 = vld [vmem:[#allocation6 + $0xe8] sm:$0xff] }
 0x127   :  { %1220 = vmatpush.msrb.mxu0 %v4897_v38  ;;  %1240 = vmatpush.msrb.mxu1 %v4900_v25  ;;  %7051 = vst [vmem:[#allocation32_spill] sm:$0xff] %v4924_v60  ;;  %v7052_v45 = vld [vmem:[#allocation68_spill] sm:$0xff]  ;;  %v7083_v25 = vld [vmem:[#allocation13_spill] sm:$0xff] }
 0x128   :  { %1260 = vmatpush.msrb.mxu2 %v7040_v44  ;;  %1280 = vmatpush.msrb.mxu3 %v7041_v28  ;;  %v7053_v44 = vld [vmem:[#allocation69_spill] sm:$0xff]  ;;  %v4929_v28 = vld [vmem:[#allocation6 + $0xc0] sm:$0xff] }
 0x129   :  { %1221 = vmatpush.msrb.mxu0 %v4905_v41  ;;  %1241 = vmatpush.msrb.mxu1 %v4908_v14  ;;  %7054 = vst [vmem:[#allocation41_spill] sm:$0xff] %v4929_v28  ;;  %v7082_v14 = vld [vmem:[#allocation12_spill] sm:$0xff] }
 0x12a   :  { %1261 = vmatpush.msrb.mxu2 %v7044_v33  ;;  %1281 = vmatpush.msrb.mxu3 %v7045_v17  ;;  %v4932_v33 = vld [vmem:[#allocation6 + $0xc8] sm:$0xff]  ;;  %v7056_v17 = vld [vmem:[#allocation70_spill] sm:$0xff] }
 0x12b   :  { %1222 = vmatpush.msrb.mxu0 %v4913_v2  ;;  %1242 = vmatpush.msrb.mxu1 %v4916_v1  ;;  %7055 = vst [vmem:[#allocation42_spill] sm:$0xff] %v4932_v33 }
 0x12c   :  { %1262 = vmatpush.msrb.mxu2 %v7048_v55  ;;  %1282 = vmatpush.msrb.mxu3 %v7049_v5  ;;  %v7057_v55 = vld [vmem:[#allocation71_spill] sm:$0xff] }
 0x12d   :  { %1223 = vmatpush.msrb.mxu0 %v4921_v21  ;;  %1243 = vmatpush.msrb.mxu1 %v4924_v60  ;;  %v4937_v5 = vld [vmem:[#allocation6 + $0xa0] sm:$0xff]  ;;  %v4940_v60 = vld [vmem:[#allocation6 + $0xa8] sm:$0xff] }
 0x12e   :  { %1263 = vmatpush.msrb.mxu2 %v7052_v45  ;;  %1283 = vmatpush.msrb.mxu3 %v7053_v44  ;;  %7058 = vst [vmem:[#allocation35_spill] sm:$0xff] %v4937_v5  ;;  %v7060_v45 = vld [vmem:[#allocation72_spill] sm:$0xff]  ;;  %v7061_v44 = vld [vmem:[#allocation73_spill] sm:$0xff]  ;;  %v7079_v21 = vld [vmem:[#allocation55_spill] sm:$0xff] }
 0x12f   :  { %1224 = vmatpush.msrb.mxu0 %v4929_v28  ;;  %1244 = vmatpush.msrb.mxu1 %v4932_v33  ;;  %7059 = vst [vmem:[#allocation36_spill] sm:$0xff] %v4940_v60  ;;  %v4945_v28 = vld [vmem:[#allocation6 + $0x80] sm:$0xff]  ;;  %v4948_v33 = vld [vmem:[#allocation6 + $0x88] sm:$0xff] }
 0x130   :  { %1264 = vmatpush.msrb.mxu2 %v7056_v17  ;;  %1284 = vmatpush.msrb.mxu3 %v7057_v55  ;;  %7062 = vst [vmem:[#allocation39_spill] sm:$0xff] %v4945_v28  ;;  %v7064_v17 = vld [vmem:[#allocation74_spill] sm:$0xff]  ;;  %v7065_v55 = vld [vmem:[#allocation75_spill] sm:$0xff] }
 0x131   :  { %1225 = vmatpush.msrb.mxu0 %v4937_v5  ;;  %1245 = vmatpush.msrb.mxu1 %v4940_v60  ;;  %7063 = vst [vmem:[#allocation40_spill] sm:$0xff] %v4948_v33  ;;  %v4953_v5 = vld [vmem:[#allocation6 + $0x60] sm:$0xff]  ;;  %v4956_v60 = vld [vmem:[#allocation6 + $0x68] sm:$0xff] }
 0x132   :  { %1265 = vmatpush.msrb.mxu2 %v7060_v45  ;;  %1285 = vmatpush.msrb.mxu3 %v7061_v44  ;;  %7066 = vst [vmem:[#allocation49_spill] sm:$0xff] %v4953_v5  ;;  %v7068_v45 = vld [vmem:[#allocation76_spill] sm:$0xff]  ;;  %v7069_v44 = vld [vmem:[#allocation77_spill] sm:$0xff] }
 0x133   :  { %1226 = vmatpush.msrb.mxu0 %v4945_v28  ;;  %1246 = vmatpush.msrb.mxu1 %v4948_v33  ;;  %7067 = vst [vmem:[#allocation43_spill] sm:$0xff] %v4956_v60  ;;  %v4961_v28 = vld [vmem:[#allocation6 + $0x40] sm:$0xff]  ;;  %v4964_v33 = vld [vmem:[#allocation6 + $0x48] sm:$0xff] }
 0x134   :  { %1266 = vmatpush.msrb.mxu2 %v7064_v17  ;;  %1286 = vmatpush.msrb.mxu3 %v7065_v55  ;;  %7070 = vst [vmem:[#allocation44_spill] sm:$0xff] %v4961_v28  ;;  %v7072_v17 = vld [vmem:[#allocation78_spill] sm:$0xff]  ;;  %v7073_v55 = vld [vmem:[#allocation79_spill] sm:$0xff] }
 0x135   :  { %1227 = vmatpush.msrb.mxu0 %v4953_v5  ;;  %1247 = vmatpush.msrb.mxu1 %v4956_v60  ;;  %7071 = vst [vmem:[#allocation56_spill] sm:$0xff] %v4964_v33  ;;  %v4969_v5 = vld [vmem:[#allocation6 + $0x20] sm:$0xff]  ;;  %v4972_v60 = vld [vmem:[#allocation6 + $0x28] sm:$0xff] }
 0x136   :  { %1267 = vmatpush.msrb.mxu2 %v7068_v45  ;;  %1287 = vmatpush.msrb.mxu3 %v7069_v44  ;;  %7074 = vst [vmem:[#allocation57_spill] sm:$0xff] %v4969_v5  ;;  %v7076_v45 = vld [vmem:[#allocation80_spill] sm:$0xff]  ;;  %v7077_v44 = vld [vmem:[#allocation81_spill] sm:$0xff] }
 0x137   :  { %1228 = vmatpush.msrb.mxu0 %v4961_v28  ;;  %1248 = vmatpush.msrb.mxu1 %v4964_v33  ;;  %7075 = vst [vmem:[#allocation47_spill] sm:$0xff] %v4972_v60  ;;  %v7078_v28 = vld [vmem:[#allocation54_spill] sm:$0xff] }
 0x138   :  { %1268 = vmatpush.msrb.mxu2 %v7072_v17  ;;  %1288 = vmatpush.msrb.mxu3 %v7073_v55  ;;  %v7080_v33 = vld [vmem:[#allocation82_spill] sm:$0xff]  ;;  %v7081_v17 = vld [vmem:[#allocation83_spill] sm:$0xff] }
 0x139   :  { %1229 = vmatpush.msrb.mxu0 %v4969_v5  ;;  %1249 = vmatpush.msrb.mxu1 %v4972_v60 }
 0x13a   :  { %1269 = vmatpush.msrb.mxu2 %v7076_v45  ;;  %1289 = vmatpush.msrb.mxu3 %v7077_v44 }
 0x13b   :  { %1230 = vmatpush.msrb.mxu0 %v7078_v28  ;;  %1250 = vmatpush.msrb.mxu1 %v7079_v21 }
 0x13c   :  { %1270 = vmatpush.msrb.mxu2 %v7080_v33  ;;  %1290 = vmatpush.msrb.mxu3 %v7081_v17 }
 0x171   :  { %v738_v55 = vpop.f32.mrf.mxu0  ;;  %v758_v1 = vpop.f32.mrf.mxu1 }
 0x172   :  { %v805_v2 = vrot.slane %v738_v55, 7  ;;  %v806_v5 = vrot.slane %v758_v1, 7 }
 0x174   :  { %v813_v41 = vadd.f32 %v805_v2, %v7082_v14  ;;  %v814_v60 = vadd.f32 %v806_v5, %v7083_v25 }
 0x176   :  { %v3154_v38 = vmul.f32 -1.442695, %v813_v41  ;;  %v3155_v45 = vmul.f32 -1.442695, %v814_v60 }
 0x178   :  { %3235 = vpow2.f32 %v3154_v38  ;;  %v798_v44 = vpop.f32.mrf.mxu3  ;;  %v778_v55 = vpop.f32.mrf.mxu2 }
 0x179   :  { %3237 = vpow2.f32 %v3155_v45  ;;  %v808_v28 = vrot.slane %v798_v44, 7  ;;  %v807_v2 = vrot.slane %v778_v55, 7 }
 0x17b   :  { %v816_v21 = vadd.f32 %v808_v28, %v4644_v53  ;;  %v815_v38 = vadd.f32 %v807_v2, %v4651_v36 }
 0x17d   :  { %v3156_v15 = vmul.f32 -1.442695, %v816_v21 }
 0x17e   :  { %v3236_v33 = vpop.eup %3235 }
 0x17f   :  { %v3238_v20 = vpop.eup %3237  ;;  %v820_v17 = vadd.f32 1.0, %v3236_v33  ;;  %3239 = vpow2.f32 %v3156_v15 }
 0x180   :  { %v839_v19 = vadd.f32 1.0, %v3238_v20 }
 0x181   :  { %3241 = vrcp.f32 %v820_v17  ;;  %v832_v53 = vand.u32 2147483648, %v820_v17  ;;  %v830_v20 = vand.u32 2147483647, %v820_v17  ;;  %vm826_vm11 = vweird.f32 %v820_v17 }
 0x182   :  { %3243 = vrcp.f32 %v839_v19  ;;  %v851_v33 = vand.u32 2147483648, %v839_v19  ;;  %v849_v55 = vand.u32 2147483647, %v839_v19  ;;  %vm845_vm12 = vweird.f32 %v839_v19 }
 0x183   :  { %v833_v2 = vor.u32 1.1754944e-38, %v832_v53  ;;  %vm831_vm15 = vcmp.eq.f32.partialorder %v830_v20, 8.507059e+37 }
 0x184   :  { %vm850_vm0 = vcmp.eq.f32.partialorder %v849_v55, 8.507059e+37 }
 0x185   :  { %v3240_v1 = vpop.eup %3239 }
 0x186   :  { %v859_v5 = vadd.f32 1.0, %v3240_v1 }
 0x187   :  { %v3242_v41 = vpop.eup %3241 }
 0x188   :  { %v3244_v60 = vpop.eup %3243  ;;  %v822_v45 = vmul.f32 %v3242_v41, %v820_v17  ;;  %3245 = vrcp.f32 %v859_v5  ;;  %vm827_vm9 = vweird.f32 %v3242_v41  ;;  %vm865_vm2 = vweird.f32 %v859_v5 }
 0x189   :  { %v841_v44 = vmul.f32 %v3244_v60, %v839_v19  ;;  %3247 = vtanh.f32 %v815_v38  ;;  %vm846_vm10 = vweird.f32 %v3244_v60  ;;  %vm828_vm13 = vmor %vm826_vm11, %vm827_vm9 }
 0x18a   :  { %v823_v28 = vsub.f32 1.0, %v822_v45  ;;  %v876_v45 = vrot.slane %v4668_v27, 7  ;;  %vm847_vm14 = vmor %vm845_vm12, %vm846_vm10 }
 0x18b   :  { %v842_v21 = vsub.f32 1.0, %v841_v44  ;;  %v852_v44 = vor.u32 1.1754944e-38, %v851_v33 }
 0x18c   :  { %v824_v15 = vmul.f32 %v3242_v41, %v823_v28 }
 0x18d   :  { %v843_v25 = vmul.f32 %v3244_v60, %v842_v21 }
 0x18e   :  { %v3246_v14 = vpop.eup %3245  ;;  %v825_v1 = vadd.f32 %v3242_v41, %v824_v15 }
 0x18f   :  { %v844_v36 = vadd.f32 %v3244_v60, %v843_v25  ;;  %v861_v59 = vmul.f32 %v3246_v14, %v859_v5  ;;  %v3248_v28 = vpop.eup %3247  ;;  %vm866_vm1 = vweird.f32 %v3246_v14 }
 0x190   :  { %v829_v38 = vsel %vm828_vm13, %v3242_v41, %v825_v1  ;;  %v871_v41 = vand.u32 2147483648, %v859_v5  ;;  %vm867_vm3 = vmor %vm865_vm2, %vm866_vm1 }
 0x191   :  { %v834_v16 = vsel %vm831_vm15, %v833_v2, %v829_v38  ;;  %v848_v13 = vsel %vm847_vm14, %v3244_v60, %v844_v36  ;;  %v862_v21 = vsub.f32 1.0, %v861_v59  ;;  %v7084_v36 = vld [vmem:[#allocation19_spill] sm:$0xff] }
 0x192   :  { %v853_v34 = vsel %vm850_vm0, %v852_v44, %v848_v13  ;;  %v879_v50 = vmul.f32 %v3248_v28, %v834_v16  ;;  %v869_v13 = vand.u32 2147483647, %v859_v5  ;;  %v872_v20 = vor.u32 1.1754944e-38, %v871_v41  ;;  %v5018_v41 = vld [vmem:[#allocation3 + $0x1b0] sm:$0xff] }
 0x193   :  { %v878_v15 = vmul.f32 %v876_v45, %v853_v34  ;;  %v863_v17 = vmul.f32 %v3246_v14, %v862_v21 }
 0x194   :  { %vm870_vm4 = vcmp.eq.f32.partialorder %v869_v13, 8.507059e+37  ;;  %v5037_v13 = vld [vmem:[#allocation3 + $0x198] sm:$0xff] }
 0x195   :  { %v4986_v53 = vadd.f32 %v879_v50, %v878_v15  ;;  %v864_v27 = vadd.f32 %v3246_v14, %v863_v17  ;;  %v5000_v15 = vld [vmem:[#allocation3 + $0x1f0] sm:$0xff]  ;;  %v5003_v17 = vld [vmem:[#allocation3 + $0x1f8] sm:$0xff] }
 0x197   :  { %3249 = vtanh.f32 %v4986_v53  ;;  %v868_v59 = vsel %vm867_vm3, %v3246_v14, %v864_v27 }
 0x198   :  { %v900_v19 = vpop.f32.mrf.mxu0  ;;  %v920_v49 = vpop.f32.mrf.mxu1  ;;  %v873_v1 = vsel %vm870_vm4, %v872_v20, %v868_v59 }
 0x199   :  { %v967_v25 = vrot.slane %v900_v19, 2  ;;  %v968_v48 = vrot.slane %v920_v49, 2 }
 0x19b   :  { %v975_v33 = vadd.f32 %v967_v25, %v4648_v6  ;;  %v976_v60 = vadd.f32 %v968_v48, %v7084_v36  ;;  %v5008_v25 = vld [vmem:[#allocation3 + $0x1d0] sm:$0xff] }
 0x19d   :  { %v3157_v16 = vmul.f32 -1.442695, %v975_v33  ;;  %v3158_v34 = vmul.f32 -1.442695, %v976_v60  ;;  %v3250_v55 = vpop.eup %3249  ;;  %v5034_v60 = vld [vmem:[#allocation3 + $0x190] sm:$0xff] }
 0x19e   :  { %v882_v45 = vmul.f32 %v3250_v55, %v873_v1  ;;  %v5060_v55 = vld [vmem:[#allocation3 + $0x158] sm:$0xff] }
 0x19f   :  { %3251 = vpow2.f32 %v3157_v16  ;;  %v960_v50 = vpop.f32.mrf.mxu3  ;;  %v940_v21 = vpop.f32.mrf.mxu2  ;;  %v5044_v16 = vld [vmem:[#allocation3 + $0x170] sm:$0xff] }
 0x1a0   :  { %3253 = vpow2.f32 %v3158_v34  ;;  %v970_v49 = vrot.slane %v960_v50, 2  ;;  %v1046_v38 = vrot.slane %v882_v45, 1  ;;  %v969_v19 = vrot.slane %v940_v21, 2  ;;  %v5047_v34 = vld [vmem:[#allocation3 + $0x178] sm:$0xff]  ;;  %v5072_v45 = vld [vmem:[#allocation3 + $0x130] sm:$0xff] }
 0x1a2   :  { %v978_v2 = vadd.f32 %v970_v49, %v4682_v10  ;;  %1048 = vst [vmem:[#allocation2 + $0x1] sm:$0x1] %v1046_v38  ;;  %1069 = vmatmul.f32.vlgmr.msra.gmra.mxu0 %v1046_v38  ;;  %1089 = vmatmul.f32.vlgmr.msra.gmra.mxu1 %v1046_v38  ;;  %v977_v33 = vadd.f32 %v969_v19, %v4686_v26  ;;  %v5057_v49 = vld [vmem:[#allocation3 + $0x150] sm:$0xff] }
 0x1a3   :  { %1109 = vmatmul.f32.vlgmr.msra.gmra.mxu2 %v1046_v38  ;;  %1129 = vmatmul.f32.vlgmr.msra.gmra.mxu3 %v1046_v38  ;;  %v5100_v19 = vld [vmem:[#allocation3 + $0x110] sm:$0xff] }
 0x1a4   :  { %v3159_v44 = vmul.f32 -1.442695, %v978_v2  ;;  %1385 = vmatpush.msra.mxu0 %v4688_v52  ;;  %1405 = vmatpush.msra.mxu1 %v4691_v42  ;;  %v5011_v52 = vld [vmem:[#allocation3 + $0x1d8] sm:$0xff] }
 0x1a5   :  { %v3252_v48 = vpop.eup %3251  ;;  %1425 = vmatpush.msra.mxu2 %v5000_v15  ;;  %1445 = vmatpush.msra.mxu3 %v5003_v17 }
 0x1a6   :  { %v3254_v28 = vpop.eup %3253  ;;  %v4992_v5 = vadd.f32 1.0, %v3252_v48  ;;  %3255 = vpow2.f32 %v3159_v44  ;;  %1386 = vmatpush.msra.mxu0 %v4699_v7  ;;  %1406 = vmatpush.msra.mxu1 %v4702_v58  ;;  %v5021_v7 = vld [vmem:[#allocation3 + $0x1b8] sm:$0xff] }
 0x1a7   :  { %v4994_v14 = vadd.f32 1.0, %v3254_v28  ;;  %1426 = vmatpush.msra.mxu2 %v5008_v25  ;;  %1446 = vmatpush.msra.mxu3 %v5011_v52  ;;  %v5075_v44 = vld [vmem:[#allocation3 + $0x138] sm:$0xff]  ;;  %v1038_v28 = vrot.slane %v4794_v22, 1 }
 0x1a8   :  { %3257 = vrcp.f32 %v4992_v5  ;;  %1387 = vmatpush.msra.mxu0 %v4707_v63  ;;  %1407 = vmatpush.msra.mxu1 %v4710_v0  ;;  %v994_v50 = vand.u32 2147483648, %v4992_v5  ;;  %v992_v20 = vand.u32 2147483647, %v4992_v5  ;;  %vm988_vm7 = vweird.f32 %v4992_v5 }
 0x1a9   :  { %3259 = vrcp.f32 %v4994_v14  ;;  %1427 = vmatpush.msra.mxu2 %v5018_v41  ;;  %1447 = vmatpush.msra.mxu3 %v5021_v7  ;;  %vm1007_vm8 = vweird.f32 %v4994_v14 }
 0x1aa   :  { %1388 = vmatpush.msra.mxu0 %v4719_v8  ;;  %1408 = vmatpush.msra.mxu1 %v4722_v56  ;;  %vm993_vm11 = vcmp.eq.f32.partialorder %v992_v20, 8.507059e+37  ;;  %v5147_v20 = vld [vmem:[#allocation3 + $0x98] sm:$0xff] }
 0x1ab   :  { %1428 = vmatpush.msra.mxu2 %v5034_v60  ;;  %1448 = vmatpush.msra.mxu3 %v5037_v13 }
 0x1ac   :  { %v3256_v42 = vpop.eup %3255  ;;  %1389 = vmatpush.msra.mxu0 %v4739_v11  ;;  %1409 = vmatpush.msra.mxu1 %v4742_v24  ;;  %v1013_v11 = vand.u32 2147483648, %v4994_v14 }
 0x1ad   :  { %v5016_v27 = vadd.f32 1.0, %v3256_v42  ;;  %1429 = vmatpush.msra.mxu2 %v5044_v16  ;;  %1449 = vmatpush.msra.mxu3 %v5047_v34 }
 0x1ae   :  { %v5024_v58 = vpop.eup %3257  ;;  %1390 = vmatpush.msra.mxu0 %v4761_v51  ;;  %1410 = vmatpush.msra.mxu1 %v4764_v18  ;;  %v1011_v18 = vand.u32 2147483647, %v4994_v14 }
 0x1af   :  { %v5029_v63 = vpop.eup %3259  ;;  %v984_v0 = vmul.f32 %v5024_v58, %v4992_v5  ;;  %3261 = vrcp.f32 %v5016_v27  ;;  %vm989_vm5 = vweird.f32 %v5024_v58  ;;  %1430 = vmatpush.msra.mxu2 %v5057_v49  ;;  %1450 = vmatpush.msra.mxu3 %v5060_v55  ;;  %vm1027_vm14 = vweird.f32 %v5016_v27  ;;  %v7097_v5 = vld [vmem:[#allocation16_spill] sm:$0xff] }
 0x1b0   :  { %v1003_v8 = vmul.f32 %v5029_v63, %v4994_v14  ;;  %3263 = vtanh.f32 %v977_v33  ;;  %vm1008_vm6 = vweird.f32 %v5029_v63  ;;  %1391 = vmatpush.msra.mxu0 %v4770_v32  ;;  %1411 = vmatpush.msra.mxu1 %v4773_v3  ;;  %vm5081_vm9 = vmor %vm988_vm7, %vm989_vm5  ;;  %v995_v3 = vor.u32 1.1754944e-38, %v994_v50 }
 0x1b1   :  { %v985_v56 = vsub.f32 1.0, %v984_v0  ;;  %1431 = vmatpush.msra.mxu2 %v5072_v45  ;;  %1451 = vmatpush.msra.mxu3 %v5075_v44  ;;  %vm5093_vm10 = vmor %vm1007_vm8, %vm1008_vm6  ;;  %v1014_v14 = vor.u32 1.1754944e-38, %v1013_v11  ;;  %vm1012_vm12 = vcmp.eq.f32.partialorder %v1011_v18, 8.507059e+37 }
 0x1b2   :  { %v1004_v59 = vsub.f32 1.0, %v1003_v8  ;;  %1392 = vmatpush.msra.mxu0 %v4778_v40  ;;  %1412 = vmatpush.msra.mxu1 %v4781_v23  ;;  %v5103_v40 = vld [vmem:[#allocation3 + $0x118] sm:$0xff]  ;;  %v5111_v8 = vld [vmem:[#allocation3 + $0xf0] sm:$0xff] }
 0x1b3   :  { %v986_v24 = vmul.f32 %v5024_v58, %v985_v56  ;;  %1432 = vmatpush.msra.mxu2 %v5100_v19  ;;  %1452 = vmatpush.msra.mxu3 %v5103_v40  ;;  %v5114_v56 = vld [vmem:[#allocation3 + $0xf8] sm:$0xff] }
 0x1b4   :  { %v1005_v51 = vmul.f32 %v5029_v63, %v1004_v59  ;;  %1393 = vmatpush.msra.mxu0 %v4786_v4  ;;  %1413 = vmatpush.msra.mxu1 %v4789_v47  ;;  %v5120_v4 = vld [vmem:[#allocation3 + $0xd0] sm:$0xff]  ;;  %v5123_v47 = vld [vmem:[#allocation3 + $0xd8] sm:$0xff] }
 0x1b5   :  { %v5068_v1 = vpop.eup %3261  ;;  %v987_v2 = vadd.f32 %v5024_v58, %v986_v24  ;;  %1433 = vmatpush.msra.mxu2 %v5111_v8  ;;  %1453 = vmatpush.msra.mxu3 %v5114_v56  ;;  %v1033_v24 = vand.u32 2147483648, %v5016_v27 }
 0x1b6   :  { %v1006_v38 = vadd.f32 %v5029_v63, %v1005_v51  ;;  %v1023_v48 = vmul.f32 %v5068_v1, %v5016_v27  ;;  %v3264_v23 = vpop.eup %3263  ;;  %1394 = vmatpush.msra.mxu0 %v4796_v43  ;;  %1414 = vmatpush.msra.mxu1 %v4799_v46  ;;  %vm1028_vm13 = vweird.f32 %v5068_v1  ;;  %v5132_v43 = vld [vmem:[#allocation3 + $0xb0] sm:$0xff]  ;;  %v5135_v46 = vld [vmem:[#allocation3 + $0xb8] sm:$0xff] }
 0x1b7   :  { %v991_v21 = vsel %vm5081_vm9, %v5024_v58, %v987_v2  ;;  %1434 = vmatpush.msra.mxu2 %v5120_v4  ;;  %1454 = vmatpush.msra.mxu3 %v5123_v47  ;;  %vm5152_vm15 = vmor %vm1027_vm14, %vm1028_vm13  ;;  %v1034_v18 = vor.u32 1.1754944e-38, %v1033_v24  ;;  %v7109_v24 = vld [vmem:[#allocation30_spill] sm:$0xff] }
 0x1b8   :  { %v996_v22 = vsel %vm993_vm11, %v995_v3, %v991_v21  ;;  %v1010_v42 = vsel %vm5093_vm10, %v5029_v63, %v1006_v38  ;;  %v1024_v33 = vsub.f32 1.0, %v1023_v48  ;;  %1395 = vmatpush.msra.mxu0 %v4805_v54  ;;  %1415 = vmatpush.msra.mxu1 %v4808_v57  ;;  %v1031_v54 = vand.u32 2147483647, %v5016_v27  ;;  %v5144_v57 = vld [vmem:[#allocation3 + $0x90] sm:$0xff]  ;;  %v5164_v27 = vld [vmem:[#allocation3 + $0x78] sm:$0xff] }
 0x1b9   :  { %v1015_v58 = vsel %vm1012_vm12, %v1014_v14, %v1010_v42  ;;  %v1041_v0 = vmul.f32 %v3264_v23, %v996_v22  ;;  %1435 = vmatpush.msra.mxu2 %v5132_v43  ;;  %1455 = vmatpush.msra.mxu3 %v5135_v46  ;;  %v5177_v3 = vld [vmem:[#allocation3 + $0x30] sm:$0xff]  ;;  %v7093_v48 = vld [vmem:[#allocation22_spill] sm:$0xff] }
 0x1ba   :  { %v1040_v59 = vmul.f32 %v1038_v28, %v1015_v58  ;;  %v1025_v50 = vmul.f32 %v5068_v1, %v1024_v33  ;;  %1396 = vmatpush.msra.mxu0 %v4815_v35  ;;  %1416 = vmatpush.msra.mxu1 %v4818_v62  ;;  %v5161_v62 = vld [vmem:[#allocation3 + $0x70] sm:$0xff]  ;;  %vm1032_vm0 = vcmp.eq.f32.partialorder %v1031_v54, 8.507059e+37  ;;  %v7096_v28 = vld [vmem:[#allocation23_spill] sm:$0xff]  ;;  %v5204_v21 = vld [vmem:[#allocation6 + $0x1d8] sm:$0xff] }
 0x1bb   :  { %1436 = vmatpush.msra.mxu2 %v5144_v57  ;;  %1456 = vmatpush.msra.mxu3 %v5147_v20  ;;  %v5185_v38 = vld [vmem:[#allocation3 + $0x10] sm:$0xff]  ;;  %7099 = vst [vmem:[#allocation37_spill] sm:$0xff] %v5204_v21  ;;  %v7101_v22 = vld [vmem:[#allocation26_spill] sm:$0xff]  ;;  %v7104_v58 = vld [vmem:[#allocation20_spill] sm:$0xff] }
 0x1bc   :  { %v5126_v63 = vadd.f32 %v1041_v0, %v1040_v59  ;;  %v1026_v11 = vadd.f32 %v5068_v1, %v1025_v50  ;;  %1397 = vmatpush.msra.mxu0 %v4824_v9  ;;  %1417 = vmatpush.msra.mxu1 %v4827_v12  ;;  %v5169_v9 = vld [vmem:[#allocation3 + $0x50] sm:$0xff]  ;;  %v5172_v12 = vld [vmem:[#allocation3 + $0x58] sm:$0xff] }
 0x1bd   :  { %1437 = vmatpush.msra.mxu2 %v5161_v62  ;;  %1457 = vmatpush.msra.mxu3 %v5164_v27  ;;  %v5201_v14 = vld [vmem:[#allocation6 + $0x1d0] sm:$0xff]  ;;  %v5212_v33 = vld [vmem:[#allocation6 + $0x1b8] sm:$0xff] }
 0x1be   :  { %3265 = vtanh.f32 %v5126_v63  ;;  %v1030_v35 = vsel %vm5152_vm15, %v5068_v1, %v1026_v11  ;;  %1398 = vmatpush.msra.mxu0 %v4833_v29  ;;  %1418 = vmatpush.msra.mxu1 %v4836_v30  ;;  %v5180_v29 = vld [vmem:[#allocation3 + $0x38] sm:$0xff]  ;;  %7098 = vst [vmem:[#allocation52_spill] sm:$0xff] %v5201_v14  ;;  %v7100_v23 = vld [vmem:[#allocation17_spill] sm:$0xff] }
 0x1bf   :  { %1438 = vmatpush.msra.mxu2 %v5169_v9  ;;  %1458 = vmatpush.msra.mxu3 %v5172_v12  ;;  %v1035_v2 = vsel %vm1032_vm0, %v1034_v18, %v1030_v35  ;;  %v5209_v42 = vld [vmem:[#allocation6 + $0x1b0] sm:$0xff]  ;;  %7103 = vst [vmem:[#allocation45_spill] sm:$0xff] %v5212_v33  ;;  %v5220_v50 = vld [vmem:[#allocation6 + $0x198] sm:$0xff]  ;;  %v7112_v35 = vld [vmem:[#allocation24_spill] sm:$0xff] }
 0x1c0   :  { %1399 = vmatpush.msra.mxu0 %v4841_v37  ;;  %1419 = vmatpush.msra.mxu1 %v4844_v31  ;;  %v5188_v37 = vld [vmem:[#allocation3 + $0x18] sm:$0xff]  ;;  %v7092_v31 = vld [vmem:[#allocation15_spill] sm:$0xff]  ;;  %7102 = vst [vmem:[#allocation38_spill] sm:$0xff] %v5209_v42  ;;  %v7105_v0 = vld [vmem:[#allocation21_spill] sm:$0xff] }
 0x1c1   :  { %1439 = vmatpush.msra.mxu2 %v5177_v3  ;;  %1459 = vmatpush.msra.mxu3 %v5180_v29  ;;  %7091 = vst [vmem:[#allocation48_spill] sm:$0xff] %v5188_v37  ;;  %v5217_v59 = vld [vmem:[#allocation6 + $0x190] sm:$0xff]  ;;  %v5228_v51 = vld [vmem:[#allocation6 + $0x178] sm:$0xff] }
 0x1c2   :  { %1400 = vmatpush.msra.mxu0 %v4849_v39  ;;  %1420 = vmatpush.msra.mxu1 %v4852_v61  ;;  %v5193_v39 = vld [vmem:[#allocation6 + $0x1f0] sm:$0xff]  ;;  %v5196_v61 = vld [vmem:[#allocation6 + $0x1f8] sm:$0xff]  ;;  %7106 = vst [vmem:[#allocation46_spill] sm:$0xff] %v5217_v59 }
 0x1c3   :  { %1440 = vmatpush.msra.mxu2 %v5185_v38  ;;  %1460 = vmatpush.msra.mxu3 %v5188_v37  ;;  %7094 = vst [vmem:[#allocation58_spill] sm:$0xff] %v5193_v39  ;;  %v7108_v11 = vld [vmem:[#allocation29_spill] sm:$0xff] }
 0x1c4   :  { %v3266_v1 = vpop.eup %3265  ;;  %7095 = vst [vmem:[#allocation51_spill] sm:$0xff] %v5196_v61  ;;  %v5225_v54 = vld [vmem:[#allocation6 + $0x170] sm:$0xff] }
 0x1c5   :  { %v1044_v32 = vmul.f32 %v3266_v1, %v1035_v2  ;;  %7107 = vst [vmem:[#allocation50_spill] sm:$0xff] %v5220_v50  ;;  %v7113_v18 = vld [vmem:[#allocation25_spill] sm:$0xff]  ;;  %v5236_v2 = vld [vmem:[#allocation6 + $0x158] sm:$0xff] }
 0x1c6   :  { %7110 = vst [vmem:[#allocation53_spill] sm:$0xff] %v5225_v54  ;;  %v5233_v1 = vld [vmem:[#allocation6 + $0x150] sm:$0xff] }
 0x1c7   :  { %v1050_v30 = vrot.slane %v1044_v32, 6  ;;  %7111 = vst [vmem:[#allocation59_spill] sm:$0xff] %v5228_v51  ;;  %v7116_v32 = vld [vmem:[#allocation33_spill] sm:$0xff] }
 0x1c8   :  { %7114 = vst [vmem:[#allocation60_spill] sm:$0xff] %v5233_v1 }
 0x1c9   :  { %1052 = vst [vmem:[#allocation2 + $0xe] sm:$0x1] %v1050_v30  ;;  %1231 = vmatmul.f32.vlgmr.msrb.gmra.mxu0 %v1050_v30  ;;  %1251 = vmatmul.f32.vlgmr.msrb.gmra.mxu1 %v1050_v30 }
 0x1ca   :  { %1271 = vmatmul.f32.vlgmr.msrb.gmra.mxu2 %v1050_v30  ;;  %1291 = vmatmul.f32.vlgmr.msrb.gmra.mxu3 %v1050_v30  ;;  %7115 = vst [vmem:[#allocation61_spill] sm:$0xff] %v5236_v2  ;;  %v7117_v30 = vld [vmem:[#allocation34_spill] sm:$0xff] }
 0x1cb   :  { %1547 = vmatpush.msrb.mxu0 %v7092_v31  ;;  %1567 = vmatpush.msrb.mxu1 %v7093_v48  ;;  %v5241_v31 = vld [vmem:[#allocation6 + $0x130] sm:$0xff]  ;;  %v5244_v48 = vld [vmem:[#allocation6 + $0x138] sm:$0xff] }
 0x1cc   :  { %1587 = vmatpush.msrb.mxu2 %v5193_v39  ;;  %1607 = vmatpush.msrb.mxu3 %v5196_v61  ;;  %7118 = vst [vmem:[#allocation62_spill] sm:$0xff] %v5241_v31 }
 0x1cd   :  { %1548 = vmatpush.msrb.mxu0 %v7096_v28  ;;  %1568 = vmatpush.msrb.mxu1 %v7097_v5  ;;  %7119 = vst [vmem:[#allocation63_spill] sm:$0xff] %v5244_v48  ;;  %v7120_v28 = vld [vmem:[#allocation27_spill] sm:$0xff]  ;;  %v7121_v5 = vld [vmem:[#allocation28_spill] sm:$0xff] }
 0x1ce   :  { %1588 = vmatpush.msrb.mxu2 %v5201_v14  ;;  %1608 = vmatpush.msrb.mxu3 %v5204_v21 }
 0x1cf   :  { %1549 = vmatpush.msrb.mxu0 %v7100_v23  ;;  %1569 = vmatpush.msrb.mxu1 %v7101_v22  ;;  %v5249_v23 = vld [vmem:[#allocation6 + $0x110] sm:$0xff]  ;;  %v5252_v22 = vld [vmem:[#allocation6 + $0x118] sm:$0xff] }
 0x1d0   :  { %1589 = vmatpush.msrb.mxu2 %v5209_v42  ;;  %1609 = vmatpush.msrb.mxu3 %v5212_v33  ;;  %7122 = vst [vmem:[#allocation64_spill] sm:$0xff] %v5249_v23 }
 0x1d1   :  { %1550 = vmatpush.msrb.mxu0 %v7104_v58  ;;  %1570 = vmatpush.msrb.mxu1 %v7105_v0  ;;  %7123 = vst [vmem:[#allocation65_spill] sm:$0xff] %v5252_v22  ;;  %v7124_v58 = vld [vmem:[#allocation31_spill] sm:$0xff]  ;;  %v7125_v0 = vld [vmem:[#allocation32_spill] sm:$0xff] }
 0x1d2   :  { %1590 = vmatpush.msrb.mxu2 %v5217_v59  ;;  %1610 = vmatpush.msrb.mxu3 %v5220_v50 }
 0x1d3   :  { %1551 = vmatpush.msrb.mxu0 %v7108_v11  ;;  %1571 = vmatpush.msrb.mxu1 %v7109_v24  ;;  %v5257_v11 = vld [vmem:[#allocation6 + $0xf0] sm:$0xff]  ;;  %v5260_v24 = vld [vmem:[#allocation6 + $0xf8] sm:$0xff] }
 0x1d4   :  { %1591 = vmatpush.msrb.mxu2 %v5225_v54  ;;  %1611 = vmatpush.msrb.mxu3 %v5228_v51  ;;  %7126 = vst [vmem:[#allocation66_spill] sm:$0xff] %v5257_v11 }
 0x1d5   :  { %1552 = vmatpush.msrb.mxu0 %v7112_v35  ;;  %1572 = vmatpush.msrb.mxu1 %v7113_v18  ;;  %7127 = vst [vmem:[#allocation67_spill] sm:$0xff] %v5260_v24  ;;  %v7128_v35 = vld [vmem:[#allocation41_spill] sm:$0xff]  ;;  %v7129_v18 = vld [vmem:[#allocation42_spill] sm:$0xff] }
 0x1d6   :  { %1592 = vmatpush.msrb.mxu2 %v5233_v1  ;;  %1612 = vmatpush.msrb.mxu3 %v5236_v2  ;;  %v7158_v2 = vld [vmem:[#allocation18_spill] sm:$0xff] }
 0x1d7   :  { %1553 = vmatpush.msrb.mxu0 %v7116_v32  ;;  %1573 = vmatpush.msrb.mxu1 %v7117_v30  ;;  %v5265_v32 = vld [vmem:[#allocation6 + $0xd0] sm:$0xff]  ;;  %v5268_v30 = vld [vmem:[#allocation6 + $0xd8] sm:$0xff] }
 0x1d8   :  { %1593 = vmatpush.msrb.mxu2 %v5241_v31  ;;  %1613 = vmatpush.msrb.mxu3 %v5244_v48  ;;  %7130 = vst [vmem:[#allocation68_spill] sm:$0xff] %v5265_v32 }
 0x1d9   :  { %1554 = vmatpush.msrb.mxu0 %v7120_v28  ;;  %1574 = vmatpush.msrb.mxu1 %v7121_v5  ;;  %7131 = vst [vmem:[#allocation69_spill] sm:$0xff] %v5268_v30  ;;  %v7132_v28 = vld [vmem:[#allocation35_spill] sm:$0xff]  ;;  %v7133_v5 = vld [vmem:[#allocation36_spill] sm:$0xff] }
 0x1da   :  { %1594 = vmatpush.msrb.mxu2 %v5249_v23  ;;  %1614 = vmatpush.msrb.mxu3 %v5252_v22  ;;  %v7157_v22 = vld [vmem:[#allocation13_spill] sm:$0xff] }
 0x1db   :  { %1555 = vmatpush.msrb.mxu0 %v7124_v58  ;;  %1575 = vmatpush.msrb.mxu1 %v7125_v0  ;;  %v5273_v58 = vld [vmem:[#allocation6 + $0xb0] sm:$0xff]  ;;  %v5276_v0 = vld [vmem:[#allocation6 + $0xb8] sm:$0xff] }
 0x1dc   :  { %1595 = vmatpush.msrb.mxu2 %v5257_v11  ;;  %1615 = vmatpush.msrb.mxu3 %v5260_v24  ;;  %7134 = vst [vmem:[#allocation70_spill] sm:$0xff] %v5273_v58  ;;  %v7156_v24 = vld [vmem:[#allocation12_spill] sm:$0xff] }
 0x1dd   :  { %1556 = vmatpush.msrb.mxu0 %v7128_v35  ;;  %1576 = vmatpush.msrb.mxu1 %v7129_v18  ;;  %7135 = vst [vmem:[#allocation71_spill] sm:$0xff] %v5276_v0  ;;  %v7136_v35 = vld [vmem:[#allocation39_spill] sm:$0xff]  ;;  %v7137_v18 = vld [vmem:[#allocation40_spill] sm:$0xff] }
 0x1de   :  { %1596 = vmatpush.msrb.mxu2 %v5265_v32  ;;  %1616 = vmatpush.msrb.mxu3 %v5268_v30  ;;  %v5281_v32 = vld [vmem:[#allocation6 + $0x90] sm:$0xff]  ;;  %v5284_v30 = vld [vmem:[#allocation6 + $0x98] sm:$0xff] }
 0x1df   :  { %1557 = vmatpush.msrb.mxu0 %v7132_v28  ;;  %1577 = vmatpush.msrb.mxu1 %v7133_v5  ;;  %7138 = vst [vmem:[#allocation72_spill] sm:$0xff] %v5281_v32  ;;  %v7140_v28 = vld [vmem:[#allocation49_spill] sm:$0xff]  ;;  %v7141_v5 = vld [vmem:[#allocation43_spill] sm:$0xff] }
 0x1e0   :  { %1597 = vmatpush.msrb.mxu2 %v5273_v58  ;;  %1617 = vmatpush.msrb.mxu3 %v5276_v0  ;;  %7139 = vst [vmem:[#allocation73_spill] sm:$0xff] %v5284_v30  ;;  %v5289_v58 = vld [vmem:[#allocation6 + $0x70] sm:$0xff]  ;;  %v5292_v0 = vld [vmem:[#allocation6 + $0x78] sm:$0xff] }
 0x1e1   :  { %1558 = vmatpush.msrb.mxu0 %v7136_v35  ;;  %1578 = vmatpush.msrb.mxu1 %v7137_v18  ;;  %7142 = vst [vmem:[#allocation74_spill] sm:$0xff] %v5289_v58  ;;  %v7144_v35 = vld [vmem:[#allocation44_spill] sm:$0xff] }
 0x1e2   :  { %1598 = vmatpush.msrb.mxu2 %v5281_v32  ;;  %1618 = vmatpush.msrb.mxu3 %v5284_v30  ;;  %7143 = vst [vmem:[#allocation75_spill] sm:$0xff] %v5292_v0  ;;  %v7145_v18 = vld [vmem:[#allocation56_spill] sm:$0xff]  ;;  %v5297_v32 = vld [vmem:[#allocation6 + $0x50] sm:$0xff]  ;;  %v5300_v30 = vld [vmem:[#allocation6 + $0x58] sm:$0xff] }
 0x1e3   :  { %1559 = vmatpush.msrb.mxu0 %v7140_v28  ;;  %1579 = vmatpush.msrb.mxu1 %v7141_v5  ;;  %7146 = vst [vmem:[#allocation76_spill] sm:$0xff] %v5297_v32  ;;  %v7148_v28 = vld [vmem:[#allocation57_spill] sm:$0xff]  ;;  %v7149_v5 = vld [vmem:[#allocation47_spill] sm:$0xff] }
 0x1e4   :  { %1599 = vmatpush.msrb.mxu2 %v5289_v58  ;;  %1619 = vmatpush.msrb.mxu3 %v5292_v0  ;;  %7147 = vst [vmem:[#allocation77_spill] sm:$0xff] %v5300_v30  ;;  %v5305_v58 = vld [vmem:[#allocation6 + $0x30] sm:$0xff]  ;;  %v5308_v0 = vld [vmem:[#allocation6 + $0x38] sm:$0xff] }
 0x1e5   :  { %1560 = vmatpush.msrb.mxu0 %v7144_v35  ;;  %1580 = vmatpush.msrb.mxu1 %v7145_v18  ;;  %7150 = vst [vmem:[#allocation78_spill] sm:$0xff] %v5305_v58  ;;  %v5311_v35 = vld [vmem:[#allocation6] sm:$0xff]  ;;  %v5314_v18 = vld [vmem:[#allocation6 + $0x8] sm:$0xff] }
 0x1e6   :  { %1600 = vmatpush.msrb.mxu2 %v5297_v32  ;;  %1620 = vmatpush.msrb.mxu3 %v5300_v30  ;;  %7151 = vst [vmem:[#allocation79_spill] sm:$0xff] %v5308_v0  ;;  %v5317_v30 = vld [vmem:[#allocation6 + $0x10] sm:$0xff] }
 0x1e7   :  { %1561 = vmatpush.msrb.mxu0 %v7148_v28  ;;  %1581 = vmatpush.msrb.mxu1 %v7149_v5  ;;  %7152 = vst [vmem:[#allocation80_spill] sm:$0xff] %v5311_v35  ;;  %v5320_v28 = vld [vmem:[#allocation6 + $0x18] sm:$0xff] }
 0x1e8   :  { %1601 = vmatpush.msrb.mxu2 %v5305_v58  ;;  %1621 = vmatpush.msrb.mxu3 %v5308_v0  ;;  %7153 = vst [vmem:[#allocation81_spill] sm:$0xff] %v5314_v18 }
 0x1e9   :  { %1562 = vmatpush.msrb.mxu0 %v5311_v35  ;;  %1582 = vmatpush.msrb.mxu1 %v5314_v18  ;;  %7154 = vst [vmem:[#allocation54_spill] sm:$0xff] %v5317_v30 }
 0x1ea   :  { %1602 = vmatpush.msrb.mxu2 %v5317_v30  ;;  %7155 = vst [vmem:[#allocation55_spill] sm:$0xff] %v5320_v28  ;;  %1622 = vmatpush.msrb.mxu3 %v5320_v28 }
 0x21f   :  { %v1070_v5 = vpop.f32.mrf.mxu0  ;;  %v1090_v58 = vpop.f32.mrf.mxu1 }
 0x220   :  { %v1137_v32 = vrot.slane %v1070_v5, 6  ;;  %v1138_v0 = vrot.slane %v1090_v58, 6 }
 0x222   :  { %v1145_v11 = vadd.f32 %v1137_v32, %v7156_v24  ;;  %v1146_v35 = vadd.f32 %v1138_v0, %v7157_v22 }
 0x224   :  { %v3160_v23 = vmul.f32 -1.442695, %v1145_v11  ;;  %v3161_v48 = vmul.f32 -1.442695, %v1146_v35  ;;  %v7159_v35 = vld [vmem:[#allocation14_spill] sm:$0xff] }
 0x226   :  { %3267 = vpow2.f32 %v3160_v23  ;;  %v1130_v18 = vpop.f32.mrf.mxu3  ;;  %v1110_v5 = vpop.f32.mrf.mxu2 }
 0x227   :  { %3269 = vpow2.f32 %v3161_v48  ;;  %v1140_v31 = vrot.slane %v1130_v18, 6  ;;  %v1139_v32 = vrot.slane %v1110_v5, 6 }
 0x229   :  { %v1148_v30 = vadd.f32 %v1140_v31, %v7158_v2  ;;  %v1147_v23 = vadd.f32 %v1139_v32, %v7159_v35 }
 0x22b   :  { %v3162_v1 = vmul.f32 -1.442695, %v1148_v30 }
 0x22c   :  { %v3268_v51 = vpop.eup %3267 }
 0x22d   :  { %v3270_v54 = vpop.eup %3269  ;;  %v1152_v28 = vadd.f32 1.0, %v3268_v51  ;;  %3271 = vpow2.f32 %v3162_v1 }
 0x22e   :  { %v1171_v50 = vadd.f32 1.0, %v3270_v54 }
 0x22f   :  { %3273 = vrcp.f32 %v1152_v28  ;;  %v1164_v2 = vand.u32 2147483648, %v1152_v28  ;;  %v1162_v54 = vand.u32 2147483647, %v1152_v28  ;;  %vm1158_vm3 = vweird.f32 %v1152_v28 }
 0x230   :  { %3275 = vrcp.f32 %v1171_v50  ;;  %v1183_v51 = vand.u32 2147483648, %v1171_v50  ;;  %v1181_v5 = vand.u32 2147483647, %v1171_v50  ;;  %vm1177_vm4 = vweird.f32 %v1171_v50 }
 0x231   :  { %v1165_v32 = vor.u32 1.1754944e-38, %v1164_v2  ;;  %vm1163_vm7 = vcmp.eq.f32.partialorder %v1162_v54, 8.507059e+37 }
 0x232   :  { %vm1182_vm8 = vcmp.eq.f32.partialorder %v1181_v5, 8.507059e+37 }
 0x233   :  { %v3272_v58 = vpop.eup %3271 }
 0x234   :  { %v1191_v0 = vadd.f32 1.0, %v3272_v58 }
 0x235   :  { %v3274_v11 = vpop.eup %3273 }
 0x236   :  { %v3276_v22 = vpop.eup %3275  ;;  %v1154_v48 = vmul.f32 %v3274_v11, %v1152_v28  ;;  %3277 = vrcp.f32 %v1191_v0  ;;  %vm1159_vm1 = vweird.f32 %v3274_v11  ;;  %vm1197_vm10 = vweird.f32 %v1191_v0 }
 0x237   :  { %v1173_v18 = vmul.f32 %v3276_v22, %v1171_v50  ;;  %3279 = vtanh.f32 %v1147_v23  ;;  %vm1178_vm2 = vweird.f32 %v3276_v22  ;;  %vm1160_vm5 = vmor %vm1158_vm3, %vm1159_vm1 }
 0x238   :  { %v1155_v31 = vsub.f32 1.0, %v1154_v48  ;;  %v1208_v48 = vrot.slane %v4986_v53, 7  ;;  %vm1179_vm6 = vmor %vm1177_vm4, %vm1178_vm2 }
 0x239   :  { %v1174_v30 = vsub.f32 1.0, %v1173_v18  ;;  %v1184_v18 = vor.u32 1.1754944e-38, %v1183_v51 }
 0x23a   :  { %v1156_v1 = vmul.f32 %v3274_v11, %v1155_v31 }
 0x23b   :  { %v1175_v24 = vmul.f32 %v3276_v22, %v1174_v30 }
 0x23c   :  { %v3278_v59 = vpop.eup %3277  ;;  %v1157_v58 = vadd.f32 %v3274_v11, %v1156_v1 }
 0x23d   :  { %v1176_v35 = vadd.f32 %v3276_v22, %v1175_v24  ;;  %v1193_v33 = vmul.f32 %v3278_v59, %v1191_v0  ;;  %v3280_v31 = vpop.eup %3279  ;;  %vm1198_vm9 = vweird.f32 %v3278_v59 }
 0x23e   :  { %v1161_v23 = vsel %vm1160_vm5, %v3274_v11, %v1157_v58  ;;  %v1203_v11 = vand.u32 2147483648, %v1191_v0  ;;  %vm1199_vm11 = vmor %vm1197_vm10, %vm1198_vm9 }
 0x23f   :  { %v1166_v42 = vsel %vm1163_vm7, %v1165_v32, %v1161_v23  ;;  %v1180_v21 = vsel %vm1179_vm6, %v3276_v22, %v1176_v35  ;;  %v1194_v30 = vsub.f32 1.0, %v1193_v33 }
 0x240   :  { %v1185_v14 = vsel %vm1182_vm8, %v1184_v18, %v1180_v21  ;;  %v1211_v61 = vmul.f32 %v3280_v31, %v1166_v42  ;;  %v1201_v21 = vand.u32 2147483647, %v1191_v0  ;;  %v1204_v35 = vor.u32 1.1754944e-38, %v1203_v11  ;;  %v5356_v11 = vld [vmem:[#allocation3 + $0x1a0] sm:$0xff] }
 0x241   :  { %v1210_v1 = vmul.f32 %v1208_v48, %v1185_v14  ;;  %v1195_v28 = vmul.f32 %v3278_v59, %v1194_v30  ;;  %v5339_v30 = vld [vmem:[#allocation3 + $0x1e0] sm:$0xff] }
 0x242   :  { %vm1202_vm12 = vcmp.eq.f32.partialorder %v1201_v21, 8.507059e+37 }
 0x243   :  { %v5328_v2 = vadd.f32 %v1211_v61, %v1210_v1  ;;  %v1196_v53 = vadd.f32 %v3278_v59, %v1195_v28  ;;  %v5342_v1 = vld [vmem:[#allocation3 + $0x1e8] sm:$0xff] }
 0x245   :  { %3281 = vtanh.f32 %v5328_v2  ;;  %v1200_v33 = vsel %vm1199_vm11, %v3278_v59, %v1196_v53 }
 0x246   :  { %v1232_v50 = vpop.f32.mrf.mxu0  ;;  %v1252_v39 = vpop.f32.mrf.mxu1  ;;  %v1205_v5 = vsel %vm1202_vm12, %v1204_v35, %v1200_v33  ;;  %v5396_v35 = vld [vmem:[#allocation3 + $0x148] sm:$0xff] }
 0x247   :  { %v1299_v24 = vrot.slane %v1232_v50, 3  ;;  %v1300_v37 = vrot.slane %v1252_v39, 3  ;;  %v5348_v50 = vld [vmem:[#allocation3 + $0x1c0] sm:$0xff] }
 0x249   :  { %v1307_v51 = vadd.f32 %v1299_v24, %v4648_v6  ;;  %v1308_v22 = vadd.f32 %v1300_v37, %v7084_v36  ;;  %v5351_v24 = vld [vmem:[#allocation3 + $0x1c8] sm:$0xff] }
 0x24b   :  { %v3163_v42 = vmul.f32 -1.442695, %v1307_v51  ;;  %v3164_v14 = vmul.f32 -1.442695, %v1308_v22  ;;  %v3282_v54 = vpop.eup %3281  ;;  %v5372_v22 = vld [vmem:[#allocation3 + $0x188] sm:$0xff] }
 0x24c   :  { %v1214_v32 = vmul.f32 %v3282_v54, %v1205_v5 }
 0x24d   :  { %3283 = vpow2.f32 %v3163_v42  ;;  %v1292_v61 = vpop.f32.mrf.mxu3  ;;  %v1272_v31 = vpop.f32.mrf.mxu2 }
 0x24e   :  { %3285 = vpow2.f32 %v3164_v14  ;;  %v1302_v39 = vrot.slane %v1292_v61, 3  ;;  %v1378_v18 = vrot.slane %v1214_v32, 2  ;;  %v1301_v28 = vrot.slane %v1272_v31, 3  ;;  %v5387_v14 = vld [vmem:[#allocation3 + $0x168] sm:$0xff]  ;;  %v5430_v31 = vld [vmem:[#allocation3 + $0x100] sm:$0xff] }
 0x24f   :  { %v5411_v32 = vld [vmem:[#allocation3 + $0x128] sm:$0xff] }
 0x250   :  { %v1310_v58 = vadd.f32 %v1302_v39, %v4682_v10  ;;  %1380 = vst [vmem:[#allocation2 + $0x2] sm:$0x1] %v1378_v18  ;;  %1401 = vmatmul.f32.vlgmr.msra.gmra.mxu0 %v1378_v18  ;;  %1421 = vmatmul.f32.vlgmr.msra.gmra.mxu1 %v1378_v18 }
 0x251   :  { %1441 = vmatmul.f32.vlgmr.msra.gmra.mxu2 %v1378_v18  ;;  %1461 = vmatmul.f32.vlgmr.msra.gmra.mxu3 %v1378_v18 }
 0x252   :  { %v3165_v48 = vmul.f32 -1.442695, %v1310_v58  ;;  %1717 = vmatpush.msra.mxu0 %v5339_v30  ;;  %1737 = vmatpush.msra.mxu1 %v5342_v1  ;;  %v5408_v58 = vld [vmem:[#allocation3 + $0x120] sm:$0xff] }
 0x253   :  { %v3284_v37 = vpop.eup %3283  ;;  %1757 = vmatpush.msra.mxu2 %v5000_v15  ;;  %1777 = vmatpush.msra.mxu3 %v5003_v17  ;;  %v5359_v15 = vld [vmem:[#allocation3 + $0x1a8] sm:$0xff] }
 0x254   :  { %v3286_v23 = vpop.eup %3285  ;;  %v5334_v0 = vadd.f32 1.0, %v3284_v37  ;;  %3287 = vpow2.f32 %v3165_v48  ;;  %1718 = vmatpush.msra.mxu0 %v5348_v50  ;;  %1738 = vmatpush.msra.mxu1 %v5351_v24 }
 0x255   :  { %v5336_v59 = vadd.f32 1.0, %v3286_v23  ;;  %1758 = vmatpush.msra.mxu2 %v5008_v25  ;;  %1778 = vmatpush.msra.mxu3 %v5011_v52  ;;  %v1309_v25 = vadd.f32 %v1301_v28, %v4686_v26  ;;  %v5369_v52 = vld [vmem:[#allocation3 + $0x180] sm:$0xff] }
 0x256   :  { %3289 = vrcp.f32 %v5334_v0  ;;  %1719 = vmatpush.msra.mxu0 %v5356_v11  ;;  %1739 = vmatpush.msra.mxu1 %v5359_v15  ;;  %vm1320_vm15 = vweird.f32 %v5334_v0 }
 0x257   :  { %3291 = vrcp.f32 %v5336_v59  ;;  %1759 = vmatpush.msra.mxu2 %v5018_v41  ;;  %1779 = vmatpush.msra.mxu3 %v5021_v7  ;;  %v5384_v7 = vld [vmem:[#allocation3 + $0x160] sm:$0xff]  ;;  %v1345_v39 = vand.u32 2147483648, %v5336_v59  ;;  %v1343_v5 = vand.u32 2147483647, %v5336_v59  ;;  %vm1339_vm0 = vweird.f32 %v5336_v59 }
 0x258   :  { %1720 = vmatpush.msra.mxu0 %v5369_v52  ;;  %1740 = vmatpush.msra.mxu1 %v5372_v22 }
 0x259   :  { %1760 = vmatpush.msra.mxu2 %v5034_v60  ;;  %1780 = vmatpush.msra.mxu3 %v5037_v13  ;;  %v1326_v60 = vand.u32 2147483648, %v5334_v0  ;;  %v5393_v13 = vld [vmem:[#allocation3 + $0x140] sm:$0xff]  ;;  %vm1344_vm4 = vcmp.eq.f32.partialorder %v1343_v5, 8.507059e+37  ;;  %v5499_v5 = vld [vmem:[#allocation3 + $0x68] sm:$0xff] }
 0x25a   :  { %v3288_v53 = vpop.eup %3287  ;;  %1721 = vmatpush.msra.mxu0 %v5384_v7  ;;  %1741 = vmatpush.msra.mxu1 %v5387_v14 }
 0x25b   :  { %v5362_v17 = vadd.f32 1.0, %v3288_v53  ;;  %1761 = vmatpush.msra.mxu2 %v5044_v16  ;;  %1781 = vmatpush.msra.mxu3 %v5047_v34  ;;  %v1324_v16 = vand.u32 2147483647, %v5334_v0  ;;  %v1327_v18 = vor.u32 1.1754944e-38, %v1326_v60  ;;  %v5463_v60 = vld [vmem:[#allocation3 + $0xc8] sm:$0xff] }
 0x25c   :  { %v5366_v51 = vpop.eup %3289  ;;  %1722 = vmatpush.msra.mxu0 %v5393_v13  ;;  %1742 = vmatpush.msra.mxu1 %v5396_v35 }
 0x25d   :  { %v5375_v21 = vpop.eup %3291  ;;  %v1316_v42 = vmul.f32 %v5366_v51, %v5334_v0  ;;  %3293 = vrcp.f32 %v5362_v17  ;;  %vm1321_vm13 = vweird.f32 %v5366_v51  ;;  %1762 = vmatpush.msra.mxu2 %v5057_v49  ;;  %1782 = vmatpush.msra.mxu3 %v5060_v55  ;;  %vm1325_vm3 = vcmp.eq.f32.partialorder %v1324_v16, 8.507059e+37  ;;  %v5485_v16 = vld [vmem:[#allocation3 + $0x88] sm:$0xff]  ;;  %v7171_v0 = vld [vmem:[#allocation51_spill] sm:$0xff] }
 0x25e   :  { %v1335_v41 = vmul.f32 %v5375_v21, %v5336_v59  ;;  %3295 = vtanh.f32 %v1309_v25  ;;  %vm1340_vm14 = vweird.f32 %v5375_v21  ;;  %1723 = vmatpush.msra.mxu0 %v5408_v58  ;;  %1743 = vmatpush.msra.mxu1 %v5411_v32  ;;  %vm5423_vm1 = vmor %vm1320_vm15, %vm1321_vm13  ;;  %v1346_v59 = vor.u32 1.1754944e-38, %v1345_v39 }
 0x25f   :  { %v1317_v33 = vsub.f32 1.0, %v1316_v42  ;;  %1763 = vmatpush.msra.mxu2 %v5072_v45  ;;  %1783 = vmatpush.msra.mxu3 %v5075_v44  ;;  %v5433_v45 = vld [vmem:[#allocation3 + $0x108] sm:$0xff]  ;;  %v1370_v44 = vrot.slane %v5126_v63, 1  ;;  %vm5439_vm2 = vmor %vm1339_vm0, %vm1340_vm14  ;;  %vm1359_vm6 = vweird.f32 %v5362_v17 }
 0x260   :  { %v1336_v61 = vsub.f32 1.0, %v1335_v41  ;;  %1724 = vmatpush.msra.mxu0 %v5430_v31  ;;  %1744 = vmatpush.msra.mxu1 %v5433_v45  ;;  %v5451_v41 = vld [vmem:[#allocation3 + $0xe0] sm:$0xff] }
 0x261   :  { %v1318_v54 = vmul.f32 %v5366_v51, %v1317_v33  ;;  %1764 = vmatpush.msra.mxu2 %v5100_v19  ;;  %1784 = vmatpush.msra.mxu3 %v5103_v40  ;;  %v5454_v33 = vld [vmem:[#allocation3 + $0xe8] sm:$0xff] }
 0x262   :  { %v1337_v34 = vmul.f32 %v5375_v21, %v1336_v61  ;;  %1725 = vmatpush.msra.mxu0 %v5451_v41  ;;  %1745 = vmatpush.msra.mxu1 %v5454_v33 }
 0x263   :  { %v5414_v48 = vpop.eup %3293  ;;  %v1319_v49 = vadd.f32 %v5366_v51, %v1318_v54  ;;  %1765 = vmatpush.msra.mxu2 %v5111_v8  ;;  %1785 = vmatpush.msra.mxu3 %v5114_v56  ;;  %v5470_v8 = vld [vmem:[#allocation3 + $0xa0] sm:$0xff]  ;;  %v5473_v56 = vld [vmem:[#allocation3 + $0xa8] sm:$0xff] }
 0x264   :  { %v1338_v37 = vadd.f32 %v5375_v21, %v1337_v34  ;;  %v1355_v23 = vmul.f32 %v5414_v48, %v5362_v17  ;;  %v3296_v53 = vpop.eup %3295  ;;  %1746 = vmatpush.msra.mxu1 %v5463_v60  ;;  %vm1360_vm5 = vweird.f32 %v5414_v48  ;;  %v1363_v34 = vand.u32 2147483647, %v5362_v17 }
 0x265   :  { %v1323_v28 = vsel %vm5423_vm1, %v5366_v51, %v1319_v49  ;;  %1766 = vmatpush.msra.mxu2 %v5120_v4  ;;  %1786 = vmatpush.msra.mxu3 %v5123_v47  ;;  %v1365_v4 = vand.u32 2147483648, %v5362_v17  ;;  %v5482_v47 = vld [vmem:[#allocation3 + $0x80] sm:$0xff]  ;;  %vm5492_vm7 = vmor %vm1359_vm6, %vm1360_vm5  ;;  %v5510_v49 = vld [vmem:[#allocation3 + $0x48] sm:$0xff] }
 0x266   :  { %v1328_v25 = vsel %vm1325_vm3, %v1327_v18, %v1323_v28  ;;  %v1342_v63 = vsel %vm5439_vm2, %v5375_v21, %v1338_v37  ;;  %v1356_v42 = vsub.f32 1.0, %v1355_v23  ;;  %v5460_v21 = vld [vmem:[#allocation3 + $0xc0] sm:$0xff]  ;;  %1747 = vmatpush.msra.mxu1 %v5473_v56  ;;  %vm1364_vm8 = vcmp.eq.f32.partialorder %v1363_v34, 8.507059e+37  ;;  %v7167_v23 = vld [vmem:[#allocation48_spill] sm:$0xff] }
 0x267   :  { %v1347_v51 = vsel %vm1344_vm4, %v1346_v59, %v1342_v63  ;;  %v1373_v19 = vmul.f32 %v3296_v53, %v1328_v25  ;;  %1726 = vmatpush.msra.mxu0 %v5460_v21  ;;  %1767 = vmatpush.msra.mxu2 %v5132_v43  ;;  %v5515_v18 = vld [vmem:[#allocation3 + $0x20] sm:$0xff]  ;;  %v5542_v59 = vld [vmem:[#allocation6 + $0x1c8] sm:$0xff]  ;;  %v7175_v53 = vld [vmem:[#allocation37_spill] sm:$0xff] }
 0x268   :  { %v1372_v40 = vmul.f32 %v1370_v44, %v1347_v51  ;;  %v1357_v61 = vmul.f32 %v5414_v48, %v1356_v42  ;;  %1787 = vmatpush.msra.mxu3 %v5135_v46  ;;  %1748 = vmatpush.msra.mxu1 %v5485_v16  ;;  %v5496_v46 = vld [vmem:[#allocation3 + $0x60] sm:$0xff]  ;;  %v7170_v44 = vld [vmem:[#allocation58_spill] sm:$0xff]  ;;  %7173 = vst [vmem:[#allocation22_spill] sm:$0xff] %v5542_v59  ;;  %v7174_v28 = vld [vmem:[#allocation52_spill] sm:$0xff] }
 0x269   :  { %1727 = vmatpush.msra.mxu0 %v5470_v8  ;;  %1768 = vmatpush.msra.mxu2 %v5144_v57  ;;  %v1366_v57 = vor.u32 1.1754944e-38, %v1365_v4  ;;  %v5523_v37 = vld [vmem:[#allocation3] sm:$0xff]  ;;  %v5550_v63 = vld [vmem:[#allocation6 + $0x1a8] sm:$0xff]  ;;  %v7178_v42 = vld [vmem:[#allocation38_spill] sm:$0xff] }
 0x26a   :  { %v5468_v39 = vadd.f32 %v1373_v19, %v1372_v40  ;;  %v1358_v54 = vadd.f32 %v5414_v48, %v1357_v61  ;;  %1788 = vmatpush.msra.mxu3 %v5147_v20  ;;  %1749 = vmatpush.msra.mxu1 %v5499_v5  ;;  %v5507_v20 = vld [vmem:[#allocation3 + $0x40] sm:$0xff]  ;;  %7177 = vst [vmem:[#allocation16_spill] sm:$0xff] %v5550_v63  ;;  %v7179_v51 = vld [vmem:[#allocation45_spill] sm:$0xff]  ;;  %v5558_v40 = vld [vmem:[#allocation6 + $0x188] sm:$0xff] }
 0x26b   :  { %1728 = vmatpush.msra.mxu0 %v5482_v47  ;;  %1769 = vmatpush.msra.mxu2 %v5161_v62  ;;  %v5518_v62 = vld [vmem:[#allocation3 + $0x28] sm:$0xff]  ;;  %v5547_v25 = vld [vmem:[#allocation6 + $0x1a0] sm:$0xff]  ;;  %7181 = vst [vmem:[#allocation26_spill] sm:$0xff] %v5558_v40  ;;  %v7182_v61 = vld [vmem:[#allocation46_spill] sm:$0xff] }
 0x26c   :  { %3297 = vtanh.f32 %v5468_v39  ;;  %v1362_v17 = vsel %vm5492_vm7, %v5414_v48, %v1358_v54  ;;  %1789 = vmatpush.msra.mxu3 %v5164_v27  ;;  %1750 = vmatpush.msra.mxu1 %v5510_v49  ;;  %7176 = vst [vmem:[#allocation23_spill] sm:$0xff] %v5547_v25  ;;  %v5555_v19 = vld [vmem:[#allocation6 + $0x180] sm:$0xff]  ;;  %v7183_v54 = vld [vmem:[#allocation50_spill] sm:$0xff]  ;;  %v5566_v34 = vld [vmem:[#allocation6 + $0x168] sm:$0xff] }
 0x26d   :  { %1729 = vmatpush.msra.mxu0 %v5496_v46  ;;  %1770 = vmatpush.msra.mxu2 %v5169_v9  ;;  %v1367_v48 = vsel %vm1364_vm8, %v1366_v57, %v1362_v17  ;;  %v5526_v9 = vld [vmem:[#allocation3 + $0x8] sm:$0xff]  ;;  %7180 = vst [vmem:[#allocation17_spill] sm:$0xff] %v5555_v19  ;;  %v5563_v4 = vld [vmem:[#allocation6 + $0x160] sm:$0xff]  ;;  %v7186_v43 = vld [vmem:[#allocation53_spill] sm:$0xff] }
 0x26e   :  { %1790 = vmatpush.msra.mxu3 %v5172_v12  ;;  %1751 = vmatpush.msra.mxu1 %v5518_v62  ;;  %7166 = vst [vmem:[#allocation82_spill] sm:$0xff] %v5526_v9  ;;  %v7187_v17 = vld [vmem:[#allocation59_spill] sm:$0xff] }
 0x26f   :  { %1730 = vmatpush.msra.mxu0 %v5507_v20  ;;  %1771 = vmatpush.msra.mxu2 %v5177_v3  ;;  %v5531_v3 = vld [vmem:[#allocation6 + $0x1e0] sm:$0xff]  ;;  %7184 = vst [vmem:[#allocation20_spill] sm:$0xff] %v5563_v4 }
 0x270   :  { %1791 = vmatpush.msra.mxu3 %v5180_v29  ;;  %1752 = vmatpush.msra.mxu1 %v5526_v9  ;;  %7168 = vst [vmem:[#allocation83_spill] sm:$0xff] %v5531_v3  ;;  %v5534_v29 = vld [vmem:[#allocation6 + $0x1e8] sm:$0xff]  ;;  %v5571_v57 = vld [vmem:[#allocation6 + $0x140] sm:$0xff] }
 0x271   :  { %1731 = vmatpush.msra.mxu0 %v5515_v18  ;;  %1772 = vmatpush.msra.mxu2 %v5185_v38  ;;  %7169 = vst [vmem:[#allocation19_spill] sm:$0xff] %v5534_v29  ;;  %v5539_v38 = vld [vmem:[#allocation6 + $0x1c0] sm:$0xff] }
 0x272   :  { %v3298_v55 = vpop.eup %3297  ;;  %1792 = vmatpush.msra.mxu3 %v7167_v23  ;;  %7172 = vst [vmem:[#allocation15_spill] sm:$0xff] %v5539_v38  ;;  %v5582_v23 = vld [vmem:[#allocation6 + $0x128] sm:$0xff] }
 0x273   :  { %v1376_v27 = vmul.f32 %v3298_v55, %v1367_v48  ;;  %1732 = vmatpush.msra.mxu0 %v5523_v37  ;;  %7185 = vst [vmem:[#allocation21_spill] sm:$0xff] %v5566_v34  ;;  %v5574_v55 = vld [vmem:[#allocation6 + $0x148] sm:$0xff] }
 0x274   :  { %7188 = vst [vmem:[#allocation29_spill] sm:$0xff] %v5571_v57  ;;  %v7190_v48 = vld [vmem:[#allocation60_spill] sm:$0xff] }
 0x275   :  { %v1382_v12 = vrot.slane %v1376_v27, 5  ;;  %7189 = vst [vmem:[#allocation30_spill] sm:$0xff] %v5574_v55  ;;  %v7191_v27 = vld [vmem:[#allocation61_spill] sm:$0xff] }
 0x276   :  { %7193 = vst [vmem:[#allocation25_spill] sm:$0xff] %v5582_v23 }
 0x277   :  { %1384 = vst [vmem:[#allocation2 + $0xd] sm:$0x1] %v1382_v12  ;;  %1563 = vmatmul.f32.vlgmr.msrb.gmra.mxu0 %v1382_v12  ;;  %1583 = vmatmul.f32.vlgmr.msrb.gmra.mxu1 %v1382_v12 }
 0x278   :  { %1603 = vmatmul.f32.vlgmr.msrb.gmra.mxu2 %v1382_v12  ;;  %1623 = vmatmul.f32.vlgmr.msrb.gmra.mxu3 %v1382_v12  ;;  %v5579_v12 = vld [vmem:[#allocation6 + $0x120] sm:$0xff] }
 0x279   :  { %1879 = vmatpush.msrb.mxu0 %v5531_v3  ;;  %1899 = vmatpush.msrb.mxu1 %v5534_v29  ;;  %7192 = vst [vmem:[#allocation24_spill] sm:$0xff] %v5579_v12 }
 0x27a   :  { %1919 = vmatpush.msrb.mxu2 %v7170_v44  ;;  %1939 = vmatpush.msrb.mxu3 %v7171_v0  ;;  %v7194_v44 = vld [vmem:[#allocation62_spill] sm:$0xff]  ;;  %v7195_v0 = vld [vmem:[#allocation63_spill] sm:$0xff] }
 0x27b   :  { %1880 = vmatpush.msrb.mxu0 %v5539_v38  ;;  %1900 = vmatpush.msrb.mxu1 %v5542_v59 }
 0x27c   :  { %1920 = vmatpush.msrb.mxu2 %v7174_v28  ;;  %1940 = vmatpush.msrb.mxu3 %v7175_v53  ;;  %v5587_v28 = vld [vmem:[#allocation6 + $0x100] sm:$0xff]  ;;  %v5590_v53 = vld [vmem:[#allocation6 + $0x108] sm:$0xff] }
 0x27d   :  { %1881 = vmatpush.msrb.mxu0 %v5547_v25  ;;  %1901 = vmatpush.msrb.mxu1 %v5550_v63  ;;  %7196 = vst [vmem:[#allocation33_spill] sm:$0xff] %v5587_v28 }
 0x27e   :  { %1921 = vmatpush.msrb.mxu2 %v7178_v42  ;;  %1941 = vmatpush.msrb.mxu3 %v7179_v51  ;;  %7197 = vst [vmem:[#allocation34_spill] sm:$0xff] %v5590_v53  ;;  %v7198_v42 = vld [vmem:[#allocation64_spill] sm:$0xff]  ;;  %v7199_v51 = vld [vmem:[#allocation65_spill] sm:$0xff] }
 0x27f   :  { %1882 = vmatpush.msrb.mxu0 %v5555_v19  ;;  %1902 = vmatpush.msrb.mxu1 %v5558_v40 }
 0x280   :  { %1922 = vmatpush.msrb.mxu2 %v7182_v61  ;;  %1942 = vmatpush.msrb.mxu3 %v7183_v54  ;;  %v5595_v61 = vld [vmem:[#allocation6 + $0xe0] sm:$0xff]  ;;  %v5598_v54 = vld [vmem:[#allocation6 + $0xe8] sm:$0xff] }
 0x281   :  { %1883 = vmatpush.msrb.mxu0 %v5563_v4  ;;  %1903 = vmatpush.msrb.mxu1 %v5566_v34  ;;  %7200 = vst [vmem:[#allocation27_spill] sm:$0xff] %v5595_v61 }
 0x282   :  { %1923 = vmatpush.msrb.mxu2 %v7186_v43  ;;  %1943 = vmatpush.msrb.mxu3 %v7187_v17  ;;  %7201 = vst [vmem:[#allocation28_spill] sm:$0xff] %v5598_v54  ;;  %v7202_v43 = vld [vmem:[#allocation66_spill] sm:$0xff]  ;;  %v7203_v17 = vld [vmem:[#allocation67_spill] sm:$0xff] }
 0x283   :  { %1884 = vmatpush.msrb.mxu0 %v5571_v57  ;;  %1904 = vmatpush.msrb.mxu1 %v5574_v55  ;;  %v7234_v57 = vld [vmem:[#allocation18_spill] sm:$0xff] }
 0x284   :  { %1924 = vmatpush.msrb.mxu2 %v7190_v48  ;;  %1944 = vmatpush.msrb.mxu3 %v7191_v27  ;;  %v5603_v48 = vld [vmem:[#allocation6 + $0xc0] sm:$0xff]  ;;  %v5606_v27 = vld [vmem:[#allocation6 + $0xc8] sm:$0xff] }
 0x285   :  { %1885 = vmatpush.msrb.mxu0 %v5579_v12  ;;  %1905 = vmatpush.msrb.mxu1 %v5582_v23  ;;  %7204 = vst [vmem:[#allocation31_spill] sm:$0xff] %v5603_v48  ;;  %v7233_v12 = vld [vmem:[#allocation13_spill] sm:$0xff] }
 0x286   :  { %1925 = vmatpush.msrb.mxu2 %v7194_v44  ;;  %1945 = vmatpush.msrb.mxu3 %v7195_v0  ;;  %7205 = vst [vmem:[#allocation32_spill] sm:$0xff] %v5606_v27  ;;  %v7206_v44 = vld [vmem:[#allocation68_spill] sm:$0xff]  ;;  %v7207_v0 = vld [vmem:[#allocation69_spill] sm:$0xff] }
 0x287   :  { %1886 = vmatpush.msrb.mxu0 %v5587_v28  ;;  %1906 = vmatpush.msrb.mxu1 %v5590_v53  ;;  %v7232_v28 = vld [vmem:[#allocation12_spill] sm:$0xff] }
 0x288   :  { %1926 = vmatpush.msrb.mxu2 %v7198_v42  ;;  %1946 = vmatpush.msrb.mxu3 %v7199_v51  ;;  %v5611_v42 = vld [vmem:[#allocation6 + $0xa0] sm:$0xff]  ;;  %v5614_v51 = vld [vmem:[#allocation6 + $0xa8] sm:$0xff] }
 0x289   :  { %1887 = vmatpush.msrb.mxu0 %v5595_v61  ;;  %1907 = vmatpush.msrb.mxu1 %v5598_v54  ;;  %7208 = vst [vmem:[#allocation41_spill] sm:$0xff] %v5611_v42  ;;  %v7229_v54 = vld [vmem:[#allocation81_spill] sm:$0xff] }
 0x28a   :  { %1927 = vmatpush.msrb.mxu2 %v7202_v43  ;;  %1947 = vmatpush.msrb.mxu3 %v7203_v17  ;;  %7209 = vst [vmem:[#allocation42_spill] sm:$0xff] %v5614_v51  ;;  %v7210_v43 = vld [vmem:[#allocation70_spill] sm:$0xff]  ;;  %v7211_v17 = vld [vmem:[#allocation71_spill] sm:$0xff] }
 0x28b   :  { %1888 = vmatpush.msrb.mxu0 %v5603_v48  ;;  %1908 = vmatpush.msrb.mxu1 %v5606_v27  ;;  %v5619_v48 = vld [vmem:[#allocation6 + $0x80] sm:$0xff]  ;;  %v5622_v27 = vld [vmem:[#allocation6 + $0x88] sm:$0xff] }
 0x28c   :  { %1928 = vmatpush.msrb.mxu2 %v7206_v44  ;;  %1948 = vmatpush.msrb.mxu3 %v7207_v0  ;;  %7212 = vst [vmem:[#allocation35_spill] sm:$0xff] %v5619_v48  ;;  %v7214_v44 = vld [vmem:[#allocation72_spill] sm:$0xff]  ;;  %v7215_v0 = vld [vmem:[#allocation73_spill] sm:$0xff] }
 0x28d   :  { %1889 = vmatpush.msrb.mxu0 %v5611_v42  ;;  %1909 = vmatpush.msrb.mxu1 %v5614_v51  ;;  %7213 = vst [vmem:[#allocation36_spill] sm:$0xff] %v5622_v27  ;;  %v5627_v42 = vld [vmem:[#allocation6 + $0x60] sm:$0xff]  ;;  %v5630_v51 = vld [vmem:[#allocation6 + $0x68] sm:$0xff] }
 0x28e   :  { %1929 = vmatpush.msrb.mxu2 %v7210_v43  ;;  %1949 = vmatpush.msrb.mxu3 %v7211_v17  ;;  %7216 = vst [vmem:[#allocation39_spill] sm:$0xff] %v5627_v42  ;;  %v7218_v43 = vld [vmem:[#allocation74_spill] sm:$0xff]  ;;  %v7219_v17 = vld [vmem:[#allocation75_spill] sm:$0xff] }
 0x28f   :  { %1890 = vmatpush.msrb.mxu0 %v5619_v48  ;;  %1910 = vmatpush.msrb.mxu1 %v5622_v27  ;;  %7217 = vst [vmem:[#allocation40_spill] sm:$0xff] %v5630_v51  ;;  %v5635_v48 = vld [vmem:[#allocation6 + $0x40] sm:$0xff]  ;;  %v5638_v27 = vld [vmem:[#allocation6 + $0x48] sm:$0xff] }
 0x290   :  { %1930 = vmatpush.msrb.mxu2 %v7214_v44  ;;  %1950 = vmatpush.msrb.mxu3 %v7215_v0  ;;  %7220 = vst [vmem:[#allocation49_spill] sm:$0xff] %v5635_v48  ;;  %v7222_v44 = vld [vmem:[#allocation76_spill] sm:$0xff]  ;;  %v7223_v0 = vld [vmem:[#allocation77_spill] sm:$0xff] }
 0x291   :  { %1891 = vmatpush.msrb.mxu0 %v5627_v42  ;;  %1911 = vmatpush.msrb.mxu1 %v5630_v51  ;;  %7221 = vst [vmem:[#allocation43_spill] sm:$0xff] %v5638_v27  ;;  %v5643_v42 = vld [vmem:[#allocation6 + $0x20] sm:$0xff]  ;;  %v5646_v51 = vld [vmem:[#allocation6 + $0x28] sm:$0xff] }
 0x292   :  { %1931 = vmatpush.msrb.mxu2 %v7218_v43  ;;  %1951 = vmatpush.msrb.mxu3 %v7219_v17  ;;  %7224 = vst [vmem:[#allocation44_spill] sm:$0xff] %v5643_v42  ;;  %v7226_v43 = vld [vmem:[#allocation78_spill] sm:$0xff]  ;;  %v7227_v17 = vld [vmem:[#allocation79_spill] sm:$0xff] }
 0x293   :  { %1892 = vmatpush.msrb.mxu0 %v5635_v48  ;;  %1912 = vmatpush.msrb.mxu1 %v5638_v27  ;;  %7225 = vst [vmem:[#allocation56_spill] sm:$0xff] %v5646_v51  ;;  %v7228_v48 = vld [vmem:[#allocation80_spill] sm:$0xff]  ;;  %v7230_v27 = vld [vmem:[#allocation54_spill] sm:$0xff] }
 0x294   :  { %1932 = vmatpush.msrb.mxu2 %v7222_v44  ;;  %1952 = vmatpush.msrb.mxu3 %v7223_v0  ;;  %v7231_v44 = vld [vmem:[#allocation55_spill] sm:$0xff] }
 0x295   :  { %1893 = vmatpush.msrb.mxu0 %v5643_v42  ;;  %1913 = vmatpush.msrb.mxu1 %v5646_v51 }
 0x296   :  { %1933 = vmatpush.msrb.mxu2 %v7226_v43  ;;  %1953 = vmatpush.msrb.mxu3 %v7227_v17 }
 0x297   :  { %1894 = vmatpush.msrb.mxu0 %v7228_v48  ;;  %1914 = vmatpush.msrb.mxu1 %v7229_v54 }
 0x298   :  { %1934 = vmatpush.msrb.mxu2 %v7230_v27  ;;  %1954 = vmatpush.msrb.mxu3 %v7231_v44 }
 0x2cd   :  { %v1402_v0 = vpop.f32.mrf.mxu0  ;;  %v1422_v61 = vpop.f32.mrf.mxu1 }
 0x2ce   :  { %v1469_v53 = vrot.slane %v1402_v0, 5  ;;  %v1470_v42 = vrot.slane %v1422_v61, 5 }
 0x2d0   :  { %v1477_v23 = vadd.f32 %v1469_v53, %v7232_v28  ;;  %v1478_v51 = vadd.f32 %v1470_v42, %v7233_v12 }
 0x2d2   :  { %v3166_v55 = vmul.f32 -1.442695, %v1477_v23  ;;  %v3167_v43 = vmul.f32 -1.442695, %v1478_v51  ;;  %v7235_v51 = vld [vmem:[#allocation14_spill] sm:$0xff] }
 0x2d4   :  { %3299 = vpow2.f32 %v3166_v55  ;;  %v1462_v17 = vpop.f32.mrf.mxu3  ;;  %v1442_v0 = vpop.f32.mrf.mxu2 }
 0x2d5   :  { %3301 = vpow2.f32 %v3167_v43  ;;  %v1472_v48 = vrot.slane %v1462_v17, 5  ;;  %v1471_v53 = vrot.slane %v1442_v0, 5 }
 0x2d7   :  { %v1480_v54 = vadd.f32 %v1472_v48, %v7234_v57  ;;  %v1479_v55 = vadd.f32 %v1471_v53, %v7235_v51 }
 0x2d9   :  { %v3168_v34 = vmul.f32 -1.442695, %v1480_v54 }
 0x2da   :  { %v3300_v27 = vpop.eup %3299 }
 0x2db   :  { %v3302_v4 = vpop.eup %3301  ;;  %v1484_v44 = vadd.f32 1.0, %v3300_v27  ;;  %3303 = vpow2.f32 %v3168_v34 }
 0x2dc   :  { %v1503_v40 = vadd.f32 1.0, %v3302_v4 }
 0x2dd   :  { %3305 = vrcp.f32 %v1484_v44  ;;  %v1496_v57 = vand.u32 2147483648, %v1484_v44  ;;  %v1494_v4 = vand.u32 2147483647, %v1484_v44  ;;  %vm1490_vm11 = vweird.f32 %v1484_v44 }
 0x2de   :  { %3307 = vrcp.f32 %v1503_v40  ;;  %v1515_v27 = vand.u32 2147483648, %v1503_v40  ;;  %v1513_v0 = vand.u32 2147483647, %v1503_v40  ;;  %vm1509_vm12 = vweird.f32 %v1503_v40 }
 0x2df   :  { %v1497_v53 = vor.u32 1.1754944e-38, %v1496_v57  ;;  %vm1495_vm15 = vcmp.eq.f32.partialorder %v1494_v4, 8.507059e+37 }
 0x2e0   :  { %vm1514_vm0 = vcmp.eq.f32.partialorder %v1513_v0, 8.507059e+37 }
 0x2e1   :  { %v3304_v61 = vpop.eup %3303 }
 0x2e2   :  { %v1523_v42 = vadd.f32 1.0, %v3304_v61 }
 0x2e3   :  { %v3306_v23 = vpop.eup %3305 }
 0x2e4   :  { %v3308_v12 = vpop.eup %3307  ;;  %v1486_v43 = vmul.f32 %v3306_v23, %v1484_v44  ;;  %3309 = vrcp.f32 %v1523_v42  ;;  %vm1491_vm9 = vweird.f32 %v3306_v23  ;;  %vm1529_vm2 = vweird.f32 %v1523_v42 }
 0x2e5   :  { %v1505_v17 = vmul.f32 %v3308_v12, %v1503_v40  ;;  %3311 = vtanh.f32 %v1479_v55  ;;  %vm1510_vm10 = vweird.f32 %v3308_v12  ;;  %vm1492_vm13 = vmor %vm1490_vm11, %vm1491_vm9 }
 0x2e6   :  { %v1487_v48 = vsub.f32 1.0, %v1486_v43  ;;  %v1540_v43 = vrot.slane %v5328_v2, 7  ;;  %vm1511_vm14 = vmor %vm1509_vm12, %vm1510_vm10 }
 0x2e7   :  { %v1506_v54 = vsub.f32 1.0, %v1505_v17  ;;  %v1516_v17 = vor.u32 1.1754944e-38, %v1515_v27 }
 0x2e8   :  { %v1488_v34 = vmul.f32 %v3306_v23, %v1487_v48 }
 0x2e9   :  { %v1507_v28 = vmul.f32 %v3308_v12, %v1506_v54 }
 0x2ea   :  { %v3310_v19 = vpop.eup %3309  ;;  %v1489_v61 = vadd.f32 %v3306_v23, %v1488_v34 }
 0x2eb   :  { %v1508_v51 = vadd.f32 %v3308_v12, %v1507_v28  ;;  %v1525_v63 = vmul.f32 %v3310_v19, %v1523_v42  ;;  %v3312_v48 = vpop.eup %3311  ;;  %vm1530_vm1 = vweird.f32 %v3310_v19 }
 0x2ec   :  { %v1493_v55 = vsel %vm1492_vm13, %v3306_v23, %v1489_v61  ;;  %v1535_v23 = vand.u32 2147483648, %v1523_v42  ;;  %vm1531_vm3 = vmor %vm1529_vm2, %vm1530_vm1 }
 0x2ed   :  { %v1498_v25 = vsel %vm1495_vm15, %v1497_v53, %v1493_v55  ;;  %v1512_v59 = vsel %vm1511_vm14, %v3308_v12, %v1508_v51  ;;  %v1526_v54 = vsub.f32 1.0, %v1525_v63 }
 0x2ee   :  { %v1517_v38 = vsel %vm1514_vm0, %v1516_v17, %v1512_v59  ;;  %v1543_v29 = vmul.f32 %v3312_v48, %v1498_v25  ;;  %v1533_v59 = vand.u32 2147483647, %v1523_v42  ;;  %v1536_v51 = vor.u32 1.1754944e-38, %v1535_v23 }
 0x2ef   :  { %v1542_v34 = vmul.f32 %v1540_v43, %v1517_v38  ;;  %v1527_v44 = vmul.f32 %v3310_v19, %v1526_v54  ;;  %v5674_v54 = vld [vmem:[#allocation3 + $0x1f0] sm:$0xff] }
 0x2f0   :  { %vm1534_vm4 = vcmp.eq.f32.partialorder %v1533_v59, 8.507059e+37  ;;  %v5718_v59 = vld [vmem:[#allocation3 + $0x170] sm:$0xff] }
 0x2f1   :  { %v5660_v57 = vadd.f32 %v1543_v29, %v1542_v34  ;;  %v1528_v2 = vadd.f32 %v3310_v19, %v1527_v44  ;;  %v5677_v34 = vld [vmem:[#allocation3 + $0x1f8] sm:$0xff] }
 0x2f3   :  { %3313 = vtanh.f32 %v5660_v57  ;;  %v1532_v63 = vsel %vm1531_vm3, %v3310_v19, %v1528_v2  ;;  %v5692_v2 = vld [vmem:[#allocation3 + $0x1b0] sm:$0xff] }
 0x2f4   :  { %v1564_v40 = vpop.f32.mrf.mxu0  ;;  %v1584_v3 = vpop.f32.mrf.mxu1  ;;  %v1537_v0 = vsel %vm1534_vm4, %v1536_v51, %v1532_v63  ;;  %v5731_v51 = vld [vmem:[#allocation3 + $0x150] sm:$0xff] }
 0x2f5   :  { %v1631_v28 = vrot.slane %v1564_v40, 4  ;;  %v1632_v9 = vrot.slane %v1584_v3, 4  ;;  %v5682_v40 = vld [vmem:[#allocation3 + $0x1d0] sm:$0xff] }
 0x2f7   :  { %v1639_v27 = vadd.f32 %v1631_v28, %v4648_v6  ;;  %v1640_v12 = vadd.f32 %v1632_v9, %v7084_v36 }
 0x2f9   :  { %v3169_v25 = vmul.f32 -1.442695, %v1639_v27  ;;  %v3170_v38 = vmul.f32 -1.442695, %v1640_v12  ;;  %v3314_v4 = vpop.eup %3313  ;;  %v5708_v27 = vld [vmem:[#allocation3 + $0x190] sm:$0xff]  ;;  %v5711_v12 = vld [vmem:[#allocation3 + $0x198] sm:$0xff] }
 0x2fa   :  { %v1546_v53 = vmul.f32 %v3314_v4, %v1537_v0 }
 0x2fb   :  { %3315 = vpow2.f32 %v3169_v25  ;;  %v1624_v29 = vpop.f32.mrf.mxu3  ;;  %v1604_v48 = vpop.f32.mrf.mxu2  ;;  %v5721_v25 = vld [vmem:[#allocation3 + $0x178] sm:$0xff] }
 0x2fc   :  { %3317 = vpow2.f32 %v3170_v38  ;;  %v1634_v3 = vrot.slane %v1624_v29, 4  ;;  %v1710_v17 = vrot.slane %v1546_v53, 3  ;;  %v1633_v44 = vrot.slane %v1604_v48, 4  ;;  %v5749_v53 = vld [vmem:[#allocation3 + $0x138] sm:$0xff]  ;;  %v5774_v48 = vld [vmem:[#allocation3 + $0x110] sm:$0xff] }
 0x2fe   :  { %v1642_v61 = vadd.f32 %v1634_v3, %v4682_v10  ;;  %1712 = vst [vmem:[#allocation2 + $0x3] sm:$0x1] %v1710_v17  ;;  %1733 = vmatmul.f32.vlgmr.msra.gmra.mxu0 %v1710_v17  ;;  %1753 = vmatmul.f32.vlgmr.msra.gmra.mxu1 %v1710_v17  ;;  %v1641_v23 = vadd.f32 %v1633_v44, %v4686_v26  ;;  %v5734_v3 = vld [vmem:[#allocation3 + $0x158] sm:$0xff] }
 0x2ff   :  { %1773 = vmatmul.f32.vlgmr.msra.gmra.mxu2 %v1710_v17  ;;  %1793 = vmatmul.f32.vlgmr.msra.gmra.mxu3 %v1710_v17 }
 0x300   :  { %v3171_v43 = vmul.f32 -1.442695, %v1642_v61  ;;  %2049 = vmatpush.msra.mxu0 %v5339_v30  ;;  %2069 = vmatpush.msra.mxu1 %v5342_v1  ;;  %v5685_v30 = vld [vmem:[#allocation3 + $0x1d8] sm:$0xff]  ;;  %v5746_v61 = vld [vmem:[#allocation3 + $0x130] sm:$0xff] }
 0x301   :  { %v3316_v9 = vpop.eup %3315  ;;  %2089 = vmatpush.msra.mxu2 %v5674_v54  ;;  %2109 = vmatpush.msra.mxu3 %v5677_v34 }
 0x302   :  { %v3318_v55 = vpop.eup %3317  ;;  %v5666_v42 = vadd.f32 1.0, %v3316_v9  ;;  %3319 = vpow2.f32 %v3171_v43  ;;  %2050 = vmatpush.msra.mxu0 %v5348_v50  ;;  %2070 = vmatpush.msra.mxu1 %v5351_v24  ;;  %v5695_v50 = vld [vmem:[#allocation3 + $0x1b8] sm:$0xff]  ;;  %v1702_v9 = vrot.slane %v5468_v39, 1 }
 0x303   :  { %v5668_v19 = vadd.f32 1.0, %v3318_v55  ;;  %2090 = vmatpush.msra.mxu2 %v5682_v40  ;;  %2110 = vmatpush.msra.mxu3 %v5685_v30  ;;  %v7248_v55 = vld [vmem:[#allocation15_spill] sm:$0xff] }
 0x304   :  { %3321 = vrcp.f32 %v5666_v42  ;;  %2051 = vmatpush.msra.mxu0 %v5356_v11  ;;  %2071 = vmatpush.msra.mxu1 %v5359_v15  ;;  %v1658_v63 = vand.u32 2147483648, %v5666_v42  ;;  %v1656_v29 = vand.u32 2147483647, %v5666_v42  ;;  %vm1652_vm7 = vweird.f32 %v5666_v42 }
 0x305   :  { %3323 = vrcp.f32 %v5668_v19  ;;  %2091 = vmatpush.msra.mxu2 %v5692_v2  ;;  %2111 = vmatpush.msra.mxu3 %v5695_v50  ;;  %vm1671_vm8 = vweird.f32 %v5668_v19 }
 0x306   :  { %2052 = vmatpush.msra.mxu0 %v5369_v52  ;;  %2072 = vmatpush.msra.mxu1 %v5372_v22  ;;  %vm1657_vm11 = vcmp.eq.f32.partialorder %v1656_v29, 8.507059e+37  ;;  %v5899_v29 = vld [vmem:[#allocation6 + $0x170] sm:$0xff] }
 0x307   :  { %2092 = vmatpush.msra.mxu2 %v5708_v27  ;;  %2112 = vmatpush.msra.mxu3 %v5711_v12  ;;  %7262 = vst [vmem:[#allocation46_spill] sm:$0xff] %v5899_v29 }
 0x308   :  { %v3320_v1 = vpop.eup %3319  ;;  %2053 = vmatpush.msra.mxu0 %v5384_v7  ;;  %2073 = vmatpush.msra.mxu1 %v5387_v14  ;;  %v1677_v7 = vand.u32 2147483648, %v5668_v19 }
 0x309   :  { %v5690_v28 = vadd.f32 1.0, %v3320_v1  ;;  %2093 = vmatpush.msra.mxu2 %v5718_v59  ;;  %2113 = vmatpush.msra.mxu3 %v5721_v25 }
 0x30a   :  { %v5698_v24 = vpop.eup %3321  ;;  %2054 = vmatpush.msra.mxu0 %v5393_v13  ;;  %2074 = vmatpush.msra.mxu1 %v5396_v35  ;;  %v1675_v35 = vand.u32 2147483647, %v5668_v19 }
 0x30b   :  { %v5703_v11 = vpop.eup %3323  ;;  %v1648_v15 = vmul.f32 %v5698_v24, %v5666_v42  ;;  %3325 = vrcp.f32 %v5690_v28  ;;  %vm1653_vm5 = vweird.f32 %v5698_v24  ;;  %2094 = vmatpush.msra.mxu2 %v5731_v51  ;;  %2114 = vmatpush.msra.mxu3 %v5734_v3  ;;  %v1678_v42 = vor.u32 1.1754944e-38, %v1677_v7 }
 0x30c   :  { %v1667_v52 = vmul.f32 %v5703_v11, %v5668_v19  ;;  %3327 = vtanh.f32 %v1641_v23  ;;  %vm1672_vm6 = vweird.f32 %v5703_v11  ;;  %2055 = vmatpush.msra.mxu0 %v5408_v58  ;;  %2075 = vmatpush.msra.mxu1 %v5411_v32  ;;  %vm5755_vm9 = vmor %vm1652_vm7, %vm1653_vm5  ;;  %v1659_v32 = vor.u32 1.1754944e-38, %v1658_v63  ;;  %v5851_v58 = vld [vmem:[#allocation3 + $0x30] sm:$0xff] }
 0x30d   :  { %v1649_v22 = vsub.f32 1.0, %v1648_v15  ;;  %2095 = vmatpush.msra.mxu2 %v5746_v61  ;;  %2115 = vmatpush.msra.mxu3 %v5749_v53  ;;  %vm5767_vm10 = vmor %vm1671_vm8, %vm1672_vm6  ;;  %vm1676_vm12 = vcmp.eq.f32.partialorder %v1675_v35, 8.507059e+37  ;;  %v5785_v15 = vld [vmem:[#allocation3 + $0xf0] sm:$0xff]  ;;  %v1697_v7 = vand.u32 2147483648, %v5690_v28  ;;  %vm1691_vm14 = vweird.f32 %v5690_v28 }
 0x30e   :  { %v1668_v38 = vsub.f32 1.0, %v1667_v52  ;;  %2056 = vmatpush.msra.mxu0 %v5430_v31  ;;  %2076 = vmatpush.msra.mxu1 %v5433_v45  ;;  %v5777_v31 = vld [vmem:[#allocation3 + $0x118] sm:$0xff] }
 0x30f   :  { %v1650_v14 = vmul.f32 %v5698_v24, %v1649_v22  ;;  %2096 = vmatpush.msra.mxu2 %v5774_v48  ;;  %2116 = vmatpush.msra.mxu3 %v5777_v31  ;;  %v5788_v52 = vld [vmem:[#allocation3 + $0xf8] sm:$0xff] }
 0x310   :  { %v1669_v13 = vmul.f32 %v5703_v11, %v1668_v38  ;;  %2057 = vmatpush.msra.mxu0 %v5451_v41  ;;  %2077 = vmatpush.msra.mxu1 %v5454_v33  ;;  %v5794_v41 = vld [vmem:[#allocation3 + $0xd0] sm:$0xff]  ;;  %v5797_v33 = vld [vmem:[#allocation3 + $0xd8] sm:$0xff] }
 0x311   :  { %v5742_v4 = vpop.eup %3325  ;;  %v1651_v0 = vadd.f32 %v5698_v24, %v1650_v14  ;;  %2097 = vmatpush.msra.mxu2 %v5785_v15  ;;  %2117 = vmatpush.msra.mxu3 %v5788_v52  ;;  %v5821_v14 = vld [vmem:[#allocation3 + $0x98] sm:$0xff] }
 0x312   :  { %v1670_v43 = vadd.f32 %v5703_v11, %v1669_v13  ;;  %v1687_v17 = vmul.f32 %v5742_v4, %v5690_v28  ;;  %v3328_v45 = vpop.eup %3327  ;;  %2058 = vmatpush.msra.mxu0 %v5460_v21  ;;  %2078 = vmatpush.msra.mxu1 %v5463_v60  ;;  %vm1692_vm13 = vweird.f32 %v5742_v4  ;;  %v5806_v21 = vld [vmem:[#allocation3 + $0xb0] sm:$0xff]  ;;  %v5809_v60 = vld [vmem:[#allocation3 + $0xb8] sm:$0xff]  ;;  %v1698_v13 = vor.u32 1.1754944e-38, %v1697_v7  ;;  %v7260_v7 = vld [vmem:[#allocation20_spill] sm:$0xff] }
 0x313   :  { %v1655_v19 = vsel %vm5755_vm9, %v5698_v24, %v1651_v0  ;;  %2098 = vmatpush.msra.mxu2 %v5794_v41  ;;  %2118 = vmatpush.msra.mxu3 %v5797_v33  ;;  %vm5826_vm15 = vmor %vm1691_vm14, %vm1692_vm13 }
 0x314   :  { %v1660_v39 = vsel %vm1657_vm11, %v1659_v32, %v1655_v19  ;;  %v1674_v44 = vsel %vm5767_vm10, %v5703_v11, %v1670_v43  ;;  %v1688_v1 = vsub.f32 1.0, %v1687_v17  ;;  %2059 = vmatpush.msra.mxu0 %v5470_v8  ;;  %2079 = vmatpush.msra.mxu1 %v5473_v56  ;;  %v1695_v8 = vand.u32 2147483647, %v5690_v28  ;;  %v5818_v56 = vld [vmem:[#allocation3 + $0x90] sm:$0xff]  ;;  %v5838_v28 = vld [vmem:[#allocation3 + $0x78] sm:$0xff]  ;;  %v7245_v17 = vld [vmem:[#allocation19_spill] sm:$0xff] }
 0x315   :  { %v1679_v24 = vsel %vm1676_vm12, %v1678_v42, %v1674_v44  ;;  %v1705_v23 = vmul.f32 %v3328_v45, %v1660_v39  ;;  %2099 = vmatpush.msra.mxu2 %v5806_v21  ;;  %2119 = vmatpush.msra.mxu3 %v5809_v60  ;;  %v5859_v43 = vld [vmem:[#allocation3 + $0x10] sm:$0xff]  ;;  %v7249_v42 = vld [vmem:[#allocation22_spill] sm:$0xff]  ;;  %v7252_v39 = vld [vmem:[#allocation23_spill] sm:$0xff] }
 0x316   :  { %v1704_v22 = vmul.f32 %v1702_v9, %v1679_v24  ;;  %v1689_v38 = vmul.f32 %v5742_v4, %v1688_v1  ;;  %2060 = vmatpush.msra.mxu0 %v5482_v47  ;;  %2080 = vmatpush.msra.mxu1 %v5485_v16  ;;  %v5835_v16 = vld [vmem:[#allocation3 + $0x70] sm:$0xff]  ;;  %vm1696_vm0 = vcmp.eq.f32.partialorder %v1695_v8, 8.507059e+37  ;;  %v5870_v9 = vld [vmem:[#allocation6 + $0x1f8] sm:$0xff]  ;;  %v7253_v44 = vld [vmem:[#allocation16_spill] sm:$0xff] }
 0x317   :  { %2100 = vmatpush.msra.mxu2 %v5818_v56  ;;  %2120 = vmatpush.msra.mxu3 %v5821_v14  ;;  %7247 = vst [vmem:[#allocation48_spill] sm:$0xff] %v5870_v9  ;;  %v5875_v19 = vld [vmem:[#allocation6 + $0x1d0] sm:$0xff]  ;;  %v5878_v45 = vld [vmem:[#allocation6 + $0x1d8] sm:$0xff] }
 0x318   :  { %v5800_v11 = vadd.f32 %v1705_v23, %v1704_v22  ;;  %v1690_v63 = vadd.f32 %v5742_v4, %v1689_v38  ;;  %2061 = vmatpush.msra.mxu0 %v5496_v46  ;;  %2081 = vmatpush.msra.mxu1 %v5499_v5  ;;  %v5843_v46 = vld [vmem:[#allocation3 + $0x50] sm:$0xff]  ;;  %v5846_v5 = vld [vmem:[#allocation3 + $0x58] sm:$0xff]  ;;  %7250 = vst [vmem:[#allocation58_spill] sm:$0xff] %v5875_v19 }
 0x319   :  { %2101 = vmatpush.msra.mxu2 %v5835_v16  ;;  %2121 = vmatpush.msra.mxu3 %v5838_v28  ;;  %7251 = vst [vmem:[#allocation51_spill] sm:$0xff] %v5878_v45  ;;  %v5883_v1 = vld [vmem:[#allocation6 + $0x1b0] sm:$0xff]  ;;  %v5886_v24 = vld [vmem:[#allocation6 + $0x1b8] sm:$0xff] }
 0x31a   :  { %3329 = vtanh.f32 %v5800_v11  ;;  %v1694_v47 = vsel %vm5826_vm15, %v5742_v4, %v1690_v63  ;;  %2062 = vmatpush.msra.mxu0 %v5507_v20  ;;  %2082 = vmatpush.msra.mxu1 %v5510_v49  ;;  %v5854_v20 = vld [vmem:[#allocation3 + $0x38] sm:$0xff]  ;;  %7254 = vst [vmem:[#allocation52_spill] sm:$0xff] %v5883_v1  ;;  %v7256_v23 = vld [vmem:[#allocation17_spill] sm:$0xff] }
 0x31b   :  { %2102 = vmatpush.msra.mxu2 %v5843_v46  ;;  %2122 = vmatpush.msra.mxu3 %v5846_v5  ;;  %v1699_v4 = vsel %vm1696_vm0, %v1698_v13, %v1694_v47  ;;  %v7242_v49 = vld [vmem:[#allocation82_spill] sm:$0xff]  ;;  %7255 = vst [vmem:[#allocation37_spill] sm:$0xff] %v5886_v24  ;;  %v5891_v38 = vld [vmem:[#allocation6 + $0x190] sm:$0xff] }
 0x31c   :  { %2063 = vmatpush.msra.mxu0 %v5515_v18  ;;  %2083 = vmatpush.msra.mxu1 %v5518_v62  ;;  %v5862_v18 = vld [vmem:[#allocation3 + $0x18] sm:$0xff]  ;;  %v7244_v62 = vld [vmem:[#allocation83_spill] sm:$0xff]  ;;  %7258 = vst [vmem:[#allocation38_spill] sm:$0xff] %v5891_v38  ;;  %v7261_v8 = vld [vmem:[#allocation21_spill] sm:$0xff] }
 0x31d   :  { %2103 = vmatpush.msra.mxu2 %v5851_v58  ;;  %2123 = vmatpush.msra.mxu3 %v5854_v20  ;;  %7243 = vst [vmem:[#allocation57_spill] sm:$0xff] %v5862_v18  ;;  %v7257_v22 = vld [vmem:[#allocation26_spill] sm:$0xff]  ;;  %v7264_v13 = vld [vmem:[#allocation29_spill] sm:$0xff] }
 0x31e   :  { %2064 = vmatpush.msra.mxu0 %v5523_v37  ;;  %2084 = vmatpush.msra.mxu1 %v7242_v49  ;;  %v5867_v37 = vld [vmem:[#allocation6 + $0x1f0] sm:$0xff]  ;;  %v5894_v63 = vld [vmem:[#allocation6 + $0x198] sm:$0xff]  ;;  %v7268_v49 = vld [vmem:[#allocation24_spill] sm:$0xff] }
 0x31f   :  { %2104 = vmatpush.msra.mxu2 %v5859_v43  ;;  %2124 = vmatpush.msra.mxu3 %v5862_v18  ;;  %7246 = vst [vmem:[#allocation47_spill] sm:$0xff] %v5867_v37  ;;  %v5902_v47 = vld [vmem:[#allocation6 + $0x178] sm:$0xff] }
 0x320   :  { %v3330_v35 = vpop.eup %3329  ;;  %7259 = vst [vmem:[#allocation45_spill] sm:$0xff] %v5894_v63 }
 0x321   :  { %v1708_v0 = vmul.f32 %v3330_v35, %v1699_v4  ;;  %7263 = vst [vmem:[#allocation50_spill] sm:$0xff] %v5902_v47  ;;  %v7265_v35 = vld [vmem:[#allocation30_spill] sm:$0xff]  ;;  %v5907_v4 = vld [vmem:[#allocation6 + $0x150] sm:$0xff] }
 0x322   :  { %7266 = vst [vmem:[#allocation53_spill] sm:$0xff] %v5907_v4 }
 0x323   :  { %v1714_v32 = vrot.slane %v1708_v0, 4  ;;  %v5910_v0 = vld [vmem:[#allocation6 + $0x158] sm:$0xff] }
 0x324   :  { %7267 = vst [vmem:[#allocation59_spill] sm:$0xff] %v5910_v0 }
 0x325   :  { %1716 = vst [vmem:[#allocation2 + $0xc] sm:$0x1] %v1714_v32  ;;  %1895 = vmatmul.f32.vlgmr.msrb.gmra.mxu0 %v1714_v32  ;;  %1915 = vmatmul.f32.vlgmr.msrb.gmra.mxu1 %v1714_v32 }
 0x326   :  { %1935 = vmatmul.f32.vlgmr.msrb.gmra.mxu2 %v1714_v32  ;;  %1955 = vmatmul.f32.vlgmr.msrb.gmra.mxu3 %v1714_v32  ;;  %v7269_v32 = vld [vmem:[#allocation25_spill] sm:$0xff] }
 0x327   :  { %2211 = vmatpush.msrb.mxu0 %v7244_v62  ;;  %2231 = vmatpush.msrb.mxu1 %v7245_v17  ;;  %v5915_v62 = vld [vmem:[#allocation6 + $0x130] sm:$0xff]  ;;  %v5918_v17 = vld [vmem:[#allocation6 + $0x138] sm:$0xff] }
 0x328   :  { %2251 = vmatpush.msrb.mxu2 %v5867_v37  ;;  %2271 = vmatpush.msrb.mxu3 %v5870_v9  ;;  %7270 = vst [vmem:[#allocation60_spill] sm:$0xff] %v5915_v62 }
 0x329   :  { %2212 = vmatpush.msrb.mxu0 %v7248_v55  ;;  %2232 = vmatpush.msrb.mxu1 %v7249_v42  ;;  %7271 = vst [vmem:[#allocation61_spill] sm:$0xff] %v5918_v17  ;;  %v7272_v55 = vld [vmem:[#allocation33_spill] sm:$0xff]  ;;  %v7273_v42 = vld [vmem:[#allocation34_spill] sm:$0xff] }
 0x32a   :  { %2252 = vmatpush.msrb.mxu2 %v5875_v19  ;;  %2272 = vmatpush.msrb.mxu3 %v5878_v45 }
 0x32b   :  { %2213 = vmatpush.msrb.mxu0 %v7252_v39  ;;  %2233 = vmatpush.msrb.mxu1 %v7253_v44  ;;  %v5923_v39 = vld [vmem:[#allocation6 + $0x110] sm:$0xff]  ;;  %v5926_v44 = vld [vmem:[#allocation6 + $0x118] sm:$0xff] }
 0x32c   :  { %2253 = vmatpush.msrb.mxu2 %v5883_v1  ;;  %2273 = vmatpush.msrb.mxu3 %v5886_v24  ;;  %7274 = vst [vmem:[#allocation62_spill] sm:$0xff] %v5923_v39 }
 0x32d   :  { %2214 = vmatpush.msrb.mxu0 %v7256_v23  ;;  %2234 = vmatpush.msrb.mxu1 %v7257_v22  ;;  %7275 = vst [vmem:[#allocation63_spill] sm:$0xff] %v5926_v44  ;;  %v7276_v23 = vld [vmem:[#allocation27_spill] sm:$0xff]  ;;  %v7277_v22 = vld [vmem:[#allocation28_spill] sm:$0xff] }
 0x32e   :  { %2254 = vmatpush.msrb.mxu2 %v5891_v38  ;;  %2274 = vmatpush.msrb.mxu3 %v5894_v63 }
 0x32f   :  { %2215 = vmatpush.msrb.mxu0 %v7260_v7  ;;  %2235 = vmatpush.msrb.mxu1 %v7261_v8  ;;  %v5931_v7 = vld [vmem:[#allocation6 + $0xf0] sm:$0xff]  ;;  %v5934_v8 = vld [vmem:[#allocation6 + $0xf8] sm:$0xff] }
 0x330   :  { %2255 = vmatpush.msrb.mxu2 %v5899_v29  ;;  %2275 = vmatpush.msrb.mxu3 %v5902_v47  ;;  %7278 = vst [vmem:[#allocation64_spill] sm:$0xff] %v5931_v7 }
 0x331   :  { %2216 = vmatpush.msrb.mxu0 %v7264_v13  ;;  %2236 = vmatpush.msrb.mxu1 %v7265_v35  ;;  %7279 = vst [vmem:[#allocation65_spill] sm:$0xff] %v5934_v8  ;;  %v7280_v13 = vld [vmem:[#allocation31_spill] sm:$0xff]  ;;  %v7281_v35 = vld [vmem:[#allocation32_spill] sm:$0xff] }
 0x332   :  { %2256 = vmatpush.msrb.mxu2 %v5907_v4  ;;  %2276 = vmatpush.msrb.mxu3 %v5910_v0  ;;  %v7310_v0 = vld [vmem:[#allocation18_spill] sm:$0xff] }
 0x333   :  { %2217 = vmatpush.msrb.mxu0 %v7268_v49  ;;  %2237 = vmatpush.msrb.mxu1 %v7269_v32  ;;  %v5939_v49 = vld [vmem:[#allocation6 + $0xd0] sm:$0xff]  ;;  %v5942_v32 = vld [vmem:[#allocation6 + $0xd8] sm:$0xff] }
 0x334   :  { %2257 = vmatpush.msrb.mxu2 %v5915_v62  ;;  %2277 = vmatpush.msrb.mxu3 %v5918_v17  ;;  %7282 = vst [vmem:[#allocation66_spill] sm:$0xff] %v5939_v49 }
 0x335   :  { %2218 = vmatpush.msrb.mxu0 %v7272_v55  ;;  %2238 = vmatpush.msrb.mxu1 %v7273_v42  ;;  %7283 = vst [vmem:[#allocation67_spill] sm:$0xff] %v5942_v32  ;;  %v7284_v55 = vld [vmem:[#allocation41_spill] sm:$0xff]  ;;  %v7285_v42 = vld [vmem:[#allocation42_spill] sm:$0xff] }
 0x336   :  { %2258 = vmatpush.msrb.mxu2 %v5923_v39  ;;  %2278 = vmatpush.msrb.mxu3 %v5926_v44  ;;  %v7309_v44 = vld [vmem:[#allocation13_spill] sm:$0xff] }
 0x337   :  { %2219 = vmatpush.msrb.mxu0 %v7276_v23  ;;  %2239 = vmatpush.msrb.mxu1 %v7277_v22  ;;  %v5947_v23 = vld [vmem:[#allocation6 + $0xb0] sm:$0xff]  ;;  %v5950_v22 = vld [vmem:[#allocation6 + $0xb8] sm:$0xff] }
 0x338   :  { %2259 = vmatpush.msrb.mxu2 %v5931_v7  ;;  %2279 = vmatpush.msrb.mxu3 %v5934_v8  ;;  %7286 = vst [vmem:[#allocation68_spill] sm:$0xff] %v5947_v23  ;;  %v7308_v8 = vld [vmem:[#allocation12_spill] sm:$0xff] }
 0x339   :  { %2220 = vmatpush.msrb.mxu0 %v7280_v13  ;;  %2240 = vmatpush.msrb.mxu1 %v7281_v35  ;;  %7287 = vst [vmem:[#allocation69_spill] sm:$0xff] %v5950_v22  ;;  %v7288_v13 = vld [vmem:[#allocation35_spill] sm:$0xff]  ;;  %v7289_v35 = vld [vmem:[#allocation36_spill] sm:$0xff] }
 0x33a   :  { %2260 = vmatpush.msrb.mxu2 %v5939_v49  ;;  %2280 = vmatpush.msrb.mxu3 %v5942_v32  ;;  %v5955_v49 = vld [vmem:[#allocation6 + $0x90] sm:$0xff]  ;;  %v5958_v32 = vld [vmem:[#allocation6 + $0x98] sm:$0xff] }
 0x33b   :  { %2221 = vmatpush.msrb.mxu0 %v7284_v55  ;;  %2241 = vmatpush.msrb.mxu1 %v7285_v42  ;;  %7290 = vst [vmem:[#allocation70_spill] sm:$0xff] %v5955_v49  ;;  %v7292_v55 = vld [vmem:[#allocation39_spill] sm:$0xff]  ;;  %v7293_v42 = vld [vmem:[#allocation40_spill] sm:$0xff] }
 0x33c   :  { %2261 = vmatpush.msrb.mxu2 %v5947_v23  ;;  %2281 = vmatpush.msrb.mxu3 %v5950_v22  ;;  %7291 = vst [vmem:[#allocation71_spill] sm:$0xff] %v5958_v32  ;;  %v5963_v23 = vld [vmem:[#allocation6 + $0x70] sm:$0xff]  ;;  %v5966_v22 = vld [vmem:[#allocation6 + $0x78] sm:$0xff] }
 0x33d   :  { %2222 = vmatpush.msrb.mxu0 %v7288_v13  ;;  %2242 = vmatpush.msrb.mxu1 %v7289_v35  ;;  %7294 = vst [vmem:[#allocation72_spill] sm:$0xff] %v5963_v23  ;;  %v7296_v13 = vld [vmem:[#allocation49_spill] sm:$0xff]  ;;  %v7297_v35 = vld [vmem:[#allocation43_spill] sm:$0xff] }
 0x33e   :  { %2262 = vmatpush.msrb.mxu2 %v5955_v49  ;;  %2282 = vmatpush.msrb.mxu3 %v5958_v32  ;;  %7295 = vst [vmem:[#allocation73_spill] sm:$0xff] %v5966_v22  ;;  %v5971_v49 = vld [vmem:[#allocation6 + $0x50] sm:$0xff]  ;;  %v5974_v32 = vld [vmem:[#allocation6 + $0x58] sm:$0xff] }
 0x33f   :  { %2223 = vmatpush.msrb.mxu0 %v7292_v55  ;;  %2243 = vmatpush.msrb.mxu1 %v7293_v42  ;;  %7298 = vst [vmem:[#allocation74_spill] sm:$0xff] %v5971_v49  ;;  %v7300_v55 = vld [vmem:[#allocation44_spill] sm:$0xff] }
 0x340   :  { %2263 = vmatpush.msrb.mxu2 %v5963_v23  ;;  %2283 = vmatpush.msrb.mxu3 %v5966_v22  ;;  %7299 = vst [vmem:[#allocation75_spill] sm:$0xff] %v5974_v32  ;;  %v7301_v42 = vld [vmem:[#allocation56_spill] sm:$0xff]  ;;  %v5979_v23 = vld [vmem:[#allocation6 + $0x30] sm:$0xff]  ;;  %v5982_v22 = vld [vmem:[#allocation6 + $0x38] sm:$0xff] }
 0x341   :  { %2224 = vmatpush.msrb.mxu0 %v7296_v13  ;;  %2244 = vmatpush.msrb.mxu1 %v7297_v35  ;;  %7302 = vst [vmem:[#allocation76_spill] sm:$0xff] %v5979_v23  ;;  %v5985_v13 = vld [vmem:[#allocation6] sm:$0xff]  ;;  %v5988_v35 = vld [vmem:[#allocation6 + $0x8] sm:$0xff] }
 0x342   :  { %2264 = vmatpush.msrb.mxu2 %v5971_v49  ;;  %2284 = vmatpush.msrb.mxu3 %v5974_v32  ;;  %7303 = vst [vmem:[#allocation77_spill] sm:$0xff] %v5982_v22  ;;  %v5991_v32 = vld [vmem:[#allocation6 + $0x10] sm:$0xff] }
 0x343   :  { %2225 = vmatpush.msrb.mxu0 %v7300_v55  ;;  %2245 = vmatpush.msrb.mxu1 %v7301_v42  ;;  %7304 = vst [vmem:[#allocation78_spill] sm:$0xff] %v5985_v13  ;;  %v5994_v55 = vld [vmem:[#allocation6 + $0x18] sm:$0xff] }
 0x344   :  { %2265 = vmatpush.msrb.mxu2 %v5979_v23  ;;  %2285 = vmatpush.msrb.mxu3 %v5982_v22  ;;  %7305 = vst [vmem:[#allocation79_spill] sm:$0xff] %v5988_v35 }
 0x345   :  { %2226 = vmatpush.msrb.mxu0 %v5985_v13  ;;  %2246 = vmatpush.msrb.mxu1 %v5988_v35  ;;  %7306 = vst [vmem:[#allocation80_spill] sm:$0xff] %v5991_v32 }
 0x346   :  { %2266 = vmatpush.msrb.mxu2 %v5991_v32  ;;  %7307 = vst [vmem:[#allocation81_spill] sm:$0xff] %v5994_v55  ;;  %2286 = vmatpush.msrb.mxu3 %v5994_v55 }
 0x37b   :  { %v1734_v42 = vpop.f32.mrf.mxu0  ;;  %v1754_v23 = vpop.f32.mrf.mxu1 }
 0x37c   :  { %v1801_v49 = vrot.slane %v1734_v42, 4  ;;  %v1802_v22 = vrot.slane %v1754_v23, 4 }
 0x37e   :  { %v1809_v7 = vadd.f32 %v1801_v49, %v7308_v8  ;;  %v1810_v13 = vadd.f32 %v1802_v22, %v7309_v44 }
 0x380   :  { %v3172_v39 = vmul.f32 -1.442695, %v1809_v7  ;;  %v3173_v17 = vmul.f32 -1.442695, %v1810_v13  ;;  %v7311_v13 = vld [vmem:[#allocation14_spill] sm:$0xff] }
 0x382   :  { %3331 = vpow2.f32 %v3172_v39  ;;  %v1794_v35 = vpop.f32.mrf.mxu3  ;;  %v1774_v42 = vpop.f32.mrf.mxu2 }
 0x383   :  { %3333 = vpow2.f32 %v3173_v17  ;;  %v1804_v62 = vrot.slane %v1794_v35, 4  ;;  %v1803_v49 = vrot.slane %v1774_v42, 4 }
 0x385   :  { %v1812_v32 = vadd.f32 %v1804_v62, %v7310_v0  ;;  %v1811_v39 = vadd.f32 %v1803_v49, %v7311_v13 }
 0x387   :  { %v3174_v4 = vmul.f32 -1.442695, %v1812_v32 }
 0x388   :  { %v3332_v47 = vpop.eup %3331 }
 0x389   :  { %v3334_v29 = vpop.eup %3333  ;;  %v1816_v55 = vadd.f32 1.0, %v3332_v47  ;;  %3335 = vpow2.f32 %v3174_v4 }
 0x38a   :  { %v1835_v63 = vadd.f32 1.0, %v3334_v29 }
 0x38b   :  { %3337 = vrcp.f32 %v1816_v55  ;;  %v1828_v0 = vand.u32 2147483648, %v1816_v55  ;;  %v1826_v29 = vand.u32 2147483647, %v1816_v55  ;;  %vm1822_vm3 = vweird.f32 %v1816_v55 }
 0x38c   :  { %3339 = vrcp.f32 %v1835_v63  ;;  %v1847_v47 = vand.u32 2147483648, %v1835_v63  ;;  %v1845_v42 = vand.u32 2147483647, %v1835_v63  ;;  %vm1841_vm4 = vweird.f32 %v1835_v63 }
 0x38d   :  { %v1829_v49 = vor.u32 1.1754944e-38, %v1828_v0  ;;  %vm1827_vm7 = vcmp.eq.f32.partialorder %v1826_v29, 8.507059e+37 }
 0x38e   :  { %vm1846_vm8 = vcmp.eq.f32.partialorder %v1845_v42, 8.507059e+37 }
 0x38f   :  { %v3336_v23 = vpop.eup %3335 }
 0x390   :  { %v1855_v22 = vadd.f32 1.0, %v3336_v23 }
 0x391   :  { %v3338_v7 = vpop.eup %3337 }
 0x392   :  { %v3340_v44 = vpop.eup %3339  ;;  %v1818_v17 = vmul.f32 %v3338_v7, %v1816_v55  ;;  %3341 = vrcp.f32 %v1855_v22  ;;  %vm1823_vm1 = vweird.f32 %v3338_v7  ;;  %vm1861_vm10 = vweird.f32 %v1855_v22 }
 0x393   :  { %v1837_v35 = vmul.f32 %v3340_v44, %v1835_v63  ;;  %3343 = vtanh.f32 %v1811_v39  ;;  %vm1842_vm2 = vweird.f32 %v3340_v44  ;;  %vm1824_vm5 = vmor %vm1822_vm3, %vm1823_vm1 }
 0x394   :  { %v1819_v62 = vsub.f32 1.0, %v1818_v17  ;;  %v1872_v17 = vrot.slane %v5660_v57, 7  ;;  %vm1843_vm6 = vmor %vm1841_vm4, %vm1842_vm2 }
 0x395   :  { %v1838_v32 = vsub.f32 1.0, %v1837_v35  ;;  %v1848_v35 = vor.u32 1.1754944e-38, %v1847_v47 }
 0x396   :  { %v1820_v4 = vmul.f32 %v3338_v7, %v1819_v62 }
 0x397   :  { %v1839_v8 = vmul.f32 %v3340_v44, %v1838_v32 }
 0x398   :  { %v3342_v38 = vpop.eup %3341  ;;  %v1821_v23 = vadd.f32 %v3338_v7, %v1820_v4 }
 0x399   :  { %v1840_v13 = vadd.f32 %v3340_v44, %v1839_v8  ;;  %v1857_v24 = vmul.f32 %v3342_v38, %v1855_v22  ;;  %v3344_v62 = vpop.eup %3343  ;;  %vm1862_vm9 = vweird.f32 %v3342_v38 }
 0x39a   :  { %v1825_v39 = vsel %vm1824_vm5, %v3338_v7, %v1821_v23  ;;  %v1867_v7 = vand.u32 2147483648, %v1855_v22  ;;  %vm1863_vm11 = vmor %vm1861_vm10, %vm1862_vm9 }
 0x39b   :  { %v1830_v1 = vsel %vm1827_vm7, %v1829_v49, %v1825_v39  ;;  %v1844_v45 = vsel %vm1843_vm6, %v3340_v44, %v1840_v13  ;;  %v1858_v32 = vsub.f32 1.0, %v1857_v24 }
 0x39c   :  { %v1849_v19 = vsel %vm1846_vm8, %v1848_v35, %v1844_v45  ;;  %v1875_v9 = vmul.f32 %v3344_v62, %v1830_v1  ;;  %v1865_v45 = vand.u32 2147483647, %v1855_v22  ;;  %v1868_v13 = vor.u32 1.1754944e-38, %v1867_v7  ;;  %v6030_v7 = vld [vmem:[#allocation3 + $0x1a0] sm:$0xff] }
 0x39d   :  { %v1874_v4 = vmul.f32 %v1872_v17, %v1849_v19  ;;  %v1859_v55 = vmul.f32 %v3342_v38, %v1858_v32  ;;  %v6013_v32 = vld [vmem:[#allocation3 + $0x1e0] sm:$0xff] }
 0x39e   :  { %vm1866_vm12 = vcmp.eq.f32.partialorder %v1865_v45, 8.507059e+37 }
 0x39f   :  { %v6002_v0 = vadd.f32 %v1875_v9, %v1874_v4  ;;  %v1860_v57 = vadd.f32 %v3342_v38, %v1859_v55  ;;  %v6016_v4 = vld [vmem:[#allocation3 + $0x1e8] sm:$0xff] }
 0x3a1   :  { %3345 = vtanh.f32 %v6002_v0  ;;  %v1864_v24 = vsel %vm1863_vm11, %v3342_v38, %v1860_v57 }
 0x3a2   :  { %v1896_v63 = vpop.f32.mrf.mxu0  ;;  %v1916_v37 = vpop.f32.mrf.mxu1  ;;  %v1869_v42 = vsel %vm1866_vm12, %v1868_v13, %v1864_v24  ;;  %v6070_v13 = vld [vmem:[#allocation3 + $0x148] sm:$0xff] }
 0x3a3   :  { %v1963_v8 = vrot.slane %v1896_v63, 5  ;;  %v1964_v18 = vrot.slane %v1916_v37, 5  ;;  %v6022_v63 = vld [vmem:[#allocation3 + $0x1c0] sm:$0xff] }
 0x3a5   :  { %v1971_v47 = vadd.f32 %v1963_v8, %v4648_v6  ;;  %v1972_v44 = vadd.f32 %v1964_v18, %v7084_v36  ;;  %v6025_v8 = vld [vmem:[#allocation3 + $0x1c8] sm:$0xff] }
 0x3a7   :  { %v3175_v1 = vmul.f32 -1.442695, %v1971_v47  ;;  %v3176_v19 = vmul.f32 -1.442695, %v1972_v44  ;;  %v3346_v29 = vpop.eup %3345  ;;  %v6046_v44 = vld [vmem:[#allocation3 + $0x188] sm:$0xff] }
 0x3a8   :  { %v1878_v49 = vmul.f32 %v3346_v29, %v1869_v42 }
 0x3a9   :  { %3347 = vpow2.f32 %v3175_v1  ;;  %v1956_v9 = vpop.f32.mrf.mxu3  ;;  %v1936_v62 = vpop.f32.mrf.mxu2 }
 0x3aa   :  { %3349 = vpow2.f32 %v3176_v19  ;;  %v1966_v37 = vrot.slane %v1956_v9, 5  ;;  %v2042_v35 = vrot.slane %v1878_v49, 4  ;;  %v1965_v55 = vrot.slane %v1936_v62, 5  ;;  %v6061_v19 = vld [vmem:[#allocation3 + $0x168] sm:$0xff]  ;;  %v6104_v62 = vld [vmem:[#allocation3 + $0x100] sm:$0xff] }
 0x3ab   :  { %v6085_v49 = vld [vmem:[#allocation3 + $0x128] sm:$0xff] }
 0x3ac   :  { %v1974_v23 = vadd.f32 %v1966_v37, %v4682_v10  ;;  %2044 = vst [vmem:[#allocation2 + $0x4] sm:$0x1] %v2042_v35  ;;  %2065 = vmatmul.f32.vlgmr.msra.gmra.mxu0 %v2042_v35  ;;  %2085 = vmatmul.f32.vlgmr.msra.gmra.mxu1 %v2042_v35 }
 0x3ad   :  { %2105 = vmatmul.f32.vlgmr.msra.gmra.mxu2 %v2042_v35  ;;  %2125 = vmatmul.f32.vlgmr.msra.gmra.mxu3 %v2042_v35 }
 0x3ae   :  { %v3177_v17 = vmul.f32 -1.442695, %v1974_v23  ;;  %2381 = vmatpush.msra.mxu0 %v6013_v32  ;;  %2401 = vmatpush.msra.mxu1 %v6016_v4  ;;  %v6082_v23 = vld [vmem:[#allocation3 + $0x120] sm:$0xff] }
 0x3af   :  { %v3348_v18 = vpop.eup %3347  ;;  %2421 = vmatpush.msra.mxu2 %v5674_v54  ;;  %2441 = vmatpush.msra.mxu3 %v5677_v34  ;;  %v6033_v54 = vld [vmem:[#allocation3 + $0x1a8] sm:$0xff] }
 0x3b0   :  { %v3350_v39 = vpop.eup %3349  ;;  %v6008_v22 = vadd.f32 1.0, %v3348_v18  ;;  %3351 = vpow2.f32 %v3177_v17  ;;  %2382 = vmatpush.msra.mxu0 %v6022_v63  ;;  %2402 = vmatpush.msra.mxu1 %v6025_v8 }
 0x3b1   :  { %v6010_v38 = vadd.f32 1.0, %v3350_v39  ;;  %2422 = vmatpush.msra.mxu2 %v5682_v40  ;;  %2442 = vmatpush.msra.mxu3 %v5685_v30  ;;  %v1973_v40 = vadd.f32 %v1965_v55, %v4686_v26  ;;  %v6043_v30 = vld [vmem:[#allocation3 + $0x180] sm:$0xff] }
 0x3b2   :  { %3353 = vrcp.f32 %v6008_v22  ;;  %2383 = vmatpush.msra.mxu0 %v6030_v7  ;;  %2403 = vmatpush.msra.mxu1 %v6033_v54  ;;  %vm1984_vm15 = vweird.f32 %v6008_v22 }
 0x3b3   :  { %3355 = vrcp.f32 %v6010_v38  ;;  %2423 = vmatpush.msra.mxu2 %v5692_v2  ;;  %2443 = vmatpush.msra.mxu3 %v5695_v50  ;;  %v6058_v50 = vld [vmem:[#allocation3 + $0x160] sm:$0xff]  ;;  %v2009_v37 = vand.u32 2147483648, %v6010_v38  ;;  %v2007_v42 = vand.u32 2147483647, %v6010_v38  ;;  %vm2003_vm0 = vweird.f32 %v6010_v38 }
 0x3b4   :  { %2384 = vmatpush.msra.mxu0 %v6043_v30  ;;  %2404 = vmatpush.msra.mxu1 %v6046_v44 }
 0x3b5   :  { %2424 = vmatpush.msra.mxu2 %v5708_v27  ;;  %2444 = vmatpush.msra.mxu3 %v5711_v12  ;;  %v1990_v27 = vand.u32 2147483648, %v6008_v22  ;;  %v6067_v12 = vld [vmem:[#allocation3 + $0x140] sm:$0xff]  ;;  %vm2008_vm4 = vcmp.eq.f32.partialorder %v2007_v42, 8.507059e+37  ;;  %v6173_v42 = vld [vmem:[#allocation3 + $0x68] sm:$0xff] }
 0x3b6   :  { %v3352_v57 = vpop.eup %3351  ;;  %2385 = vmatpush.msra.mxu0 %v6058_v50  ;;  %2405 = vmatpush.msra.mxu1 %v6061_v19 }
 0x3b7   :  { %v6036_v34 = vadd.f32 1.0, %v3352_v57  ;;  %2425 = vmatpush.msra.mxu2 %v5718_v59  ;;  %2445 = vmatpush.msra.mxu3 %v5721_v25  ;;  %v1988_v59 = vand.u32 2147483647, %v6008_v22  ;;  %v1991_v35 = vor.u32 1.1754944e-38, %v1990_v27  ;;  %v6137_v27 = vld [vmem:[#allocation3 + $0xc8] sm:$0xff] }
 0x3b8   :  { %v6040_v47 = vpop.eup %3353  ;;  %2386 = vmatpush.msra.mxu0 %v6067_v12  ;;  %2406 = vmatpush.msra.mxu1 %v6070_v13 }
 0x3b9   :  { %v6049_v45 = vpop.eup %3355  ;;  %v1980_v1 = vmul.f32 %v6040_v47, %v6008_v22  ;;  %3357 = vrcp.f32 %v6036_v34  ;;  %vm1985_vm13 = vweird.f32 %v6040_v47  ;;  %2426 = vmatpush.msra.mxu2 %v5731_v51  ;;  %2446 = vmatpush.msra.mxu3 %v5734_v3  ;;  %vm1989_vm3 = vcmp.eq.f32.partialorder %v1988_v59, 8.507059e+37  ;;  %v6159_v59 = vld [vmem:[#allocation3 + $0x88] sm:$0xff] }
 0x3ba   :  { %v1999_v2 = vmul.f32 %v6049_v45, %v6010_v38  ;;  %3359 = vtanh.f32 %v1973_v40  ;;  %vm2004_vm14 = vweird.f32 %v6049_v45  ;;  %2387 = vmatpush.msra.mxu0 %v6082_v23  ;;  %2407 = vmatpush.msra.mxu1 %v6085_v49  ;;  %vm6097_vm1 = vmor %vm1984_vm15, %vm1985_vm13  ;;  %v2010_v38 = vor.u32 1.1754944e-38, %v2009_v37  ;;  %v7323_v22 = vld [vmem:[#allocation48_spill] sm:$0xff] }
 0x3bb   :  { %v1981_v24 = vsub.f32 1.0, %v1980_v1  ;;  %2427 = vmatpush.msra.mxu2 %v5746_v61  ;;  %2447 = vmatpush.msra.mxu3 %v5749_v53  ;;  %v6107_v61 = vld [vmem:[#allocation3 + $0x108] sm:$0xff]  ;;  %v2034_v53 = vrot.slane %v5800_v11, 1  ;;  %vm6113_vm2 = vmor %vm2003_vm0, %vm2004_vm14  ;;  %vm2023_vm6 = vweird.f32 %v6036_v34 }
 0x3bc   :  { %v2000_v9 = vsub.f32 1.0, %v1999_v2  ;;  %2388 = vmatpush.msra.mxu0 %v6104_v62  ;;  %2408 = vmatpush.msra.mxu1 %v6107_v61  ;;  %v6125_v2 = vld [vmem:[#allocation3 + $0xe0] sm:$0xff] }
 0x3bd   :  { %v1982_v29 = vmul.f32 %v6040_v47, %v1981_v24  ;;  %2428 = vmatpush.msra.mxu2 %v5774_v48  ;;  %2448 = vmatpush.msra.mxu3 %v5777_v31  ;;  %v6128_v24 = vld [vmem:[#allocation3 + $0xe8] sm:$0xff] }
 0x3be   :  { %v2001_v25 = vmul.f32 %v6049_v45, %v2000_v9  ;;  %2389 = vmatpush.msra.mxu0 %v6125_v2  ;;  %2409 = vmatpush.msra.mxu1 %v6128_v24 }
 0x3bf   :  { %v6088_v17 = vpop.eup %3357  ;;  %v1983_v51 = vadd.f32 %v6040_v47, %v1982_v29  ;;  %2429 = vmatpush.msra.mxu2 %v5785_v15  ;;  %2449 = vmatpush.msra.mxu3 %v5788_v52  ;;  %v6144_v15 = vld [vmem:[#allocation3 + $0xa0] sm:$0xff]  ;;  %v6147_v52 = vld [vmem:[#allocation3 + $0xa8] sm:$0xff] }
 0x3c0   :  { %v2002_v18 = vadd.f32 %v6049_v45, %v2001_v25  ;;  %v2019_v39 = vmul.f32 %v6088_v17, %v6036_v34  ;;  %v3360_v57 = vpop.eup %3359  ;;  %2410 = vmatpush.msra.mxu1 %v6137_v27  ;;  %vm2024_vm5 = vweird.f32 %v6088_v17  ;;  %v2027_v25 = vand.u32 2147483647, %v6036_v34 }
 0x3c1   :  { %v1987_v55 = vsel %vm6097_vm1, %v6040_v47, %v1983_v51  ;;  %2430 = vmatpush.msra.mxu2 %v5794_v41  ;;  %2450 = vmatpush.msra.mxu3 %v5797_v33  ;;  %v2029_v41 = vand.u32 2147483648, %v6036_v34  ;;  %v6156_v33 = vld [vmem:[#allocation3 + $0x80] sm:$0xff]  ;;  %vm6166_vm7 = vmor %vm2023_vm6, %vm2024_vm5  ;;  %v6184_v51 = vld [vmem:[#allocation3 + $0x48] sm:$0xff] }
 0x3c2   :  { %v1992_v40 = vsel %vm1989_vm3, %v1991_v35, %v1987_v55  ;;  %v2006_v11 = vsel %vm6113_vm2, %v6049_v45, %v2002_v18  ;;  %v2020_v1 = vsub.f32 1.0, %v2019_v39  ;;  %v6134_v45 = vld [vmem:[#allocation3 + $0xc0] sm:$0xff]  ;;  %2411 = vmatpush.msra.mxu1 %v6147_v52  ;;  %vm2028_vm8 = vcmp.eq.f32.partialorder %v2027_v25, 8.507059e+37  ;;  %v7319_v39 = vld [vmem:[#allocation57_spill] sm:$0xff]  ;;  %v7326_v55 = vld [vmem:[#allocation58_spill] sm:$0xff] }
 0x3c3   :  { %v2011_v47 = vsel %vm2008_vm4, %v2010_v38, %v2006_v11  ;;  %v2037_v48 = vmul.f32 %v3360_v57, %v1992_v40  ;;  %2390 = vmatpush.msra.mxu0 %v6134_v45  ;;  %2431 = vmatpush.msra.mxu2 %v5806_v21  ;;  %v6189_v35 = vld [vmem:[#allocation3 + $0x20] sm:$0xff]  ;;  %v6216_v38 = vld [vmem:[#allocation6 + $0x1c8] sm:$0xff]  ;;  %v7338_v21 = vld [vmem:[#allocation46_spill] sm:$0xff] }
 0x3c4   :  { %v2036_v31 = vmul.f32 %v2034_v53, %v2011_v47  ;;  %v2021_v9 = vmul.f32 %v6088_v17, %v2020_v1  ;;  %2451 = vmatpush.msra.mxu3 %v5809_v60  ;;  %2412 = vmatpush.msra.mxu1 %v6159_v59  ;;  %v6170_v60 = vld [vmem:[#allocation3 + $0x60] sm:$0xff]  ;;  %7325 = vst [vmem:[#allocation19_spill] sm:$0xff] %v6216_v38  ;;  %v6224_v11 = vld [vmem:[#allocation6 + $0x1a8] sm:$0xff]  ;;  %v7331_v47 = vld [vmem:[#allocation37_spill] sm:$0xff] }
 0x3c5   :  { %2391 = vmatpush.msra.mxu0 %v6144_v15  ;;  %2432 = vmatpush.msra.mxu2 %v5818_v56  ;;  %v2030_v56 = vor.u32 1.1754944e-38, %v2029_v41  ;;  %v6197_v18 = vld [vmem:[#allocation3] sm:$0xff]  ;;  %7329 = vst [vmem:[#allocation22_spill] sm:$0xff] %v6224_v11  ;;  %v7330_v1 = vld [vmem:[#allocation52_spill] sm:$0xff] }
 0x3c6   :  { %v6142_v37 = vadd.f32 %v2037_v48, %v2036_v31  ;;  %v2022_v29 = vadd.f32 %v6088_v17, %v2021_v9  ;;  %2452 = vmatpush.msra.mxu3 %v5821_v14  ;;  %2413 = vmatpush.msra.mxu1 %v6173_v42  ;;  %v6181_v14 = vld [vmem:[#allocation3 + $0x40] sm:$0xff]  ;;  %v6232_v31 = vld [vmem:[#allocation6 + $0x188] sm:$0xff]  ;;  %v7334_v9 = vld [vmem:[#allocation38_spill] sm:$0xff] }
 0x3c7   :  { %2392 = vmatpush.msra.mxu0 %v6156_v33  ;;  %2433 = vmatpush.msra.mxu2 %v5835_v16  ;;  %v6192_v16 = vld [vmem:[#allocation3 + $0x28] sm:$0xff]  ;;  %v7322_v53 = vld [vmem:[#allocation47_spill] sm:$0xff]  ;;  %7333 = vst [vmem:[#allocation16_spill] sm:$0xff] %v6232_v31 }
 0x3c8   :  { %3361 = vtanh.f32 %v6142_v37  ;;  %v2026_v34 = vsel %vm6166_vm7, %v6088_v17, %v2022_v29  ;;  %2453 = vmatpush.msra.mxu3 %v5838_v28  ;;  %2414 = vmatpush.msra.mxu1 %v6184_v51  ;;  %v7327_v57 = vld [vmem:[#allocation51_spill] sm:$0xff]  ;;  %v7335_v29 = vld [vmem:[#allocation45_spill] sm:$0xff]  ;;  %v6240_v25 = vld [vmem:[#allocation6 + $0x168] sm:$0xff] }
 0x3c9   :  { %2393 = vmatpush.msra.mxu0 %v6170_v60  ;;  %2434 = vmatpush.msra.mxu2 %v5843_v46  ;;  %v2031_v17 = vsel %vm2028_vm8, %v2030_v56, %v2026_v34  ;;  %v6200_v46 = vld [vmem:[#allocation3 + $0x8] sm:$0xff]  ;;  %v6221_v40 = vld [vmem:[#allocation6 + $0x1a0] sm:$0xff]  ;;  %7337 = vst [vmem:[#allocation26_spill] sm:$0xff] %v6240_v25  ;;  %v7339_v34 = vld [vmem:[#allocation50_spill] sm:$0xff] }
 0x3ca   :  { %2454 = vmatpush.msra.mxu3 %v5846_v5  ;;  %2415 = vmatpush.msra.mxu1 %v6192_v16  ;;  %7318 = vst [vmem:[#allocation54_spill] sm:$0xff] %v6200_v46  ;;  %v6229_v48 = vld [vmem:[#allocation6 + $0x180] sm:$0xff] }
 0x3cb   :  { %2394 = vmatpush.msra.mxu0 %v6181_v14  ;;  %2435 = vmatpush.msra.mxu2 %v5851_v58  ;;  %v6205_v58 = vld [vmem:[#allocation6 + $0x1e0] sm:$0xff]  ;;  %7328 = vst [vmem:[#allocation15_spill] sm:$0xff] %v6221_v40 }
 0x3cc   :  { %2455 = vmatpush.msra.mxu3 %v5854_v20  ;;  %2416 = vmatpush.msra.mxu1 %v6200_v46  ;;  %7320 = vst [vmem:[#allocation55_spill] sm:$0xff] %v6205_v58  ;;  %v6208_v20 = vld [vmem:[#allocation6 + $0x1e8] sm:$0xff]  ;;  %v6237_v41 = vld [vmem:[#allocation6 + $0x160] sm:$0xff] }
 0x3cd   :  { %2395 = vmatpush.msra.mxu0 %v6189_v35  ;;  %2436 = vmatpush.msra.mxu2 %v5859_v43  ;;  %7321 = vst [vmem:[#allocation82_spill] sm:$0xff] %v6208_v20  ;;  %v6213_v43 = vld [vmem:[#allocation6 + $0x1c0] sm:$0xff] }
 0x3ce   :  { %v3362_v3 = vpop.eup %3361  ;;  %2456 = vmatpush.msra.mxu3 %v7319_v39  ;;  %7324 = vst [vmem:[#allocation83_spill] sm:$0xff] %v6213_v43  ;;  %v6245_v56 = vld [vmem:[#allocation6 + $0x140] sm:$0xff]  ;;  %v6256_v39 = vld [vmem:[#allocation6 + $0x128] sm:$0xff] }
 0x3cf   :  { %v2040_v28 = vmul.f32 %v3362_v3, %v2031_v17  ;;  %2396 = vmatpush.msra.mxu0 %v6197_v18  ;;  %7332 = vst [vmem:[#allocation23_spill] sm:$0xff] %v6229_v48  ;;  %v6248_v3 = vld [vmem:[#allocation6 + $0x148] sm:$0xff]  ;;  %v7342_v17 = vld [vmem:[#allocation53_spill] sm:$0xff] }
 0x3d0   :  { %7336 = vst [vmem:[#allocation17_spill] sm:$0xff] %v6237_v41 }
 0x3d1   :  { %v2046_v5 = vrot.slane %v2040_v28, 3  ;;  %7340 = vst [vmem:[#allocation20_spill] sm:$0xff] %v6245_v56  ;;  %v7343_v28 = vld [vmem:[#allocation59_spill] sm:$0xff] }
 0x3d2   :  { %7341 = vst [vmem:[#allocation21_spill] sm:$0xff] %v6248_v3 }
 0x3d3   :  { %2048 = vst [vmem:[#allocation2 + $0xb] sm:$0x1] %v2046_v5  ;;  %2227 = vmatmul.f32.vlgmr.msrb.gmra.mxu0 %v2046_v5  ;;  %2247 = vmatmul.f32.vlgmr.msrb.gmra.mxu1 %v2046_v5 }
 0x3d4   :  { %2267 = vmatmul.f32.vlgmr.msrb.gmra.mxu2 %v2046_v5  ;;  %2287 = vmatmul.f32.vlgmr.msrb.gmra.mxu3 %v2046_v5  ;;  %v6253_v5 = vld [vmem:[#allocation6 + $0x120] sm:$0xff]  ;;  %7345 = vst [vmem:[#allocation30_spill] sm:$0xff] %v6256_v39 }
 0x3d5   :  { %2543 = vmatpush.msrb.mxu0 %v6205_v58  ;;  %2563 = vmatpush.msrb.mxu1 %v6208_v20  ;;  %7344 = vst [vmem:[#allocation29_spill] sm:$0xff] %v6253_v5 }
 0x3d6   :  { %2583 = vmatpush.msrb.mxu2 %v7322_v53  ;;  %2603 = vmatpush.msrb.mxu3 %v7323_v22  ;;  %v7346_v53 = vld [vmem:[#allocation60_spill] sm:$0xff]  ;;  %v7347_v22 = vld [vmem:[#allocation61_spill] sm:$0xff] }
 0x3d7   :  { %2544 = vmatpush.msrb.mxu0 %v6213_v43  ;;  %2564 = vmatpush.msrb.mxu1 %v6216_v38 }
 0x3d8   :  { %2584 = vmatpush.msrb.mxu2 %v7326_v55  ;;  %2604 = vmatpush.msrb.mxu3 %v7327_v57  ;;  %v6261_v55 = vld [vmem:[#allocation6 + $0x100] sm:$0xff]  ;;  %v6264_v57 = vld [vmem:[#allocation6 + $0x108] sm:$0xff] }
 0x3d9   :  { %2545 = vmatpush.msrb.mxu0 %v6221_v40  ;;  %2565 = vmatpush.msrb.mxu1 %v6224_v11  ;;  %7348 = vst [vmem:[#allocation24_spill] sm:$0xff] %v6261_v55 }
 0x3da   :  { %2585 = vmatpush.msrb.mxu2 %v7330_v1  ;;  %2605 = vmatpush.msrb.mxu3 %v7331_v47  ;;  %7349 = vst [vmem:[#allocation25_spill] sm:$0xff] %v6264_v57  ;;  %v7350_v1 = vld [vmem:[#allocation62_spill] sm:$0xff]  ;;  %v7351_v47 = vld [vmem:[#allocation63_spill] sm:$0xff] }
 0x3db   :  { %2546 = vmatpush.msrb.mxu0 %v6229_v48  ;;  %2566 = vmatpush.msrb.mxu1 %v6232_v31 }
 0x3dc   :  { %2586 = vmatpush.msrb.mxu2 %v7334_v9  ;;  %2606 = vmatpush.msrb.mxu3 %v7335_v29  ;;  %v6269_v9 = vld [vmem:[#allocation6 + $0xe0] sm:$0xff]  ;;  %v6272_v29 = vld [vmem:[#allocation6 + $0xe8] sm:$0xff] }
 0x3dd   :  { %2547 = vmatpush.msrb.mxu0 %v6237_v41  ;;  %2567 = vmatpush.msrb.mxu1 %v6240_v25  ;;  %7352 = vst [vmem:[#allocation33_spill] sm:$0xff] %v6269_v9 }
 0x3de   :  { %2587 = vmatpush.msrb.mxu2 %v7338_v21  ;;  %2607 = vmatpush.msrb.mxu3 %v7339_v34  ;;  %7353 = vst [vmem:[#allocation34_spill] sm:$0xff] %v6272_v29  ;;  %v7354_v21 = vld [vmem:[#allocation64_spill] sm:$0xff]  ;;  %v7355_v34 = vld [vmem:[#allocation65_spill] sm:$0xff] }
 0x3df   :  { %2548 = vmatpush.msrb.mxu0 %v6245_v56  ;;  %2568 = vmatpush.msrb.mxu1 %v6248_v3  ;;  %v7386_v56 = vld [vmem:[#allocation18_spill] sm:$0xff] }
 0x3e0   :  { %2588 = vmatpush.msrb.mxu2 %v7342_v17  ;;  %2608 = vmatpush.msrb.mxu3 %v7343_v28  ;;  %v6277_v17 = vld [vmem:[#allocation6 + $0xc0] sm:$0xff]  ;;  %v6280_v28 = vld [vmem:[#allocation6 + $0xc8] sm:$0xff] }
 0x3e1   :  { %2549 = vmatpush.msrb.mxu0 %v6253_v5  ;;  %2569 = vmatpush.msrb.mxu1 %v6256_v39  ;;  %7356 = vst [vmem:[#allocation27_spill] sm:$0xff] %v6277_v17  ;;  %v7385_v5 = vld [vmem:[#allocation13_spill] sm:$0xff] }
 0x3e2   :  { %2589 = vmatpush.msrb.mxu2 %v7346_v53  ;;  %2609 = vmatpush.msrb.mxu3 %v7347_v22  ;;  %7357 = vst [vmem:[#allocation28_spill] sm:$0xff] %v6280_v28  ;;  %v7358_v53 = vld [vmem:[#allocation66_spill] sm:$0xff]  ;;  %v7359_v22 = vld [vmem:[#allocation67_spill] sm:$0xff] }
 0x3e3   :  { %2550 = vmatpush.msrb.mxu0 %v6261_v55  ;;  %2570 = vmatpush.msrb.mxu1 %v6264_v57  ;;  %v7384_v55 = vld [vmem:[#allocation12_spill] sm:$0xff] }
 0x3e4   :  { %2590 = vmatpush.msrb.mxu2 %v7350_v1  ;;  %2610 = vmatpush.msrb.mxu3 %v7351_v47  ;;  %v6285_v1 = vld [vmem:[#allocation6 + $0xa0] sm:$0xff]  ;;  %v6288_v47 = vld [vmem:[#allocation6 + $0xa8] sm:$0xff] }
 0x3e5   :  { %2551 = vmatpush.msrb.mxu0 %v6269_v9  ;;  %2571 = vmatpush.msrb.mxu1 %v6272_v29  ;;  %7360 = vst [vmem:[#allocation31_spill] sm:$0xff] %v6285_v1  ;;  %v7381_v29 = vld [vmem:[#allocation79_spill] sm:$0xff] }
 0x3e6   :  { %2591 = vmatpush.msrb.mxu2 %v7354_v21  ;;  %2611 = vmatpush.msrb.mxu3 %v7355_v34  ;;  %7361 = vst [vmem:[#allocation32_spill] sm:$0xff] %v6288_v47  ;;  %v7362_v21 = vld [vmem:[#allocation68_spill] sm:$0xff]  ;;  %v7363_v34 = vld [vmem:[#allocation69_spill] sm:$0xff] }
 0x3e7   :  { %2552 = vmatpush.msrb.mxu0 %v6277_v17  ;;  %2572 = vmatpush.msrb.mxu1 %v6280_v28  ;;  %v6293_v17 = vld [vmem:[#allocation6 + $0x80] sm:$0xff]  ;;  %v6296_v28 = vld [vmem:[#allocation6 + $0x88] sm:$0xff] }
 0x3e8   :  { %2592 = vmatpush.msrb.mxu2 %v7358_v53  ;;  %2612 = vmatpush.msrb.mxu3 %v7359_v22  ;;  %7364 = vst [vmem:[#allocation41_spill] sm:$0xff] %v6293_v17  ;;  %v7366_v53 = vld [vmem:[#allocation70_spill] sm:$0xff]  ;;  %v7367_v22 = vld [vmem:[#allocation71_spill] sm:$0xff] }
 0x3e9   :  { %2553 = vmatpush.msrb.mxu0 %v6285_v1  ;;  %2573 = vmatpush.msrb.mxu1 %v6288_v47  ;;  %7365 = vst [vmem:[#allocation42_spill] sm:$0xff] %v6296_v28  ;;  %v6301_v1 = vld [vmem:[#allocation6 + $0x60] sm:$0xff]  ;;  %v6304_v47 = vld [vmem:[#allocation6 + $0x68] sm:$0xff] }
 0x3ea   :  { %2593 = vmatpush.msrb.mxu2 %v7362_v21  ;;  %2613 = vmatpush.msrb.mxu3 %v7363_v34  ;;  %7368 = vst [vmem:[#allocation35_spill] sm:$0xff] %v6301_v1  ;;  %v7370_v21 = vld [vmem:[#allocation72_spill] sm:$0xff]  ;;  %v7371_v34 = vld [vmem:[#allocation73_spill] sm:$0xff] }
 0x3eb   :  { %2554 = vmatpush.msrb.mxu0 %v6293_v17  ;;  %2574 = vmatpush.msrb.mxu1 %v6296_v28  ;;  %7369 = vst [vmem:[#allocation36_spill] sm:$0xff] %v6304_v47  ;;  %v6309_v17 = vld [vmem:[#allocation6 + $0x40] sm:$0xff]  ;;  %v6312_v28 = vld [vmem:[#allocation6 + $0x48] sm:$0xff] }
 0x3ec   :  { %2594 = vmatpush.msrb.mxu2 %v7366_v53  ;;  %2614 = vmatpush.msrb.mxu3 %v7367_v22  ;;  %7372 = vst [vmem:[#allocation39_spill] sm:$0xff] %v6309_v17  ;;  %v7374_v53 = vld [vmem:[#allocation74_spill] sm:$0xff]  ;;  %v7375_v22 = vld [vmem:[#allocation75_spill] sm:$0xff] }
 0x3ed   :  { %2555 = vmatpush.msrb.mxu0 %v6301_v1  ;;  %2575 = vmatpush.msrb.mxu1 %v6304_v47  ;;  %7373 = vst [vmem:[#allocation40_spill] sm:$0xff] %v6312_v28  ;;  %v6317_v1 = vld [vmem:[#allocation6 + $0x20] sm:$0xff]  ;;  %v6320_v47 = vld [vmem:[#allocation6 + $0x28] sm:$0xff] }
 0x3ee   :  { %2595 = vmatpush.msrb.mxu2 %v7370_v21  ;;  %2615 = vmatpush.msrb.mxu3 %v7371_v34  ;;  %7376 = vst [vmem:[#allocation49_spill] sm:$0xff] %v6317_v1  ;;  %v7378_v21 = vld [vmem:[#allocation76_spill] sm:$0xff]  ;;  %v7379_v34 = vld [vmem:[#allocation77_spill] sm:$0xff] }
 0x3ef   :  { %2556 = vmatpush.msrb.mxu0 %v6309_v17  ;;  %2576 = vmatpush.msrb.mxu1 %v6312_v28  ;;  %7377 = vst [vmem:[#allocation43_spill] sm:$0xff] %v6320_v47  ;;  %v7380_v17 = vld [vmem:[#allocation78_spill] sm:$0xff]  ;;  %v7382_v28 = vld [vmem:[#allocation80_spill] sm:$0xff] }
 0x3f0   :  { %2596 = vmatpush.msrb.mxu2 %v7374_v53  ;;  %2616 = vmatpush.msrb.mxu3 %v7375_v22  ;;  %v7383_v53 = vld [vmem:[#allocation81_spill] sm:$0xff] }
 0x3f1   :  { %2557 = vmatpush.msrb.mxu0 %v6317_v1  ;;  %2577 = vmatpush.msrb.mxu1 %v6320_v47 }
 0x3f2   :  { %2597 = vmatpush.msrb.mxu2 %v7378_v21  ;;  %2617 = vmatpush.msrb.mxu3 %v7379_v34 }
 0x3f3   :  { %2558 = vmatpush.msrb.mxu0 %v7380_v17  ;;  %2578 = vmatpush.msrb.mxu1 %v7381_v29 }
 0x3f4   :  { %2598 = vmatpush.msrb.mxu2 %v7382_v28  ;;  %2618 = vmatpush.msrb.mxu3 %v7383_v53 }
 0x429   :  { %v2066_v22 = vpop.f32.mrf.mxu0  ;;  %v2086_v9 = vpop.f32.mrf.mxu1 }
 0x42a   :  { %v2133_v57 = vrot.slane %v2066_v22, 3  ;;  %v2134_v1 = vrot.slane %v2086_v9, 3 }
 0x42c   :  { %v2141_v39 = vadd.f32 %v2133_v57, %v7384_v55  ;;  %v2142_v47 = vadd.f32 %v2134_v1, %v7385_v5 }
 0x42e   :  { %v3178_v3 = vmul.f32 -1.442695, %v2141_v39  ;;  %v3179_v21 = vmul.f32 -1.442695, %v2142_v47  ;;  %v7387_v47 = vld [vmem:[#allocation14_spill] sm:$0xff] }
 0x430   :  { %3363 = vpow2.f32 %v3178_v3  ;;  %v2126_v34 = vpop.f32.mrf.mxu3  ;;  %v2106_v22 = vpop.f32.mrf.mxu2 }
 0x431   :  { %3365 = vpow2.f32 %v3179_v21  ;;  %v2136_v17 = vrot.slane %v2126_v34, 3  ;;  %v2135_v57 = vrot.slane %v2106_v22, 3 }
 0x433   :  { %v2144_v29 = vadd.f32 %v2136_v17, %v7386_v56  ;;  %v2143_v3 = vadd.f32 %v2135_v57, %v7387_v47 }
 0x435   :  { %v3180_v25 = vmul.f32 -1.442695, %v2144_v29 }
 0x436   :  { %v3364_v28 = vpop.eup %3363 }
 0x437   :  { %v3366_v41 = vpop.eup %3365  ;;  %v2148_v53 = vadd.f32 1.0, %v3364_v28  ;;  %3367 = vpow2.f32 %v3180_v25 }
 0x438   :  { %v2167_v31 = vadd.f32 1.0, %v3366_v41 }
 0x439   :  { %3369 = vrcp.f32 %v2148_v53  ;;  %v2160_v56 = vand.u32 2147483648, %v2148_v53  ;;  %v2158_v41 = vand.u32 2147483647, %v2148_v53  ;;  %vm2154_vm11 = vweird.f32 %v2148_v53 }
 0x43a   :  { %3371 = vrcp.f32 %v2167_v31  ;;  %v2179_v28 = vand.u32 2147483648, %v2167_v31  ;;  %v2177_v22 = vand.u32 2147483647, %v2167_v31  ;;  %vm2173_vm12 = vweird.f32 %v2167_v31 }
 0x43b   :  { %v2161_v57 = vor.u32 1.1754944e-38, %v2160_v56  ;;  %vm2159_vm15 = vcmp.eq.f32.partialorder %v2158_v41, 8.507059e+37 }
 0x43c   :  { %vm2178_vm0 = vcmp.eq.f32.partialorder %v2177_v22, 8.507059e+37 }
 0x43d   :  { %v3368_v9 = vpop.eup %3367 }
 0x43e   :  { %v2187_v1 = vadd.f32 1.0, %v3368_v9 }
 0x43f   :  { %v3370_v39 = vpop.eup %3369 }
 0x440   :  { %v3372_v5 = vpop.eup %3371  ;;  %v2150_v21 = vmul.f32 %v3370_v39, %v2148_v53  ;;  %3373 = vrcp.f32 %v2187_v1  ;;  %vm2155_vm9 = vweird.f32 %v3370_v39  ;;  %vm2193_vm2 = vweird.f32 %v2187_v1 }
 0x441   :  { %v2169_v34 = vmul.f32 %v3372_v5, %v2167_v31  ;;  %3375 = vtanh.f32 %v2143_v3  ;;  %vm2174_vm10 = vweird.f32 %v3372_v5  ;;  %vm2156_vm13 = vmor %vm2154_vm11, %vm2155_vm9 }
 0x442   :  { %v2151_v17 = vsub.f32 1.0, %v2150_v21  ;;  %v2204_v21 = vrot.slane %v6002_v0, 7  ;;  %vm2175_vm14 = vmor %vm2173_vm12, %vm2174_vm10 }
 0x443   :  { %v2170_v29 = vsub.f32 1.0, %v2169_v34  ;;  %v2180_v34 = vor.u32 1.1754944e-38, %v2179_v28 }
 0x444   :  { %v2152_v25 = vmul.f32 %v3370_v39, %v2151_v17 }
 0x445   :  { %v2171_v55 = vmul.f32 %v3372_v5, %v2170_v29 }
 0x446   :  { %v3374_v48 = vpop.eup %3373  ;;  %v2153_v9 = vadd.f32 %v3370_v39, %v2152_v25 }
 0x447   :  { %v2172_v47 = vadd.f32 %v3372_v5, %v2171_v55  ;;  %v2189_v11 = vmul.f32 %v3374_v48, %v2187_v1  ;;  %v3376_v17 = vpop.eup %3375  ;;  %vm2194_vm1 = vweird.f32 %v3374_v48 }
 0x448   :  { %v2157_v3 = vsel %vm2156_vm13, %v3370_v39, %v2153_v9  ;;  %v2199_v39 = vand.u32 2147483648, %v2187_v1  ;;  %vm2195_vm3 = vmor %vm2193_vm2, %vm2194_vm1 }
 0x449   :  { %v2162_v40 = vsel %vm2159_vm15, %v2161_v57, %v2157_v3  ;;  %v2176_v38 = vsel %vm2175_vm14, %v3372_v5, %v2172_v47  ;;  %v2190_v29 = vsub.f32 1.0, %v2189_v11 }
 0x44a   :  { %v2181_v43 = vsel %vm2178_vm0, %v2180_v34, %v2176_v38  ;;  %v2207_v20 = vmul.f32 %v3376_v17, %v2162_v40  ;;  %v2197_v38 = vand.u32 2147483647, %v2187_v1  ;;  %v2200_v47 = vor.u32 1.1754944e-38, %v2199_v39  ;;  %v3786_v39 = vld [vmem:[#allocation3 + $0x1b8] sm:$0xff] }
 0x44b   :  { %v2206_v25 = vmul.f32 %v2204_v21, %v2181_v43  ;;  %v2191_v53 = vmul.f32 %v3374_v48, %v2190_v29  ;;  %v3781_v29 = vld [vmem:[#allocation3 + $0x1f0] sm:$0xff] }
 0x44c   :  { %vm2198_vm4 = vcmp.eq.f32.partialorder %v2197_v38, 8.507059e+37 }
 0x44d   :  { %v6334_v56 = vadd.f32 %v2207_v20, %v2206_v25  ;;  %v2192_v0 = vadd.f32 %v3374_v48, %v2191_v53  ;;  %v3782_v25 = vld [vmem:[#allocation3 + $0x1f8] sm:$0xff] }
 0x44f   :  { %3377 = vtanh.f32 %v6334_v56  ;;  %v2196_v11 = vsel %vm2195_vm3, %v3374_v48, %v2192_v0 }
 0x450   :  { %v2228_v31 = vpop.f32.mrf.mxu0  ;;  %v2248_v58 = vpop.f32.mrf.mxu1  ;;  %v2201_v22 = vsel %vm2198_vm4, %v2200_v47, %v2196_v11 }
 0x451   :  { %v2295_v55 = vrot.slane %v2228_v31, 6  ;;  %v2296_v46 = vrot.slane %v2248_v58, 6  ;;  %v3783_v31 = vld [vmem:[#allocation3 + $0x1d0] sm:$0xff] }
 0x453   :  { %v2303_v28 = vadd.f32 %v2295_v55, %v4648_v6  ;;  %v2304_v5 = vadd.f32 %v2296_v46, %v7084_v36  ;;  %v3784_v55 = vld [vmem:[#allocation3 + $0x1d8] sm:$0xff] }
 0x455   :  { %v3181_v40 = vmul.f32 -1.442695, %v2303_v28  ;;  %v3182_v43 = vmul.f32 -1.442695, %v2304_v5  ;;  %v3378_v41 = vpop.eup %3377  ;;  %v3788_v5 = vld [vmem:[#allocation3 + $0x198] sm:$0xff] }
 0x456   :  { %v2210_v57 = vmul.f32 %v3378_v41, %v2201_v22 }
 0x457   :  { %3379 = vpow2.f32 %v3181_v40  ;;  %v2288_v20 = vpop.f32.mrf.mxu3  ;;  %v2268_v17 = vpop.f32.mrf.mxu2  ;;  %v3790_v40 = vld [vmem:[#allocation3 + $0x178] sm:$0xff] }
 0x458   :  { %3381 = vpow2.f32 %v3182_v43  ;;  %v2298_v58 = vrot.slane %v2288_v20, 6  ;;  %v2374_v34 = vrot.slane %v2210_v57, 5  ;;  %v2297_v53 = vrot.slane %v2268_v17, 6  ;;  %v3794_v57 = vld [vmem:[#allocation3 + $0x138] sm:$0xff]  ;;  %v3795_v17 = vld [vmem:[#allocation3 + $0x110] sm:$0xff] }
 0x45a   :  { %v2306_v9 = vadd.f32 %v2298_v58, %v4682_v10  ;;  %2376 = vst [vmem:[#allocation2 + $0x5] sm:$0x1] %v2374_v34  ;;  %2397 = vmatmul.f32.vlgmr.msra.gmra.mxu0 %v2374_v34  ;;  %2417 = vmatmul.f32.vlgmr.msra.gmra.mxu1 %v2374_v34  ;;  %v3792_v58 = vld [vmem:[#allocation3 + $0x158] sm:$0xff] }
 0x45b   :  { %2437 = vmatmul.f32.vlgmr.msra.gmra.mxu2 %v2374_v34  ;;  %2457 = vmatmul.f32.vlgmr.msra.gmra.mxu3 %v2374_v34 }
 0x45c   :  { %v3183_v21 = vmul.f32 -1.442695, %v2306_v9  ;;  %2713 = vmatpush.msra.mxu0 %v6013_v32  ;;  %2733 = vmatpush.msra.mxu1 %v6016_v4  ;;  %v3785_v4 = vld [vmem:[#allocation3 + $0x1b0] sm:$0xff] }
 0x45d   :  { %v3380_v46 = vpop.eup %3379  ;;  %2753 = vmatpush.msra.mxu2 %v3781_v29  ;;  %2773 = vmatpush.msra.mxu3 %v3782_v25  ;;  %v3793_v9 = vld [vmem:[#allocation3 + $0x130] sm:$0xff]  ;;  %v3796_v29 = vld [vmem:[#allocation3 + $0x118] sm:$0xff] }
 0x45e   :  { %v3382_v3 = vpop.eup %3381  ;;  %v6340_v1 = vadd.f32 1.0, %v3380_v46  ;;  %3383 = vpow2.f32 %v3183_v21  ;;  %2714 = vmatpush.msra.mxu0 %v6022_v63  ;;  %2734 = vmatpush.msra.mxu1 %v6025_v8  ;;  %v2305_v63 = vadd.f32 %v2297_v53, %v4686_v26  ;;  %v2366_v46 = vrot.slane %v6142_v37, 1  ;;  %v7402_v21 = vld [vmem:[#allocation16_spill] sm:$0xff] }
 0x45f   :  { %v6342_v48 = vadd.f32 1.0, %v3382_v3  ;;  %2754 = vmatpush.msra.mxu2 %v3783_v31  ;;  %2774 = vmatpush.msra.mxu3 %v3784_v55  ;;  %v3797_v55 = vld [vmem:[#allocation3 + $0xf0] sm:$0xff] }
 0x460   :  { %3385 = vrcp.f32 %v6340_v1  ;;  %2715 = vmatpush.msra.mxu0 %v6030_v7  ;;  %2735 = vmatpush.msra.mxu1 %v6033_v54  ;;  %v3787_v54 = vld [vmem:[#allocation3 + $0x190] sm:$0xff]  ;;  %v2322_v11 = vand.u32 2147483648, %v6340_v1  ;;  %vm2316_vm7 = vweird.f32 %v6340_v1 }
 0x461   :  { %3387 = vrcp.f32 %v6342_v48  ;;  %2755 = vmatpush.msra.mxu2 %v3785_v4  ;;  %2775 = vmatpush.msra.mxu3 %v3786_v39  ;;  %v2341_v20 = vand.u32 2147483648, %v6342_v48  ;;  %vm2335_vm8 = vweird.f32 %v6342_v48  ;;  %v3821_v3 = vld [vmem:[#allocation6 + $0x170] sm:$0xff] }
 0x462   :  { %2716 = vmatpush.msra.mxu0 %v6043_v30  ;;  %2736 = vmatpush.msra.mxu1 %v6046_v44  ;;  %v3789_v44 = vld [vmem:[#allocation3 + $0x170] sm:$0xff] }
 0x463   :  { %2756 = vmatpush.msra.mxu2 %v3787_v54  ;;  %2776 = vmatpush.msra.mxu3 %v3788_v5  ;;  %v3833_v54 = vld [vmem:[#allocation6 + $0xb0] sm:$0xff] }
 0x464   :  { %v3384_v0 = vpop.eup %3383  ;;  %2717 = vmatpush.msra.mxu0 %v6058_v50  ;;  %2737 = vmatpush.msra.mxu1 %v6061_v19  ;;  %v2320_v50 = vand.u32 2147483647, %v6340_v1  ;;  %v3791_v19 = vld [vmem:[#allocation3 + $0x150] sm:$0xff] }
 0x465   :  { %v6352_v32 = vadd.f32 1.0, %v3384_v0  ;;  %2757 = vmatpush.msra.mxu2 %v3789_v44  ;;  %2777 = vmatpush.msra.mxu3 %v3790_v40  ;;  %v3798_v0 = vld [vmem:[#allocation3 + $0xf8] sm:$0xff]  ;;  %v3809_v40 = vld [vmem:[#allocation3 + $0x30] sm:$0xff] }
 0x466   :  { %v6354_v28 = vpop.eup %3385  ;;  %2718 = vmatpush.msra.mxu0 %v6067_v12  ;;  %2738 = vmatpush.msra.mxu1 %v6070_v13  ;;  %v2339_v12 = vand.u32 2147483647, %v6342_v48  ;;  %vm2321_vm11 = vcmp.eq.f32.partialorder %v2320_v50, 8.507059e+37  ;;  %v3814_v50 = vld [vmem:[#allocation6 + $0x1f8] sm:$0xff] }
 0x467   :  { %v6359_v8 = vpop.eup %3387  ;;  %v2312_v7 = vmul.f32 %v6354_v28, %v6340_v1  ;;  %3389 = vrcp.f32 %v6352_v32  ;;  %vm2317_vm5 = vweird.f32 %v6354_v28  ;;  %2758 = vmatpush.msra.mxu2 %v3791_v19  ;;  %2778 = vmatpush.msra.mxu3 %v3792_v58  ;;  %v2342_v1 = vor.u32 1.1754944e-38, %v2341_v20  ;;  %v3812_v20 = vld [vmem:[#allocation3 + $0x18] sm:$0xff]  ;;  %v7398_v19 = vld [vmem:[#allocation19_spill] sm:$0xff]  ;;  %v3815_v58 = vld [vmem:[#allocation6 + $0x1d0] sm:$0xff] }
 0x468   :  { %v2331_v38 = vmul.f32 %v6359_v8, %v6342_v48  ;;  %3391 = vtanh.f32 %v2305_v63  ;;  %vm2336_vm6 = vweird.f32 %v6359_v8  ;;  %2719 = vmatpush.msra.mxu0 %v6082_v23  ;;  %2739 = vmatpush.msra.mxu1 %v6085_v49  ;;  %vm6387_vm9 = vmor %vm2316_vm7, %vm2317_vm5  ;;  %v2323_v23 = vor.u32 1.1754944e-38, %v2322_v11  ;;  %v3800_v63 = vld [vmem:[#allocation3 + $0xd8] sm:$0xff]  ;;  %v3811_v11 = vld [vmem:[#allocation3 + $0x10] sm:$0xff] }
 0x469   :  { %v2313_v30 = vsub.f32 1.0, %v2312_v7  ;;  %2759 = vmatpush.msra.mxu2 %v3793_v9  ;;  %2779 = vmatpush.msra.mxu3 %v3794_v57  ;;  %vm6399_vm10 = vmor %vm2335_vm8, %vm2336_vm6  ;;  %vm2340_vm12 = vcmp.eq.f32.partialorder %v2339_v12, 8.507059e+37  ;;  %v3802_v7 = vld [vmem:[#allocation3 + $0xb8] sm:$0xff]  ;;  %vm2355_vm14 = vweird.f32 %v6352_v32  ;;  %v7399_v12 = vld [vmem:[#allocation15_spill] sm:$0xff] }
 0x46a   :  { %v2332_v43 = vsub.f32 1.0, %v2331_v38  ;;  %2720 = vmatpush.msra.mxu0 %v6104_v62  ;;  %2740 = vmatpush.msra.mxu1 %v6107_v61  ;;  %v3807_v38 = vld [vmem:[#allocation3 + $0x50] sm:$0xff]  ;;  %v3818_v9 = vld [vmem:[#allocation6 + $0x1b8] sm:$0xff]  ;;  %v7401_v57 = vld [vmem:[#allocation23_spill] sm:$0xff] }
 0x46b   :  { %v2314_v47 = vmul.f32 %v6354_v28, %v2313_v30  ;;  %2760 = vmatpush.msra.mxu2 %v3795_v17  ;;  %2780 = vmatpush.msra.mxu3 %v3796_v29  ;;  %v3808_v30 = vld [vmem:[#allocation3 + $0x58] sm:$0xff]  ;;  %v7406_v17 = vld [vmem:[#allocation21_spill] sm:$0xff] }
 0x46c   :  { %v2333_v41 = vmul.f32 %v6359_v8, %v2332_v43  ;;  %2721 = vmatpush.msra.mxu0 %v6125_v2  ;;  %2741 = vmatpush.msra.mxu1 %v6128_v24  ;;  %v3810_v43 = vld [vmem:[#allocation3 + $0x38] sm:$0xff]  ;;  %v3823_v29 = vld [vmem:[#allocation6 + $0x150] sm:$0xff] }
 0x46d   :  { %v6380_v13 = vpop.eup %3389  ;;  %v2315_v22 = vadd.f32 %v6354_v28, %v2314_v47  ;;  %2761 = vmatpush.msra.mxu2 %v3797_v55  ;;  %2781 = vmatpush.msra.mxu3 %v3798_v0  ;;  %v3813_v47 = vld [vmem:[#allocation6 + $0x1f0] sm:$0xff] }
 0x46e   :  { %v2334_v49 = vadd.f32 %v6359_v8, %v2333_v41  ;;  %v2351_v34 = vmul.f32 %v6380_v13, %v6352_v32  ;;  %v3392_v62 = vpop.eup %3391  ;;  %2722 = vmatpush.msra.mxu0 %v6134_v45  ;;  %2742 = vmatpush.msra.mxu1 %v6137_v27  ;;  %vm2356_vm13 = vweird.f32 %v6380_v13  ;;  %v2361_v45 = vand.u32 2147483648, %v6352_v32  ;;  %v3816_v41 = vld [vmem:[#allocation6 + $0x1d8] sm:$0xff]  ;;  %v7410_v55 = vld [vmem:[#allocation25_spill] sm:$0xff] }
 0x46f   :  { %v2319_v48 = vsel %vm6387_vm9, %v6354_v28, %v2315_v22  ;;  %v3799_v28 = vld [vmem:[#allocation3 + $0xd0] sm:$0xff]  ;;  %2782 = vmatpush.msra.mxu3 %v3800_v63  ;;  %v2359_v27 = vand.u32 2147483647, %v6352_v32  ;;  %vm6428_vm15 = vmor %vm2355_vm14, %vm2356_vm13  ;;  %v3806_v32 = vld [vmem:[#allocation3 + $0x78] sm:$0xff] }
 0x470   :  { %v2324_v61 = vsel %vm2321_vm11, %v2323_v23, %v2319_v48  ;;  %v2338_v37 = vsel %vm6399_vm10, %v6359_v8, %v2334_v49  ;;  %v2352_v25 = vsub.f32 1.0, %v2351_v34  ;;  %2762 = vmatpush.msra.mxu2 %v3799_v28  ;;  %2723 = vmatpush.msra.mxu0 %v6144_v15  ;;  %v3801_v8 = vld [vmem:[#allocation3 + $0xb0] sm:$0xff]  ;;  %v2362_v5 = vor.u32 1.1754944e-38, %v2361_v45  ;;  %v3820_v49 = vld [vmem:[#allocation6 + $0x198] sm:$0xff]  ;;  %v7405_v48 = vld [vmem:[#allocation20_spill] sm:$0xff] }
 0x471   :  { %v2343_v53 = vsel %vm2340_vm12, %v2342_v1, %v2338_v37  ;;  %v2369_v31 = vmul.f32 %v3392_v62, %v2324_v61  ;;  %2743 = vmatpush.msra.mxu1 %v6147_v52  ;;  %2783 = vmatpush.msra.mxu3 %v3802_v7  ;;  %v3803_v15 = vld [vmem:[#allocation3 + $0x90] sm:$0xff]  ;;  %v3804_v52 = vld [vmem:[#allocation3 + $0x98] sm:$0xff]  ;;  %vm2360_vm0 = vcmp.eq.f32.partialorder %v2359_v27, 8.507059e+37  ;;  %v7414_v7 = vld [vmem:[#allocation28_spill] sm:$0xff] }
 0x472   :  { %v2368_v4 = vmul.f32 %v2366_v46, %v2343_v53  ;;  %v2353_v39 = vmul.f32 %v6380_v13, %v2352_v25  ;;  %2763 = vmatpush.msra.mxu2 %v3801_v8  ;;  %2724 = vmatpush.msra.mxu0 %v6156_v33  ;;  %v3817_v22 = vld [vmem:[#allocation6 + $0x1b0] sm:$0xff]  ;;  %v7404_v46 = vld [vmem:[#allocation26_spill] sm:$0xff]  ;;  %v7413_v8 = vld [vmem:[#allocation27_spill] sm:$0xff] }
 0x473   :  { %2744 = vmatpush.msra.mxu1 %v6159_v59  ;;  %2784 = vmatpush.msra.mxu3 %v3804_v52  ;;  %v3805_v59 = vld [vmem:[#allocation3 + $0x70] sm:$0xff]  ;;  %v3822_v1 = vld [vmem:[#allocation6 + $0x178] sm:$0xff]  ;;  %v7416_v52 = vld [vmem:[#allocation32_spill] sm:$0xff] }
 0x474   :  { %v6414_v2 = vadd.f32 %v2369_v31, %v2368_v4  ;;  %v2354_v24 = vadd.f32 %v6380_v13, %v2353_v39  ;;  %2764 = vmatpush.msra.mxu2 %v3803_v15  ;;  %2725 = vmatpush.msra.mxu0 %v6170_v60  ;;  %v3819_v23 = vld [vmem:[#allocation6 + $0x190] sm:$0xff]  ;;  %v3824_v62 = vld [vmem:[#allocation6 + $0x158] sm:$0xff]  ;;  %v7409_v31 = vld [vmem:[#allocation24_spill] sm:$0xff] }
 0x475   :  { %2745 = vmatpush.msra.mxu1 %v6173_v42  ;;  %2785 = vmatpush.msra.mxu3 %v3806_v32  ;;  %v7403_v34 = vld [vmem:[#allocation17_spill] sm:$0xff]  ;;  %v7408_v37 = vld [vmem:[#allocation30_spill] sm:$0xff]  ;;  %v7415_v15 = vld [vmem:[#allocation31_spill] sm:$0xff] }
 0x476   :  { %3393 = vtanh.f32 %v6414_v2  ;;  %v2358_v33 = vsel %vm6428_vm15, %v6380_v13, %v2354_v24  ;;  %2765 = vmatpush.msra.mxu2 %v3805_v59  ;;  %2726 = vmatpush.msra.mxu0 %v6181_v14  ;;  %v7394_v14 = vld [vmem:[#allocation54_spill] sm:$0xff]  ;;  %v7407_v61 = vld [vmem:[#allocation29_spill] sm:$0xff] }
 0x477   :  { %2746 = vmatpush.msra.mxu1 %v6184_v51  ;;  %2786 = vmatpush.msra.mxu3 %v3808_v30  ;;  %v2363_v42 = vsel %vm2360_vm0, %v2362_v5, %v2358_v33  ;;  %v7400_v13 = vld [vmem:[#allocation22_spill] sm:$0xff]  ;;  %v3825_v25 = vld [vmem:[#allocation6 + $0x130] sm:$0xff]  ;;  %v7419_v30 = vld [vmem:[#allocation35_spill] sm:$0xff] }
 0x478   :  { %2766 = vmatpush.msra.mxu2 %v3807_v38  ;;  %2727 = vmatpush.msra.mxu0 %v6189_v35  ;;  %v7395_v35 = vld [vmem:[#allocation55_spill] sm:$0xff]  ;;  %v3826_v53 = vld [vmem:[#allocation6 + $0x138] sm:$0xff]  ;;  %v3827_v0 = vld [vmem:[#allocation6 + $0x110] sm:$0xff] }
 0x479   :  { %2747 = vmatpush.msra.mxu1 %v6192_v16  ;;  %2787 = vmatpush.msra.mxu3 %v3810_v43  ;;  %v7396_v16 = vld [vmem:[#allocation82_spill] sm:$0xff]  ;;  %v7411_v39 = vld [vmem:[#allocation33_spill] sm:$0xff]  ;;  %v7422_v43 = vld [vmem:[#allocation40_spill] sm:$0xff] }
 0x47a   :  { %2767 = vmatpush.msra.mxu2 %v3809_v40  ;;  %2728 = vmatpush.msra.mxu0 %v6197_v18  ;;  %v7397_v18 = vld [vmem:[#allocation83_spill] sm:$0xff]  ;;  %v3828_v4 = vld [vmem:[#allocation6 + $0x118] sm:$0xff]  ;;  %v3829_v63 = vld [vmem:[#allocation6 + $0xf0] sm:$0xff] }
 0x47b   :  { %2748 = vmatpush.msra.mxu1 %v7394_v14  ;;  %2788 = vmatpush.msra.mxu3 %v3812_v20  ;;  %v7412_v28 = vld [vmem:[#allocation34_spill] sm:$0xff]  ;;  %v3831_v45 = vld [vmem:[#allocation6 + $0xd0] sm:$0xff]  ;;  %v7421_v40 = vld [vmem:[#allocation39_spill] sm:$0xff] }
 0x47c   :  { %v3394_v60 = vpop.eup %3393  ;;  %2768 = vmatpush.msra.mxu2 %v3811_v11  ;;  %v3830_v24 = vld [vmem:[#allocation6 + $0xf8] sm:$0xff]  ;;  %v7417_v59 = vld [vmem:[#allocation41_spill] sm:$0xff]  ;;  %v7424_v20 = vld [vmem:[#allocation43_spill] sm:$0xff] }
 0x47d   :  { %v2372_v44 = vmul.f32 %v3394_v60, %v2363_v42  ;;  %v3832_v27 = vld [vmem:[#allocation6 + $0xd8] sm:$0xff]  ;;  %v3835_v5 = vld [vmem:[#allocation6 + $0x90] sm:$0xff]  ;;  %v7420_v60 = vld [vmem:[#allocation36_spill] sm:$0xff] }
 0x47e   :  { %v3834_v33 = vld [vmem:[#allocation6 + $0xb8] sm:$0xff]  ;;  %v3837_v42 = vld [vmem:[#allocation6 + $0x70] sm:$0xff] }
 0x47f   :  { %v2378_v51 = vrot.slane %v2372_v44, 2  ;;  %v7418_v32 = vld [vmem:[#allocation42_spill] sm:$0xff]  ;;  %v3839_v14 = vld [vmem:[#allocation6 + $0x50] sm:$0xff] }
 0x480   :  { %v3836_v38 = vld [vmem:[#allocation6 + $0x98] sm:$0xff]  ;;  %v7423_v11 = vld [vmem:[#allocation49_spill] sm:$0xff] }
 0x481   :  { %2380 = vst [vmem:[#allocation2 + $0xa] sm:$0x1] %v2378_v51  ;;  %2559 = vmatmul.f32.vlgmr.msrb.gmra.mxu0 %v2378_v51  ;;  %2579 = vmatmul.f32.vlgmr.msrb.gmra.mxu1 %v2378_v51  ;;  %v3838_v44 = vld [vmem:[#allocation6 + $0x78] sm:$0xff] }
 0x482   :  { %2599 = vmatmul.f32.vlgmr.msrb.gmra.mxu2 %v2378_v51  ;;  %2619 = vmatmul.f32.vlgmr.msrb.gmra.mxu3 %v2378_v51  ;;  %v3840_v51 = vld [vmem:[#allocation6 + $0x58] sm:$0xff] }
 0x483   :  { %2875 = vmatpush.msrb.mxu0 %v7395_v35  ;;  %2895 = vmatpush.msrb.mxu1 %v7396_v16  ;;  %v3841_v35 = vld [vmem:[#allocation6 + $0x30] sm:$0xff]  ;;  %v3842_v16 = vld [vmem:[#allocation6 + $0x38] sm:$0xff] }
 0x484   :  { %2915 = vmatpush.msrb.mxu2 %v3813_v47  ;;  %2935 = vmatpush.msrb.mxu3 %v3814_v50  ;;  %v3843_v47 = vld [vmem:[#allocation6] sm:$0xff]  ;;  %v3844_v50 = vld [vmem:[#allocation6 + $0x8] sm:$0xff] }
 0x485   :  { %2876 = vmatpush.msrb.mxu0 %v7397_v18  ;;  %2896 = vmatpush.msrb.mxu1 %v7398_v19  ;;  %v3845_v18 = vld [vmem:[#allocation6 + $0x10] sm:$0xff]  ;;  %v3846_v19 = vld [vmem:[#allocation6 + $0x18] sm:$0xff] }
 0x486   :  { %2916 = vmatpush.msrb.mxu2 %v3815_v58  ;;  %2936 = vmatpush.msrb.mxu3 %v3816_v41 }
 0x487   :  { %2877 = vmatpush.msrb.mxu0 %v7399_v12  ;;  %2897 = vmatpush.msrb.mxu1 %v7400_v13 }
 0x488   :  { %2917 = vmatpush.msrb.mxu2 %v3817_v22  ;;  %2937 = vmatpush.msrb.mxu3 %v3818_v9  ;;  %v7425_v22 = vld [vmem:[#allocation12_spill] sm:$0xff] }
 0x489   :  { %2878 = vmatpush.msrb.mxu0 %v7401_v57  ;;  %2898 = vmatpush.msrb.mxu1 %v7402_v21  ;;  %v7426_v57 = vld [vmem:[#allocation13_spill] sm:$0xff] }
 0x48a   :  { %2918 = vmatpush.msrb.mxu2 %v3819_v23  ;;  %2938 = vmatpush.msrb.mxu3 %v3820_v49 }
 0x48b   :  { %2879 = vmatpush.msrb.mxu0 %v7403_v34  ;;  %2899 = vmatpush.msrb.mxu1 %v7404_v46 }
 0x48c   :  { %2919 = vmatpush.msrb.mxu2 %v3821_v3  ;;  %2939 = vmatpush.msrb.mxu3 %v3822_v1  ;;  %v7427_v3 = vld [vmem:[#allocation18_spill] sm:$0xff] }
 0x48d   :  { %2880 = vmatpush.msrb.mxu0 %v7405_v48  ;;  %2900 = vmatpush.msrb.mxu1 %v7406_v17 }
 0x48e   :  { %2920 = vmatpush.msrb.mxu2 %v3823_v29  ;;  %2940 = vmatpush.msrb.mxu3 %v3824_v62 }
 0x48f   :  { %2881 = vmatpush.msrb.mxu0 %v7407_v61  ;;  %2901 = vmatpush.msrb.mxu1 %v7408_v37 }
 0x490   :  { %2921 = vmatpush.msrb.mxu2 %v3825_v25  ;;  %2941 = vmatpush.msrb.mxu3 %v3826_v53 }
 0x491   :  { %2882 = vmatpush.msrb.mxu0 %v7409_v31  ;;  %2902 = vmatpush.msrb.mxu1 %v7410_v55 }
 0x492   :  { %2922 = vmatpush.msrb.mxu2 %v3827_v0  ;;  %2942 = vmatpush.msrb.mxu3 %v3828_v4  ;;  %v7428_v0 = vld [vmem:[#allocation14_spill] sm:$0xff] }
 0x493   :  { %2883 = vmatpush.msrb.mxu0 %v7411_v39  ;;  %2903 = vmatpush.msrb.mxu1 %v7412_v28 }
 0x494   :  { %2923 = vmatpush.msrb.mxu2 %v3829_v63  ;;  %2943 = vmatpush.msrb.mxu3 %v3830_v24 }
 0x495   :  { %2884 = vmatpush.msrb.mxu0 %v7413_v8  ;;  %2904 = vmatpush.msrb.mxu1 %v7414_v7 }
 0x496   :  { %2924 = vmatpush.msrb.mxu2 %v3831_v45  ;;  %2944 = vmatpush.msrb.mxu3 %v3832_v27 }
 0x497   :  { %2885 = vmatpush.msrb.mxu0 %v7415_v15  ;;  %2905 = vmatpush.msrb.mxu1 %v7416_v52 }
 0x498   :  { %2925 = vmatpush.msrb.mxu2 %v3833_v54  ;;  %2945 = vmatpush.msrb.mxu3 %v3834_v33 }
 0x499   :  { %2886 = vmatpush.msrb.mxu0 %v7417_v59  ;;  %2906 = vmatpush.msrb.mxu1 %v7418_v32 }
 0x49a   :  { %2926 = vmatpush.msrb.mxu2 %v3835_v5  ;;  %2946 = vmatpush.msrb.mxu3 %v3836_v38 }
 0x49b   :  { %2887 = vmatpush.msrb.mxu0 %v7419_v30  ;;  %2907 = vmatpush.msrb.mxu1 %v7420_v60  ;;  %v2536_v30 = vrot.slane %v6334_v56, 7 }
 0x49c   :  { %2927 = vmatpush.msrb.mxu2 %v3837_v42  ;;  %2947 = vmatpush.msrb.mxu3 %v3838_v44 }
 0x49d   :  { %2888 = vmatpush.msrb.mxu0 %v7421_v40  ;;  %2908 = vmatpush.msrb.mxu1 %v7422_v43 }
 0x49e   :  { %2928 = vmatpush.msrb.mxu2 %v3839_v14  ;;  %2948 = vmatpush.msrb.mxu3 %v3840_v51 }
 0x49f   :  { %2889 = vmatpush.msrb.mxu0 %v7423_v11  ;;  %2909 = vmatpush.msrb.mxu1 %v7424_v20 }
 0x4a0   :  { %2929 = vmatpush.msrb.mxu2 %v3841_v35  ;;  %2949 = vmatpush.msrb.mxu3 %v3842_v16 }
 0x4a1   :  { %2890 = vmatpush.msrb.mxu0 %v3843_v47  ;;  %2910 = vmatpush.msrb.mxu1 %v3844_v50 }
 0x4a2   :  { %2930 = vmatpush.msrb.mxu2 %v3845_v18  ;;  %2950 = vmatpush.msrb.mxu3 %v3846_v19 }
 0x4d7   :  { %v2398_v58 = vpop.f32.mrf.mxu0  ;;  %v2418_v41 = vpop.f32.mrf.mxu1 }
 0x4d8   :  { %v2465_v12 = vrot.slane %v2398_v58, 2  ;;  %v2466_v13 = vrot.slane %v2418_v41, 2 }
 0x4da   :  { %v2473_v9 = vadd.f32 %v2465_v12, %v7425_v22  ;;  %v2474_v21 = vadd.f32 %v2466_v13, %v7426_v57 }
 0x4dc   :  { %v3184_v23 = vmul.f32 -1.442695, %v2473_v9  ;;  %v3185_v49 = vmul.f32 -1.442695, %v2474_v21 }
 0x4de   :  { %3395 = vpow2.f32 %v3184_v23  ;;  %v2458_v34 = vpop.f32.mrf.mxu3  ;;  %v2438_v37 = vpop.f32.mrf.mxu2 }
 0x4df   :  { %3397 = vpow2.f32 %v3185_v49  ;;  %v2468_v46 = vrot.slane %v2458_v34, 2  ;;  %v2467_v25 = vrot.slane %v2438_v37, 2 }
 0x4e1   :  { %v2476_v1 = vadd.f32 %v2468_v46, %v7427_v3  ;;  %v2475_v4 = vadd.f32 %v2467_v25, %v7428_v0 }
 0x4e3   :  { %v3186_v48 = vmul.f32 -1.442695, %v2476_v1 }
 0x4e4   :  { %v3396_v17 = vpop.eup %3395 }
 0x4e5   :  { %v3398_v29 = vpop.eup %3397  ;;  %v2480_v62 = vadd.f32 1.0, %v3396_v17  ;;  %3399 = vpow2.f32 %v3186_v48 }
 0x4e6   :  { %v2499_v61 = vadd.f32 1.0, %v3398_v29 }
 0x4e7   :  { %3401 = vrcp.f32 %v2480_v62  ;;  %v2492_v7 = vand.u32 2147483648, %v2480_v62  ;;  %v2490_v15 = vand.u32 2147483647, %v2480_v62  ;;  %vm2486_vm3 = vweird.f32 %v2480_v62 }
 0x4e8   :  { %3403 = vrcp.f32 %v2499_v61  ;;  %v2511_v45 = vand.u32 2147483648, %v2499_v61  ;;  %v2509_v54 = vand.u32 2147483647, %v2499_v61  ;;  %vm2505_vm4 = vweird.f32 %v2499_v61 }
 0x4e9   :  { %v2493_v32 = vor.u32 1.1754944e-38, %v2492_v7  ;;  %vm2491_vm7 = vcmp.eq.f32.partialorder %v2490_v15, 8.507059e+37 }
 0x4ea   :  { %v2512_v60 = vor.u32 1.1754944e-38, %v2511_v45  ;;  %vm2510_vm8 = vcmp.eq.f32.partialorder %v2509_v54, 8.507059e+37 }
 0x4eb   :  { %v3400_v53 = vpop.eup %3399 }
 0x4ec   :  { %v2519_v31 = vadd.f32 1.0, %v3400_v53 }
 0x4ed   :  { %v3402_v55 = vpop.eup %3401 }
 0x4ee   :  { %v3404_v39 = vpop.eup %3403  ;;  %v2482_v28 = vmul.f32 %v3402_v55, %v2480_v62  ;;  %3405 = vrcp.f32 %v2519_v31  ;;  %vm2487_vm1 = vweird.f32 %v3402_v55  ;;  %v2531_v58 = vand.u32 2147483648, %v2519_v31 }
 0x4ef   :  { %v2501_v63 = vmul.f32 %v3404_v39, %v2499_v61  ;;  %3407 = vtanh.f32 %v2475_v4  ;;  %vm2506_vm2 = vweird.f32 %v3404_v39  ;;  %vm2488_vm5 = vmor %vm2486_vm3, %vm2487_vm1  ;;  %vm2525_vm10 = vweird.f32 %v2519_v31 }
 0x4f0   :  { %v2483_v24 = vsub.f32 1.0, %v2482_v28  ;;  %vm2507_vm6 = vmor %vm2505_vm4, %vm2506_vm2  ;;  %v2529_v13 = vand.u32 2147483647, %v2519_v31  ;;  %v2532_v34 = vor.u32 1.1754944e-38, %v2531_v58 }
 0x4f1   :  { %v2502_v8 = vsub.f32 1.0, %v2501_v63 }
 0x4f2   :  { %v2484_v27 = vmul.f32 %v3402_v55, %v2483_v24  ;;  %vm2530_vm12 = vcmp.eq.f32.partialorder %v2529_v13, 8.507059e+37 }
 0x4f3   :  { %v2503_v52 = vmul.f32 %v3404_v39, %v2502_v8 }
 0x4f4   :  { %v3406_v33 = vpop.eup %3405  ;;  %v2485_v59 = vadd.f32 %v3402_v55, %v2484_v27 }
 0x4f5   :  { %v2504_v5 = vadd.f32 %v3404_v39, %v2503_v52  ;;  %v2521_v38 = vmul.f32 %v3406_v33, %v2519_v31  ;;  %v3408_v44 = vpop.eup %3407  ;;  %vm2526_vm9 = vweird.f32 %v3406_v33 }
 0x4f6   :  { %v2489_v42 = vsel %vm2488_vm5, %v3402_v55, %v2485_v59  ;;  %vm2527_vm11 = vmor %vm2525_vm10, %vm2526_vm9 }
 0x4f7   :  { %v2494_v40 = vsel %vm2491_vm7, %v2493_v32, %v2489_v42  ;;  %v2508_v43 = vsel %vm2507_vm6, %v3404_v39, %v2504_v5  ;;  %v2522_v14 = vsub.f32 1.0, %v2521_v38 }
 0x4f8   :  { %v2513_v51 = vsel %vm2510_vm8, %v2512_v60, %v2508_v43  ;;  %v2539_v11 = vmul.f32 %v3408_v44, %v2494_v40  ;;  %v2698_v40 = vrot.slane %v6414_v2, 1 }
 0x4f9   :  { %v2538_v20 = vmul.f32 %v2536_v30, %v2513_v51  ;;  %v2523_v35 = vmul.f32 %v3406_v33, %v2522_v14 }
 0x4fb   :  { %v6478_v50 = vadd.f32 %v2539_v11, %v2538_v20  ;;  %v2524_v56 = vadd.f32 %v3406_v33, %v2523_v35 }
 0x4fd   :  { %3409 = vtanh.f32 %v6478_v50  ;;  %v2528_v23 = vsel %vm2527_vm11, %v3406_v33, %v2524_v56 }
 0x4fe   :  { %v2560_v16 = vpop.f32.mrf.mxu0  ;;  %v2580_v47 = vpop.f32.mrf.mxu1  ;;  %v2533_v48 = vsel %vm2530_vm12, %v2532_v34, %v2528_v23  ;;  %v3047_v34 = vld [vmem:[%s6618_s7 + $0x78] sm:$0xff] }
 0x4ff   :  { %v2627_v18 = vrot.slane %v2560_v16, 7  ;;  %v2628_v19 = vrot.slane %v2580_v47, 7 }
 0x501   :  { %v2635_v41 = vadd.f32 %v2627_v18, %v4648_v6  ;;  %v2636_v12 = vadd.f32 %v2628_v19, %v7084_v36 }
 0x503   :  { %v3187_v9 = vmul.f32 -1.442695, %v2635_v41  ;;  %v3188_v21 = vmul.f32 -1.442695, %v2636_v12  ;;  %v3410_v1 = vpop.eup %3409 }
 0x504   :  { %v2542_v29 = vmul.f32 %v3410_v1, %v2533_v48  ;;  %v3045_v1 = vld [vmem:[%s6618_s7 + $0x68] sm:$0xff] }
 0x505   :  { %3411 = vpow2.f32 %v3187_v9  ;;  %v2620_v49 = vpop.f32.mrf.mxu3  ;;  %v2600_v55 = vpop.f32.mrf.mxu2 }
 0x506   :  { %3413 = vpow2.f32 %v3188_v21  ;;  %v2630_v46 = vrot.slane %v2620_v49, 7  ;;  %v2706_v61 = vrot.slane %v2542_v29, 6  ;;  %v2629_v4 = vrot.slane %v2600_v55, 7  ;;  %v3044_v29 = vld [vmem:[%s6618_s7 + $0x60] sm:$0xff] }
 0x508   :  { %v2638_v17 = vadd.f32 %v2630_v46, %v4682_v10  ;;  %2708 = vst [vmem:[#allocation2 + $0x6] sm:$0x1] %v2706_v61  ;;  %2729 = vmatmul.f32.vlgmr.msra.gmra.mxu0 %v2706_v61  ;;  %2749 = vmatmul.f32.vlgmr.msra.gmra.mxu1 %v2706_v61  ;;  %v2637_v24 = vadd.f32 %v2629_v4, %v4686_v26  ;;  %v3046_v46 = vld [vmem:[%s6618_s7 + $0x70] sm:$0xff] }
 0x509   :  { %2769 = vmatmul.f32.vlgmr.msra.gmra.mxu2 %v2706_v61  ;;  %2789 = vmatmul.f32.vlgmr.msra.gmra.mxu3 %v2706_v61 }
 0x50a   :  { %v3189_v62 = vmul.f32 -1.442695, %v2638_v17  ;;  %3068 = vmatpush.msra.mxu0 %v3047_v34 }
 0x50b   :  { %v3412_v37 = vpop.eup %3411 }
 0x50c   :  { %v3414_v25 = vpop.eup %3413  ;;  %v2642_v53 = vadd.f32 1.0, %v3412_v37  ;;  %3415 = vpow2.f32 %v3189_v62  ;;  %3069 = vmatpush.msra.mxu0 %v3046_v46  ;;  %v3043_v37 = vld [vmem:[%s6618_s7 + $0x58] sm:$0xff] }
 0x50d   :  { %v2661_v31 = vadd.f32 1.0, %v3414_v25 }
 0x50e   :  { %3417 = vrcp.f32 %v2642_v53  ;;  %v2654_v52 = vand.u32 2147483648, %v2642_v53  ;;  %v2652_v59 = vand.u32 2147483647, %v2642_v53  ;;  %vm2648_vm15 = vweird.f32 %v2642_v53  ;;  %3070 = vmatpush.msra.mxu0 %v3045_v1  ;;  %v3060_v1 = vld [vmem:[%s6618_s7 + $0xe0] sm:$0xff] }
 0x50f   :  { %3419 = vrcp.f32 %v2661_v31  ;;  %v2673_v54 = vand.u32 2147483648, %v2661_v31  ;;  %v2671_v5 = vand.u32 2147483647, %v2661_v31  ;;  %vm2667_vm0 = vweird.f32 %v2661_v31 }
 0x510   :  { %v2655_v60 = vor.u32 1.1754944e-38, %v2654_v52  ;;  %vm2653_vm3 = vcmp.eq.f32.partialorder %v2652_v59, 8.507059e+37  ;;  %3071 = vmatpush.msra.mxu0 %v3044_v29  ;;  %v3037_v52 = vld [vmem:[%s6618_s7 + $0x28] sm:$0xff] }
 0x511   :  { %v2674_v43 = vor.u32 1.1754944e-38, %v2673_v54  ;;  %vm2672_vm4 = vcmp.eq.f32.partialorder %v2671_v5, 8.507059e+37 }
 0x512   :  { %v3416_v39 = vpop.eup %3415  ;;  %3072 = vmatpush.msra.mxu0 %v3043_v37 }
 0x513   :  { %v2681_v28 = vadd.f32 1.0, %v3416_v39  ;;  %v3041_v39 = vld [vmem:[%s6618_s7 + $0x48] sm:$0xff] }
 0x514   :  { %v3418_v63 = vpop.eup %3417 }
 0x515   :  { %v3420_v8 = vpop.eup %3419  ;;  %v2644_v7 = vmul.f32 %v3418_v63, %v2642_v53  ;;  %3421 = vrcp.f32 %v2681_v28  ;;  %vm2649_vm13 = vweird.f32 %v3418_v63  ;;  %v2693_v2 = vand.u32 2147483648, %v2681_v28 }
 0x516   :  { %v2663_v45 = vmul.f32 %v3420_v8, %v2661_v31  ;;  %3423 = vtanh.f32 %v2637_v24  ;;  %vm2668_vm14 = vweird.f32 %v3420_v8  ;;  %vm2650_vm1 = vmor %vm2648_vm15, %vm2649_vm13  ;;  %vm2687_vm6 = vweird.f32 %v2681_v28  ;;  %v3042_v31 = vld [vmem:[%s6618_s7 + $0x50] sm:$0xff]  ;;  %v3039_v24 = vld [vmem:[%s6618_s7 + $0x38] sm:$0xff] }
 0x517   :  { %v2645_v27 = vsub.f32 1.0, %v2644_v7  ;;  %vm2669_vm2 = vmor %vm2667_vm0, %vm2668_vm14  ;;  %v2691_v41 = vand.u32 2147483647, %v2681_v28  ;;  %v2694_v13 = vor.u32 1.1754944e-38, %v2693_v2  ;;  %3073 = vmatpush.msra.mxu0 %v3042_v31  ;;  %v3038_v7 = vld [vmem:[%s6618_s7 + $0x30] sm:$0xff] }
 0x518   :  { %v2664_v15 = vsub.f32 1.0, %v2663_v45 }
 0x519   :  { %v2646_v33 = vmul.f32 %v3418_v63, %v2645_v27  ;;  %vm2692_vm8 = vcmp.eq.f32.partialorder %v2691_v41, 8.507059e+37  ;;  %3074 = vmatpush.msra.mxu0 %v3041_v39 }
 0x51a   :  { %v2665_v32 = vmul.f32 %v3420_v8, %v2664_v15 }
 0x51b   :  { %v3422_v38 = vpop.eup %3421  ;;  %v2647_v30 = vadd.f32 %v3418_v63, %v2646_v33  ;;  %v3036_v33 = vld [vmem:[%s6618_s7 + $0x20] sm:$0xff] }
 0x51c   :  { %v2666_v42 = vadd.f32 %v3420_v8, %v2665_v32  ;;  %v2683_v44 = vmul.f32 %v3422_v38, %v2681_v28  ;;  %v3424_v51 = vpop.eup %3423  ;;  %vm2688_vm5 = vweird.f32 %v3422_v38  ;;  %v3035_v32 = vld [vmem:[%s6618_s7 + $0x18] sm:$0xff] }
 0x51d   :  { %v2651_v14 = vsel %vm2650_vm1, %v3418_v63, %v2647_v30  ;;  %vm2689_vm7 = vmor %vm2687_vm6, %vm2688_vm5 }
 0x51e   :  { %v2656_v11 = vsel %vm2653_vm3, %v2655_v60, %v2651_v14  ;;  %v2670_v20 = vsel %vm2669_vm2, %v3420_v8, %v2666_v42  ;;  %v2684_v35 = vsub.f32 1.0, %v2683_v44  ;;  %v3033_v44 = vld [vmem:[%s6618_s7 + $0x8] sm:$0xff] }
 0x51f   :  { %v2675_v16 = vsel %vm2672_vm4, %v2674_v43, %v2670_v20  ;;  %v2701_v47 = vmul.f32 %v3424_v51, %v2656_v11  ;;  %v3032_v51 = vld [vmem:[%s6618_s7] sm:$0xff] }
 0x520   :  { %v2700_v18 = vmul.f32 %v2698_v40, %v2675_v16  ;;  %v2685_v19 = vmul.f32 %v3422_v38, %v2684_v35 }
 0x522   :  { %v6486_v56 = vadd.f32 %v2701_v47, %v2700_v18  ;;  %v2686_v58 = vadd.f32 %v3422_v38, %v2685_v19  ;;  %v3062_v19 = vld [vmem:[%s6618_s7 + $0xf0] sm:$0xff] }
 0x524   :  { %3425 = vtanh.f32 %v6486_v56  ;;  %v2690_v12 = vsel %vm2689_vm7, %v3422_v38, %v2686_v58  ;;  %v3034_v38 = vld [vmem:[%s6618_s7 + $0x10] sm:$0xff] }
 0x525   :  { %v2695_v21 = vsel %vm2692_vm8, %v2694_v13, %v2690_v12  ;;  %v3061_v13 = vld [vmem:[%s6618_s7 + $0xe8] sm:$0xff] }
 0x52a   :  { %v3426_v9 = vpop.eup %3425 }
 0x52b   :  { %v2704_v23 = vmul.f32 %v3426_v9, %v2695_v21 }
 0x52d   :  { %v2710_v49 = vrot.slane %v2704_v23, 1 }
 0x52f   :  { %2712 = vst [vmem:[#allocation2 + $0x9] sm:$0x1] %v2710_v49  ;;  %2891 = vmatmul.f32.vlgmr.msrb.gmra.mxu0 %v2710_v49  ;;  %2911 = vmatmul.f32.vlgmr.msrb.gmra.mxu1 %v2710_v49 }
 0x530   :  { %2931 = vmatmul.f32.vlgmr.msrb.gmra.mxu2 %v2710_v49  ;;  %2951 = vmatmul.f32.vlgmr.msrb.gmra.mxu3 %v2710_v49  ;;  %v2868_v49 = vrot.slane %v6478_v50, 7  ;;  %v3059_v50 = vld [vmem:[%s6618_s7 + $0xd8] sm:$0xff] }
 0x585   :  { %v2730_v48 = vpop.f32.mrf.mxu0  ;;  %v2750_v17 = vpop.f32.mrf.mxu1 }
 0x586   :  { %v2797_v62 = vrot.slane %v2730_v48, 1  ;;  %v2798_v61 = vrot.slane %v2750_v17, 1 }
 0x588   :  { %v2805_v25 = vadd.f32 %v2797_v62, %v7425_v22  ;;  %v2806_v53 = vadd.f32 %v2798_v61, %v7426_v57  ;;  %v3040_v22 = vld [vmem:[%s6618_s7 + $0x40] sm:$0xff] }
 0x589   :  { %3075 = vmatpush.msra.mxu0 %v3040_v22 }
 0x58a   :  { %v3190_v55 = vmul.f32 -1.442695, %v2805_v25  ;;  %v3191_v4 = vmul.f32 -1.442695, %v2806_v53 }
 0x58b   :  { %3076 = vmatpush.msra.mxu0 %v3039_v24 }
 0x58c   :  { %3427 = vpow2.f32 %v3190_v55  ;;  %v2790_v28 = vpop.f32.mrf.mxu3  ;;  %v2770_v54 = vpop.f32.mrf.mxu2 }
 0x58d   :  { %3429 = vpow2.f32 %v3191_v4  ;;  %v2800_v63 = vrot.slane %v2790_v28, 1  ;;  %3077 = vmatpush.msra.mxu0 %v3038_v7  ;;  %v2799_v59 = vrot.slane %v2770_v54, 1  ;;  %v3058_v4 = vld [vmem:[%s6618_s7 + $0xd0] sm:$0xff] }
 0x58e   :  { %v3054_v54 = vld [vmem:[%s6618_s7 + $0xb0] sm:$0xff] }
 0x58f   :  { %v2808_v57 = vadd.f32 %v2800_v63, %v7427_v3  ;;  %3078 = vmatpush.msra.mxu0 %v3037_v52  ;;  %v2807_v42 = vadd.f32 %v2799_v59, %v7428_v0  ;;  %v3063_v0 = vld [vmem:[%s6618_s7 + $0xf8] sm:$0xff] }
 0x590   :  { %3088 = vmatpush.msra.mxu1 %v3063_v0 }
 0x591   :  { %v3192_v8 = vmul.f32 -1.442695, %v2808_v57  ;;  %3079 = vmatpush.msra.mxu0 %v3036_v33  ;;  %v3057_v57 = vld [vmem:[%s6618_s7 + $0xc8] sm:$0xff] }
 0x592   :  { %v3428_v45 = vpop.eup %3427  ;;  %3089 = vmatpush.msra.mxu1 %v3062_v19 }
 0x593   :  { %v3430_v27 = vpop.eup %3429  ;;  %v2812_v15 = vadd.f32 1.0, %v3428_v45  ;;  %3431 = vpow2.f32 %v3192_v8  ;;  %3080 = vmatpush.msra.mxu0 %v3035_v32 }
 0x594   :  { %v2831_v3 = vadd.f32 1.0, %v3430_v27  ;;  %3090 = vmatpush.msra.mxu1 %v3061_v13  ;;  %v3055_v27 = vld [vmem:[%s6618_s7 + $0xb8] sm:$0xff] }
 0x595   :  { %3433 = vrcp.f32 %v2812_v15  ;;  %3081 = vmatpush.msra.mxu0 %v3034_v38  ;;  %v2824_v35 = vand.u32 2147483648, %v2812_v15  ;;  %v2822_v18 = vand.u32 2147483647, %v2812_v15  ;;  %vm2818_vm11 = vweird.f32 %v2812_v15  ;;  %v3053_v38 = vld [vmem:[%s6618_s7 + $0xa8] sm:$0xff] }
 0x596   :  { %3435 = vrcp.f32 %v2831_v3  ;;  %v2843_v16 = vand.u32 2147483648, %v2831_v3  ;;  %v2841_v2 = vand.u32 2147483647, %v2831_v3  ;;  %vm2837_vm12 = vweird.f32 %v2831_v3  ;;  %3091 = vmatpush.msra.mxu1 %v3060_v1 }
 0x597   :  { %3082 = vmatpush.msra.mxu0 %v3033_v44  ;;  %v2825_v9 = vor.u32 1.1754944e-38, %v2824_v35  ;;  %vm2823_vm15 = vcmp.eq.f32.partialorder %v2822_v18, 8.507059e+37 }
 0x598   :  { %v2844_v34 = vor.u32 1.1754944e-38, %v2843_v16  ;;  %vm2842_vm0 = vcmp.eq.f32.partialorder %v2841_v2, 8.507059e+37  ;;  %3092 = vmatpush.msra.mxu1 %v3059_v50 }
 0x599   :  { %v3432_v5 = vpop.eup %3431  ;;  %3083 = vmatpush.msra.mxu0 %v3032_v51  ;;  %v3049_v51 = vld [vmem:[%s6618_s7 + $0x88] sm:$0xff] }
 0x59a   :  { %v6534_v30 = vadd.f32 1.0, %v3432_v5  ;;  %3093 = vmatpush.msra.mxu1 %v3058_v4 }
 0x59b   :  { %v3434_v60 = vpop.eup %3433 }
 0x59c   :  { %v3436_v40 = vpop.eup %3435  ;;  %v2814_v43 = vmul.f32 %v3434_v60, %v2812_v15  ;;  %3437 = vrcp.f32 %v6534_v30  ;;  %vm2819_vm9 = vweird.f32 %v3434_v60  ;;  %v2863_v24 = vand.u32 2147483648, %v6534_v30  ;;  %3094 = vmatpush.msra.mxu1 %v3057_v57 }
 0x59d   :  { %v2833_v14 = vmul.f32 %v3436_v40, %v2831_v3  ;;  %3439 = vtanh.f32 %v2807_v42  ;;  %vm2838_vm10 = vweird.f32 %v3436_v40  ;;  %vm2820_vm13 = vmor %vm2818_vm11, %vm2819_vm9  ;;  %vm2857_vm2 = vweird.f32 %v6534_v30 }
 0x59e   :  { %v2815_v11 = vsub.f32 1.0, %v2814_v43  ;;  %vm2839_vm14 = vmor %vm2837_vm12, %vm2838_vm10  ;;  %v2861_v45 = vand.u32 2147483647, %v6534_v30  ;;  %v2864_v15 = vor.u32 1.1754944e-38, %v2863_v24  ;;  %v3051_v43 = vld [vmem:[%s6618_s7 + $0x98] sm:$0xff] }
 0x59f   :  { %v2834_v20 = vsub.f32 1.0, %v2833_v14  ;;  %v3050_v14 = vld [vmem:[%s6618_s7 + $0x90] sm:$0xff] }
 0x5a0   :  { %v2816_v47 = vmul.f32 %v3434_v60, %v2815_v11  ;;  %vm2862_vm4 = vcmp.eq.f32.partialorder %v2861_v45, 8.507059e+37 }
 0x5a1   :  { %v2835_v58 = vmul.f32 %v3436_v40, %v2834_v20  ;;  %v3048_v20 = vld [vmem:[%s6618_s7 + $0x80] sm:$0xff] }
 0x5a2   :  { %v3438_v41 = vpop.eup %3437  ;;  %v2817_v12 = vadd.f32 %v3434_v60, %v2816_v47 }
 0x5a3   :  { %v2836_v21 = vadd.f32 %v3436_v40, %v2835_v58  ;;  %v2853_v23 = vmul.f32 %v3438_v41, %v6534_v30  ;;  %v3440_v48 = vpop.eup %3439  ;;  %vm2858_vm1 = vweird.f32 %v3438_v41 }
 0x5a4   :  { %v2821_v46 = vsel %vm2820_vm13, %v3434_v60, %v2817_v12  ;;  %vm2859_vm3 = vmor %vm2857_vm2, %vm2858_vm1  ;;  %vm3108_vm1 = vcmask 64512  }
 0x5a5   :  { %v2826_v17 = vsel %vm2823_vm15, %v2825_v9, %v2821_v46  ;;  %v2840_v29 = vsel %vm2839_vm14, %v3436_v40, %v2836_v21  ;;  %v2854_v62 = vsub.f32 1.0, %v2853_v23 }
 0x5a6   :  { %v2845_v61 = vsel %vm2842_vm0, %v2844_v34, %v2840_v29  ;;  %v2871_v37 = vmul.f32 %v3440_v48, %v2826_v17 }
 0x5a7   :  { %v2870_v25 = vmul.f32 %v2868_v49, %v2845_v61  ;;  %v2855_v53 = vmul.f32 %v3438_v41, %v2854_v62  ;;  %v3018_v61 = vrot.slane %v6486_v56, 1 }
 0x5a9   :  { %v2872_v39 = vadd.f32 %v2871_v37, %v2870_v25  ;;  %v2856_v22 = vadd.f32 %v3438_v41, %v2855_v53 }
 0x5ab   :  { %3441 = vtanh.f32 %v2872_v39 }
 0x5ac   :  { %v2892_v31 = vpop.f32.mrf.mxu0  ;;  %v2912_v55 = vpop.f32.mrf.mxu1 }
 0x5ad   :  { %v2955_v28 = vadd.f32 %v2892_v31, %v4648_v6  ;;  %v2956_v63 = vadd.f32 %v2912_v55, %v7084_v36  ;;  %v3056_v6 = vld [vmem:[%s6618_s7 + $0xc0] sm:$0xff]  ;;  %v2860_v36 = vsel %vm2859_vm3, %v3438_v41, %v2856_v22 }
 0x5ae   :  { %3095 = vmatpush.msra.mxu1 %v3056_v6  ;;  %v2865_v59 = vsel %vm2862_vm4, %v2864_v15, %v2860_v36  ;;  %v3202_v36 = vld [vmem:[%s6619_s8] ss:$0 sm:$0xff]  ;;  %s3930_s8 = smov [#allocation8]  }
 0x5af   :  { %v3193_v8 = vmul.f32 -1.442695, %v2955_v28  ;;  %v3194_v7 = vmul.f32 -1.442695, %v2956_v63  ;;  %s3127_s23 = sshll.u32 %s3930_s8, 4  ;;  %s3128_s23 = int_to_ptr.vmem [resolvable:$true] %s3127_s23 }
 0x5b0   :  { %3096 = vmatpush.msra.mxu1 %v3055_v27 }
 0x5b1   :  { %3443 = vpow2.f32 %v3193_v8  ;;  %v3442_v33 = vpop.eup %3441 }
 0x5b2   :  { %3445 = vpow2.f32 %v3194_v7  ;;  %3097 = vmatpush.msra.mxu1 %v3054_v54  ;;  %v2874_v32 = vmul.f32 %v3442_v33, %v2865_v59 }
 0x5b3   :  { %v2952_v52 = vpop.f32.mrf.mxu3  ;;  %v2932_v11 = vpop.f32.mrf.mxu2 }
 0x5b4   :  { %v2958_v3 = vadd.f32 %v2952_v52, %v4682_v10  ;;  %3098 = vmatpush.msra.mxu1 %v3053_v38  ;;  %v3026_v42 = vrot.slane %v2874_v32, 7  ;;  %v3052_v10 = vld [vmem:[%s6618_s7 + $0xa0] sm:$0xff]  ;;  %v2957_v47 = vadd.f32 %v2932_v11, %v4686_v26 }
 0x5b6   :  { %v3195_v5 = vmul.f32 -1.442695, %v2958_v3  ;;  %3099 = vmatpush.msra.mxu1 %v3052_v10  ;;  %3028 = vst [vmem:[#allocation2 + $0x7] sm:$0x1] %v3026_v42 }
 0x5b7   :  { %v3444_v30 = vpop.eup %3443 }
 0x5b8   :  { %v3446_v60 = vpop.eup %3445  ;;  %v2962_v44 = vadd.f32 1.0, %v3444_v30  ;;  %3447 = vpow2.f32 %v3195_v5  ;;  %3100 = vmatpush.msra.mxu1 %v3051_v43 }
 0x5b9   :  { %v2981_v40 = vadd.f32 1.0, %v3446_v60 }
 0x5ba   :  { %3449 = vrcp.f32 %v2962_v44  ;;  %3101 = vmatpush.msra.mxu1 %v3050_v14  ;;  %v2974_v13 = vand.u32 2147483648, %v2962_v44  ;;  %v2972_v23 = vand.u32 2147483647, %v2962_v44  ;;  %vm2968_vm7 = vweird.f32 %v2962_v44 }
 0x5bb   :  { %3451 = vrcp.f32 %v2981_v40  ;;  %v2993_v9 = vand.u32 2147483648, %v2981_v40  ;;  %v2991_v34 = vand.u32 2147483647, %v2981_v40  ;;  %vm2987_vm8 = vweird.f32 %v2981_v40 }
 0x5bc   :  { %3102 = vmatpush.msra.mxu1 %v3049_v51  ;;  %v2975_v1 = vor.u32 1.1754944e-38, %v2974_v13  ;;  %vm2973_vm11 = vcmp.eq.f32.partialorder %v2972_v23, 8.507059e+37 }
 0x5bd   :  { %v3030_v58 = vld [vmem:[#allocation2] sm:$0xff]  ;;  %v2994_v29 = vor.u32 1.1754944e-38, %v2993_v9  ;;  %vm2992_vm12 = vcmp.eq.f32.partialorder %v2991_v34, 8.507059e+37 }
 0x5be   :  { %v3448_v0 = vpop.eup %3447  ;;  %3103 = vmatpush.msra.mxu1 %v3048_v20  ;;  %3084 = vmatmul.f32.vlgmr.msra.gmra.mxu0 %v3030_v58 }
 0x5bf   :  { %v3001_v35 = vadd.f32 1.0, %v3448_v0 }
 0x5c0   :  { %v3450_v16 = vpop.eup %3449 }
 0x5c1   :  { %v3452_v18 = vpop.eup %3451  ;;  %v2964_v19 = vmul.f32 %v3450_v16, %v2962_v44  ;;  %3453 = vrcp.f32 %v3001_v35  ;;  %vm2969_vm5 = vweird.f32 %v3450_v16  ;;  %v3013_v22 = vand.u32 2147483648, %v3001_v35 }
 0x5c2   :  { %v2983_v2 = vmul.f32 %v3452_v18, %v2981_v40  ;;  %3455 = vtanh.f32 %v2957_v47  ;;  %vm2988_vm6 = vweird.f32 %v3452_v18  ;;  %vm2970_vm9 = vmor %vm2968_vm7, %vm2969_vm5  ;;  %vm3007_vm14 = vweird.f32 %v3001_v35 }
 0x5c3   :  { %v2965_v41 = vsub.f32 1.0, %v2964_v19  ;;  %vm2989_vm10 = vmor %vm2987_vm8, %vm2988_vm6  ;;  %v3011_v57 = vand.u32 2147483647, %v3001_v35  ;;  %v3014_v8 = vor.u32 1.1754944e-38, %v3013_v22 }
 0x5c4   :  { %v2984_v12 = vsub.f32 1.0, %v2983_v2 }
 0x5c5   :  { %v2966_v21 = vmul.f32 %v3450_v16, %v2965_v41  ;;  %vm3012_vm0 = vcmp.eq.f32.partialorder %v3011_v57, 8.507059e+37 }
 0x5c6   :  { %v2985_v49 = vmul.f32 %v3452_v18, %v2984_v12 }
 0x5c7   :  { %v3454_v46 = vpop.eup %3453  ;;  %v2967_v26 = vadd.f32 %v3450_v16, %v2966_v21 }
 0x5c8   :  { %v2986_v48 = vadd.f32 %v3452_v18, %v2985_v49  ;;  %v3003_v17 = vmul.f32 %v3454_v46, %v3001_v35  ;;  %v3456_v37 = vpop.eup %3455  ;;  %vm3008_vm13 = vweird.f32 %v3454_v46 }
 0x5c9   :  { %v2971_v62 = vsel %vm2970_vm9, %v3450_v16, %v2967_v26  ;;  %vm3009_vm15 = vmor %vm3007_vm14, %vm3008_vm13 }
 0x5ca   :  { %v2976_v50 = vsel %vm2973_vm11, %v2975_v1, %v2971_v62  ;;  %v2990_v25 = vsel %vm2989_vm10, %v3452_v18, %v2986_v48  ;;  %v3004_v53 = vsub.f32 1.0, %v3003_v17 }
 0x5cb   :  { %v2995_v31 = vsel %vm2992_vm12, %v2994_v29, %v2990_v25  ;;  %v3021_v55 = vmul.f32 %v3456_v37, %v2976_v50 }
 0x5cc   :  { %v3020_v4 = vmul.f32 %v3018_v61, %v2995_v31  ;;  %v3005_v39 = vmul.f32 %v3454_v46, %v3004_v53 }
 0x5ce   :  { %v3022_v28 = vadd.f32 %v3021_v55, %v3020_v4  ;;  %v3006_v63 = vadd.f32 %v3454_v46, %v3005_v39 }
 0x5d0   :  { %3457 = vtanh.f32 %v3022_v28  ;;  %v3010_v24 = vsel %vm3009_vm15, %v3454_v46, %v3006_v63 }
 0x5d1   :  { %v3015_v7 = vsel %vm3012_vm0, %v3014_v8, %v3010_v24 }
 0x5d6   :  { %v3458_v56 = vpop.eup %3457 }
 0x5d7   :  { %v3024_v45 = vmul.f32 %v3458_v56, %v3015_v7 }
 0x5d9   :  { %3029 = vst [vmem:[#allocation2 + $0x8] sm:$0x1] %v3024_v45 }
 0x5e0   :  { %v3031_v6 = vld [vmem:[#allocation2 + $0x8] sm:$0xff] }
 0x5e1   :  { %3104 = vmatmul.f32.vlgmr.msra.gmra.mxu1 %v3031_v6 }
 0x63b   :  { %v3085_v27 = vpop.f32.mrf.mxu0 }
 0x63c   :  { %v3086_v15 = vadd.f32 %v3202_v36, %v3085_v27 }
 0x65e   :  { %v3105_v52 = vpop.f32.mrf.mxu1 }
 0x65f   :  { %v3106_v3 = vadd.f32 %v3105_v52, %v3086_v15 }
 0x661   :  { %v3109_v54 = vsel %vm3108_vm1, %v3106_v3, -inf }
 0x662   :  { %3110 = vmax.xlane.f32.xlu0 %v3109_v54 }
 0x6d5   :  { %v3111_v33 = vpop.xlane.xlu0 %3110 }
 0x6d6   :  { %v3112_v59 = vsub.f32 %v3106_v3, %v3111_v33 }
 0x6d8   :  { %v3113_v32 = vmul.f32 1.442695, %v3112_v59 }
 0x6da   :  { %3459 = vpow2.f32 %v3113_v32 }
 0x6e0   :  { %v3460_v5 = vpop.eup %3459 }
 0x6e1   :  { %v3115_v38 = vsel %vm3108_vm1, %v3460_v5, 0.0 }
 0x6e2   :  { %3116 = vadd.xlane.f32.xlu0 %v3115_v38 }
 0x755   :  { %v3117_v30 = vpop.xlane.xlu0 %3116 }
 0x756   :  { %3461 = vlog2.f32 %v3117_v30 }
 0x75c   :  { %v3462_v60 = vpop.eup %3461 }
 0x75d   :  { %v3119_v42 = vmul.f32 0.6931472, %v3462_v60 }
 0x75f   :  { %v3120_v44 = vsub.f32 %v3112_v59, %v3119_v42 }
 0x761   :  { %3121 = vst.msk [vmem:[#allocation8] sm:$0xff] %vm3108_vm1, %v3120_v44 }
 0x762   :  { %3132 = dma.vmem_to_hbm [thread:$0]  %s3128_s23, 128, %s3130_s25, [#allocation5]  }
 0x763   :  { %3923 = dma.done.wait [#allocation5], 128  }
 0x764   :  { %3924 = vsyncadd [#allocation5], 4294967168 }
 0x765   :  { %3137 = vsyncpa [#allocation4], 1 }
 0x766   :  { %3138 = vsyncpa [#allocation7], 1 }
 0x767   :  { %3139 = vsyncpa [#allocation5], 1 }

</bundles_post_ra>
